<compile_context>
chip_gen: v7x
topology: tpu7x:2x2x1
jax: 0.10.0
libtpu: 0.0.40
codegen_flags: <defaults>
</compile_context>

<pallas_src>
import functools

import jax
import jax.numpy as jnp
from jax.experimental import pallas as pl
from jax.experimental.pallas import tpu as pltpu


def _fast_sigmoid(x):
    # exp (EUP) + approximate reciprocal (EUP) -> no full-precision divide on the serial
    # recurrence chain. Saturates correctly at 0/1 for large |x| (no NaNs).
    return pl.reciprocal(1.0 + jnp.exp(-x), approx=True)


def _lstm_kernel(x_ref, wih_ref, whh_ref, b_ref, out_ref, gx_sc):
    """Full LSTM sequence in a single (gridless) kernel invocation.

    x_ref  : (T*B, D)   f32, time-major rows; row t*B + b == timestep t, batch element b
    wih_ref: (D, 4H)    f32,  W_ih^T
    whh_ref: (H, 4H)    bf16, W_hh^T (bf16 MXU operand for the recurrent matmul)
    b_ref  : (1, 4H)    f32,  b_ih + b_hh
    out_ref: (B, H)     f32,  hidden state after the last timestep
    gx_sc  : (T*B, 4H)  f32 VMEM scratch holding the hoisted input projections
    """
    TB = x_ref.shape[0]
    B, H = out_ref.shape
    T = TB // B

    # Hoisted input projection: one matmul over all timesteps (off the serial critical
    # path), bias folded in. Kept f32 (tiny; keeps the reference check tight). Result is
    # lane-dense (4H columns).
    gx_sc[...] = (
        jnp.dot(x_ref[...], wih_ref[...], preferred_element_type=jnp.float32)
        + b_ref[...]
    )

    whh = whh_ref[...]                      # bf16 (H, 4H), resident for the whole loop
    h = jnp.zeros((B, H), jnp.float32)
    c = jnp.zeros((B, H), jnp.float32)

    # Serial recurrence, fully unrolled (T static, small). PyTorch gate order [i, f, g, o].
    # TODO(synk): hold W_hh^T in MXU weight-staging registers across the recurrence
    #   (pltpu.matmul_push_rhs once + matmul_acc_lhs/matmul_pop per step) to also remove
    #   the per-step weight-fill latency from the critical path.
    # TODO(synk): switch the static unroll to lax.fori_loop(0, T, ..., unroll=<small>)
    #   carrying (h, c) if T grows beyond ~32 in production (vreg pressure / compile time).
    for t in range(T):
        gates = gx_sc[t * B:(t + 1) * B, :] + jnp.dot(
            h.astype(jnp.bfloat16), whh, preferred_element_type=jnp.float32)
        i_g = _fast_sigmoid(gates[:, 0 * H:1 * H])
        f_g = _fast_sigmoid(gates[:, 1 * H:2 * H])
        g_g = jnp.tanh(gates[:, 2 * H:3 * H])
        o_g = _fast_sigmoid(gates[:, 3 * H:4 * H])
        c = f_g * c + i_g * g_g
        h = o_g * jnp.tanh(c)

    # Single store, only after the final timestep.
    out_ref[...] = h.astype(out_ref.dtype)


def lstm_last_hidden_pallas(x_flat, w_ih_t, w_hh_t_bf16, bias_row, *, batch):
    """x_flat: (T*B, D) time-major rows; returns (B, H) = hidden state after last timestep."""
    TB, D = x_flat.shape
    H = w_hh_t_bf16.shape[0]
    B = batch
    assert TB % B == 0
    assert w_ih_t.shape == (D, 4 * H)
    assert w_hh_t_bf16.shape == (H, 4 * H)
    assert bias_row.shape == (1, 4 * H)

    # Gridless call: single invocation, whole operands resident in VMEM, single-buffered.
    # TODO(synk): at production shapes (bert_dim 768-1024, large T*B) chunk the time axis
    #   (grid=(T//Tc,) marked "arbitrary", h/c carried in persistent VMEM scratch, gx
    #   computed per chunk) so the working set fits v7x's 64 MiB VMEM, and add a "parallel"
    #   batch-chunk axis to shard across v7x's two TensorCores once batch >= ~16.
    return pl.pallas_call(
        _lstm_kernel,
        out_shape=jax.ShapeDtypeStruct((B, H), jnp.float32),
        in_specs=[
            pl.BlockSpec(memory_space=pltpu.MemorySpace.VMEM),   # x, all timesteps
            pl.BlockSpec(memory_space=pltpu.MemorySpace.VMEM),   # W_ih^T (f32)
            pl.BlockSpec(memory_space=pltpu.MemorySpace.VMEM),   # W_hh^T (bf16)
            pl.BlockSpec(memory_space=pltpu.MemorySpace.VMEM),   # combined bias
        ],
        out_specs=pl.BlockSpec(memory_space=pltpu.MemorySpace.VMEM),
        scratch_shapes=[
            pltpu.VMEM((TB, 4 * H), jnp.float32),                # hoisted gate projections
        ],
    )(x_flat, w_ih_t, w_hh_t_bf16, bias_row)


class LSTMPallas:
    """Mirror of the PyTorch `LSTM` module (num_layers=1, unidirectional)."""

    def __init__(self, input_channel, bert_dim, key):
        D, H = input_channel, bert_dim
        k1, k2, k3, k4 = jax.random.split(key, 4)
        bound = 1.0 / jnp.sqrt(jnp.float32(H))     # PyTorch default init range
        self.w_ih = jax.random.uniform(k1, (4 * H, D), jnp.float32, -bound, bound)
        self.w_hh = jax.random.uniform(k2, (4 * H, H), jnp.float32, -bound, bound)
        self.b_ih = jax.random.uniform(k3, (4 * H,), jnp.float32, -bound, bound)
        self.b_hh = jax.random.uniform(k4, (4 * H,), jnp.float32, -bound, bound)
        self.D, self.H = D, H

    @functools.partial(jax.jit, static_argnums=0)
    def __call__(self, cnn_output):
        # cnn_output: (batch, seq_len, h, w)
        batch, seq_len, h, w = cnn_output.shape
        assert seq_len == self.D, "nn.LSTM input_size must equal seq_len"
        x = cnn_output.reshape(batch, seq_len, h * w)     # view
        x = jnp.transpose(x, (2, 0, 1))                   # permute(2,0,1) -> (T, B, D)
        T, B, D = x.shape
        x_flat = x.reshape(T * B, D).astype(jnp.float32)  # layout plumbing only (XLA reshape)
        out = lstm_last_hidden_pallas(
            x_flat,
            jnp.transpose(self.w_ih),                             # (D, 4H) f32
            jnp.transpose(self.w_hh).astype(jnp.bfloat16),        # (H, 4H) bf16 MXU operand
            (self.b_ih + self.b_hh)[None, :],                     # (1, 4H) f32
            batch=batch,
        )
        return out                                        # (batch, bert_dim)


def _lstm_ref(x_tbd, w_ih, w_hh, b_ih, b_hh):
    """Pure-JAX f32 reference (PyTorch LSTM semantics) for validation."""
    T, B, D = x_tbd.shape
    H = w_hh.shape[1]

    def step(carry, x_t):
        h, c = carry
        gates = x_t @ w_ih.T + b_ih + h @ w_hh.T + b_hh
        i, f, g, o = jnp.split(gates, 4, axis=-1)
        i, f, g, o = jax.nn.sigmoid(i), jax.nn.sigmoid(f), jnp.tanh(g), jax.nn.sigmoid(o)
        c = f * c + i * g
        h = o * jnp.tanh(c)
        return (h, c), None

    (h, _), _ = jax.lax.scan(step, (jnp.zeros((B, H)), jnp.zeros((B, H))), x_tbd)
    return h


if __name__ == "__main__":
    # Small shapes consistent with the forward:
    #   input_channel == seq_len (LSTM input_size), LSTM sequence length == h*w.
    batch, seq_len, hh, ww = 2, 8, 4, 4        # x: (2, 8, 4, 4) -> T = 16, D = 8
    bert_dim = 128                             # hidden size (lane-aligned)

    key = jax.random.PRNGKey(0)
    kx, kp = jax.random.split(key)
    x = jax.random.normal(kx, (batch, seq_len, hh, ww), dtype=jnp.float32)

    model = LSTMPallas(input_channel=seq_len, bert_dim=bert_dim, key=kp)
    out = model(x)
    out = jax.block_until_ready(out)
    assert out.shape == (batch, bert_dim)

    # Cross-check against pure-JAX f32 reference. Tolerance loosened (2e-2) to cover the
    # bf16 MXU operands of the recurrent matmul and the approx EUP reciprocal in sigmoid.
    x_tbd = jnp.transpose(x.reshape(batch, seq_len, hh * ww), (2, 0, 1))
    ref = _lstm_ref(x_tbd, model.w_ih, model.w_hh, model.b_ih, model.b_hh)
    assert jnp.allclose(out, ref, atol=2e-2, rtol=2e-2), "mismatch vs reference"

    print("KERNEL_OK")
</pallas_src>

<mosaic_0001>
module attributes {stable_mosaic.version = 11 : i64} {
  func.func @_lstm_kernel(%arg0: memref<32x8xf32, #tpu.memory_space<vmem>>, %arg1: memref<8x512xf32, #tpu.memory_space<vmem>>, %arg2: memref<128x512xbf16, #tpu.memory_space<vmem>>, %arg3: memref<1x512xf32, #tpu.memory_space<vmem>>, %arg4: memref<2x128xf32, #tpu.memory_space<vmem>>, %arg5: memref<32x512xf32, #tpu.memory_space<vmem>>) attributes {dimension_semantics = [], scalar_prefetch = 0 : i64, scratch_operands = 1 : i64, tpu.core_type = #tpu.core_type<tc>} {
    %c0 = arith.constant 0 : index
    %c0_0 = arith.constant 0 : index
    %0 = vector.load %arg0[%c0, %c0_0] : memref<32x8xf32, #tpu.memory_space<vmem>>, vector<32x8xf32>
    %c0_1 = arith.constant 0 : index
    %c0_2 = arith.constant 0 : index
    %1 = vector.load %arg1[%c0_1, %c0_2] : memref<8x512xf32, #tpu.memory_space<vmem>>, vector<8x512xf32>
    %cst = arith.constant dense<0.000000e+00> : vector<32x512xf32>
    %2 = tpu.matmul %0, %1, %cst {dimension_numbers = #tpu.dot_dimension_numbers<[1], [0], [0], [1], [0, 0, 1, 1], [], []>} : vector<32x8xf32>, vector<8x512xf32>, vector<32x512xf32> -> vector<32x512xf32>
    %c0_3 = arith.constant 0 : index
    %c0_4 = arith.constant 0 : index
    %3 = vector.load %arg3[%c0_3, %c0_4] : memref<1x512xf32, #tpu.memory_space<vmem>>, vector<1x512xf32>
    %4 = vector.broadcast %3 : vector<1x512xf32> to vector<32x512xf32>
    %5 = arith.addf %2, %4 : vector<32x512xf32>
    %c0_5 = arith.constant 0 : index
    %c0_6 = arith.constant 0 : index
    %6 = vector.load %arg5[%c0_5, %c0_6] : memref<32x512xf32, #tpu.memory_space<vmem>>, vector<32x512xf32>
    tpu.vector_store %arg5[%c0_5, %c0_6], %5 {strides = array<i32>} : memref<32x512xf32, #tpu.memory_space<vmem>>, vector<32x512xf32>,
    %c0_7 = arith.constant 0 : index
    %c0_8 = arith.constant 0 : index
    %7 = vector.load %arg2[%c0_7, %c0_8] : memref<128x512xbf16, #tpu.memory_space<vmem>>, vector<128x512xbf16>
    %cst_9 = arith.constant 0.000000e+00 : f32
    %8 = vector.broadcast %cst_9 : f32 to vector<2x128xf32>
    %cst_10 = arith.constant 0.000000e+00 : f32
    %9 = vector.broadcast %cst_10 : f32 to vector<2x128xf32>
    %c0_11 = arith.constant 0 : index
    %c0_12 = arith.constant 0 : index
    %10 = vector.load %arg5[%c0_11, %c0_12] : memref<32x512xf32, #tpu.memory_space<vmem>>, vector<2x512xf32>
    %11 = arith.truncf %8 : vector<2x128xf32> to vector<2x128xbf16>
    %cst_13 = arith.constant dense<0.000000e+00> : vector<2x512xf32>
    %12 = tpu.matmul %11, %7, %cst_13 {dimension_numbers = #tpu.dot_dimension_numbers<[1], [0], [0], [1], [0, 0, 1, 1], [], []>} : vector<2x128xbf16>, vector<128x512xbf16>, vector<2x512xf32> -> vector<2x512xf32>
    %13 = arith.addf %10, %12 : vector<2x512xf32>
    %14 = vector.extract_strided_slice %13 {offsets = [0, 0], sizes = [2, 128], strides = [1, 1]} : vector<2x512xf32> to vector<2x128xf32>
    %cst_14 = arith.constant 0.000000e+00 : f32
    %15 = vector.broadcast %cst_14 : f32 to vector<2x128xf32>
    %16 = arith.subf %15, %14 : vector<2x128xf32>
    %17 = math.exp %16 : vector<2x128xf32>
    %cst_15 = arith.constant 1.000000e+00 : f32
    %18 = vector.broadcast %cst_15 : f32 to vector<2x128xf32>
    %19 = arith.addf %18, %17 : vector<2x128xf32>
    %20 = tpu.reciprocal %19 {approx = true} : vector<2x128xf32> -> vector<2x128xf32>
    %21 = vector.extract_strided_slice %13 {offsets = [0, 128], sizes = [2, 128], strides = [1, 1]} : vector<2x512xf32> to vector<2x128xf32>
    %cst_16 = arith.constant 0.000000e+00 : f32
    %22 = vector.broadcast %cst_16 : f32 to vector<2x128xf32>
    %23 = arith.subf %22, %21 : vector<2x128xf32>
    %24 = math.exp %23 : vector<2x128xf32>
    %cst_17 = arith.constant 1.000000e+00 : f32
    %25 = vector.broadcast %cst_17 : f32 to vector<2x128xf32>
    %26 = arith.addf %25, %24 : vector<2x128xf32>
    %27 = tpu.reciprocal %26 {approx = true} : vector<2x128xf32> -> vector<2x128xf32>
    %28 = vector.extract_strided_slice %13 {offsets = [0, 256], sizes = [2, 128], strides = [1, 1]} : vector<2x512xf32> to vector<2x128xf32>
    %29 = math.tanh %28 : vector<2x128xf32>
    %30 = vector.extract_strided_slice %13 {offsets = [0, 384], sizes = [2, 128], strides = [1, 1]} : vector<2x512xf32> to vector<2x128xf32>
    %cst_18 = arith.constant 0.000000e+00 : f32
    %31 = vector.broadcast %cst_18 : f32 to vector<2x128xf32>
    %32 = arith.subf %31, %30 : vector<2x128xf32>
    %33 = math.exp %32 : vector<2x128xf32>
    %cst_19 = arith.constant 1.000000e+00 : f32
    %34 = vector.broadcast %cst_19 : f32 to vector<2x128xf32>
    %35 = arith.addf %34, %33 : vector<2x128xf32>
    %36 = tpu.reciprocal %35 {approx = true} : vector<2x128xf32> -> vector<2x128xf32>
    %37 = arith.mulf %27, %9 : vector<2x128xf32>
    %38 = arith.mulf %20, %29 : vector<2x128xf32>
    %39 = arith.addf %37, %38 : vector<2x128xf32>
    %40 = math.tanh %39 : vector<2x128xf32>
    %41 = arith.mulf %36, %40 : vector<2x128xf32>
    %c2 = arith.constant 2 : index
    %c0_20 = arith.constant 0 : index
    %42 = vector.load %arg5[%c2, %c0_20] : memref<32x512xf32, #tpu.memory_space<vmem>>, vector<2x512xf32>
    %43 = arith.truncf %41 : vector<2x128xf32> to vector<2x128xbf16>
    %cst_21 = arith.constant dense<0.000000e+00> : vector<2x512xf32>
    %44 = tpu.matmul %43, %7, %cst_21 {dimension_numbers = #tpu.dot_dimension_numbers<[1], [0], [0], [1], [0, 0, 1, 1], [], []>} : vector<2x128xbf16>, vector<128x512xbf16>, vector<2x512xf32> -> vector<2x512xf32>
    %45 = arith.addf %42, %44 : vector<2x512xf32>
    %46 = vector.extract_strided_slice %45 {offsets = [0, 0], sizes = [2, 128], strides = [1, 1]} : vector<2x512xf32> to vector<2x128xf32>
    %cst_22 = arith.constant 0.000000e+00 : f32
    %47 = vector.broadcast %cst_22 : f32 to vector<2x128xf32>
    %48 = arith.subf %47, %46 : vector<2x128xf32>
    %49 = math.exp %48 : vector<2x128xf32>
    %cst_23 = arith.constant 1.000000e+00 : f32
    %50 = vector.broadcast %cst_23 : f32 to vector<2x128xf32>
    %51 = arith.addf %50, %49 : vector<2x128xf32>
    %52 = tpu.reciprocal %51 {approx = true} : vector<2x128xf32> -> vector<2x128xf32>
    %53 = vector.extract_strided_slice %45 {offsets = [0, 128], sizes = [2, 128], strides = [1, 1]} : vector<2x512xf32> to vector<2x128xf32>
    %cst_24 = arith.constant 0.000000e+00 : f32
    %54 = vector.broadcast %cst_24 : f32 to vector<2x128xf32>
    %55 = arith.subf %54, %53 : vector<2x128xf32>
    %56 = math.exp %55 : vector<2x128xf32>
    %cst_25 = arith.constant 1.000000e+00 : f32
    %57 = vector.broadcast %cst_25 : f32 to vector<2x128xf32>
    %58 = arith.addf %57, %56 : vector<2x128xf32>
    %59 = tpu.reciprocal %58 {approx = true} : vector<2x128xf32> -> vector<2x128xf32>
    %60 = vector.extract_strided_slice %45 {offsets = [0, 256], sizes = [2, 128], strides = [1, 1]} : vector<2x512xf32> to vector<2x128xf32>
    %61 = math.tanh %60 : vector<2x128xf32>
    %62 = vector.extract_strided_slice %45 {offsets = [0, 384], sizes = [2, 128], strides = [1, 1]} : vector<2x512xf32> to vector<2x128xf32>
    %cst_26 = arith.constant 0.000000e+00 : f32
    %63 = vector.broadcast %cst_26 : f32 to vector<2x128xf32>
    %64 = arith.subf %63, %62 : vector<2x128xf32>
    %65 = math.exp %64 : vector<2x128xf32>
    %cst_27 = arith.constant 1.000000e+00 : f32
    %66 = vector.broadcast %cst_27 : f32 to vector<2x128xf32>
    %67 = arith.addf %66, %65 : vector<2x128xf32>
    %68 = tpu.reciprocal %67 {approx = true} : vector<2x128xf32> -> vector<2x128xf32>
    %69 = arith.mulf %59, %39 : vector<2x128xf32>
    %70 = arith.mulf %52, %61 : vector<2x128xf32>
    %71 = arith.addf %69, %70 : vector<2x128xf32>
    %72 = math.tanh %71 : vector<2x128xf32>
    %73 = arith.mulf %68, %72 : vector<2x128xf32>
    %c4 = arith.constant 4 : index
    %c0_28 = arith.constant 0 : index
    %74 = vector.load %arg5[%c4, %c0_28] : memref<32x512xf32, #tpu.memory_space<vmem>>, vector<2x512xf32>
    %75 = arith.truncf %73 : vector<2x128xf32> to vector<2x128xbf16>
    %cst_29 = arith.constant dense<0.000000e+00> : vector<2x512xf32>
    %76 = tpu.matmul %75, %7, %cst_29 {dimension_numbers = #tpu.dot_dimension_numbers<[1], [0], [0], [1], [0, 0, 1, 1], [], []>} : vector<2x128xbf16>, vector<128x512xbf16>, vector<2x512xf32> -> vector<2x512xf32>
    %77 = arith.addf %74, %76 : vector<2x512xf32>
    %78 = vector.extract_strided_slice %77 {offsets = [0, 0], sizes = [2, 128], strides = [1, 1]} : vector<2x512xf32> to vector<2x128xf32>
    %cst_30 = arith.constant 0.000000e+00 : f32
    %79 = vector.broadcast %cst_30 : f32 to vector<2x128xf32>
    %80 = arith.subf %79, %78 : vector<2x128xf32>
    %81 = math.exp %80 : vector<2x128xf32>
    %cst_31 = arith.constant 1.000000e+00 : f32
    %82 = vector.broadcast %cst_31 : f32 to vector<2x128xf32>
    %83 = arith.addf %82, %81 : vector<2x128xf32>
    %84 = tpu.reciprocal %83 {approx = true} : vector<2x128xf32> -> vector<2x128xf32>
    %85 = vector.extract_strided_slice %77 {offsets = [0, 128], sizes = [2, 128], strides = [1, 1]} : vector<2x512xf32> to vector<2x128xf32>
    %cst_32 = arith.constant 0.000000e+00 : f32
    %86 = vector.broadcast %cst_32 : f32 to vector<2x128xf32>
    %87 = arith.subf %86, %85 : vector<2x128xf32>
    %88 = math.exp %87 : vector<2x128xf32>
    %cst_33 = arith.constant 1.000000e+00 : f32
    %89 = vector.broadcast %cst_33 : f32 to vector<2x128xf32>
    %90 = arith.addf %89, %88 : vector<2x128xf32>
    %91 = tpu.reciprocal %90 {approx = true} : vector<2x128xf32> -> vector<2x128xf32>
    %92 = vector.extract_strided_slice %77 {offsets = [0, 256], sizes = [2, 128], strides = [1, 1]} : vector<2x512xf32> to vector<2x128xf32>
    %93 = math.tanh %92 : vector<2x128xf32>
    %94 = vector.extract_strided_slice %77 {offsets = [0, 384], sizes = [2, 128], strides = [1, 1]} : vector<2x512xf32> to vector<2x128xf32>
    %cst_34 = arith.constant 0.000000e+00 : f32
    %95 = vector.broadcast %cst_34 : f32 to vector<2x128xf32>
    %96 = arith.subf %95, %94 : vector<2x128xf32>
    %97 = math.exp %96 : vector<2x128xf32>
    %cst_35 = arith.constant 1.000000e+00 : f32
    %98 = vector.broadcast %cst_35 : f32 to vector<2x128xf32>
    %99 = arith.addf %98, %97 : vector<2x128xf32>
    %100 = tpu.reciprocal %99 {approx = true} : vector<2x128xf32> -> vector<2x128xf32>
    %101 = arith.mulf %91, %71 : vector<2x128xf32>
    %102 = arith.mulf %84, %93 : vector<2x128xf32>
    %103 = arith.addf %101, %102 : vector<2x128xf32>
    %104 = math.tanh %103 : vector<2x128xf32>
    %105 = arith.mulf %100, %104 : vector<2x128xf32>
    %c6 = arith.constant 6 : index
    %c0_36 = arith.constant 0 : index
    %106 = vector.load %arg5[%c6, %c0_36] : memref<32x512xf32, #tpu.memory_space<vmem>>, vector<2x512xf32>
    %107 = arith.truncf %105 : vector<2x128xf32> to vector<2x128xbf16>
    %cst_37 = arith.constant dense<0.000000e+00> : vector<2x512xf32>
    %108 = tpu.matmul %107, %7, %cst_37 {dimension_numbers = #tpu.dot_dimension_numbers<[1], [0], [0], [1], [0, 0, 1, 1], [], []>} : vector<2x128xbf16>, vector<128x512xbf16>, vector<2x512xf32> -> vector<2x512xf32>
    %109 = arith.addf %106, %108 : vector<2x512xf32>
    %110 = vector.extract_strided_slice %109 {offsets = [0, 0], sizes = [2, 128], strides = [1, 1]} : vector<2x512xf32> to vector<2x128xf32>
    %cst_38 = arith.constant 0.000000e+00 : f32
    %111 = vector.broadcast %cst_38 : f32 to vector<2x128xf32>
    %112 = arith.subf %111, %110 : vector<2x128xf32>
    %113 = math.exp %112 : vector<2x128xf32>
    %cst_39 = arith.constant 1.000000e+00 : f32
    %114 = vector.broadcast %cst_39 : f32 to vector<2x128xf32>
    %115 = arith.addf %114, %113 : vector<2x128xf32>
    %116 = tpu.reciprocal %115 {approx = true} : vector<2x128xf32> -> vector<2x128xf32>
    %117 = vector.extract_strided_slice %109 {offsets = [0, 128], sizes = [2, 128], strides = [1, 1]} : vector<2x512xf32> to vector<2x128xf32>
    %cst_40 = arith.constant 0.000000e+00 : f32
    %118 = vector.broadcast %cst_40 : f32 to vector<2x128xf32>
    %119 = arith.subf %118, %117 : vector<2x128xf32>
    %120 = math.exp %119 : vector<2x128xf32>
    %cst_41 = arith.constant 1.000000e+00 : f32
    %121 = vector.broadcast %cst_41 : f32 to vector<2x128xf32>
    %122 = arith.addf %121, %120 : vector<2x128xf32>
    %123 = tpu.reciprocal %122 {approx = true} : vector<2x128xf32> -> vector<2x128xf32>
    %124 = vector.extract_strided_slice %109 {offsets = [0, 256], sizes = [2, 128], strides = [1, 1]} : vector<2x512xf32> to vector<2x128xf32>
    %125 = math.tanh %124 : vector<2x128xf32>
    %126 = vector.extract_strided_slice %109 {offsets = [0, 384], sizes = [2, 128], strides = [1, 1]} : vector<2x512xf32> to vector<2x128xf32>
    %cst_42 = arith.constant 0.000000e+00 : f32
    %127 = vector.broadcast %cst_42 : f32 to vector<2x128xf32>
    %128 = arith.subf %127, %126 : vector<2x128xf32>
    %129 = math.exp %128 : vector<2x128xf32>
    %cst_43 = arith.constant 1.000000e+00 : f32
    %130 = vector.broadcast %cst_43 : f32 to vector<2x128xf32>
    %131 = arith.addf %130, %129 : vector<2x128xf32>
    %132 = tpu.reciprocal %131 {approx = true} : vector<2x128xf32> -> vector<2x128xf32>
    %133 = arith.mulf %123, %103 : vector<2x128xf32>
    %134 = arith.mulf %116, %125 : vector<2x128xf32>
    %135 = arith.addf %133, %134 : vector<2x128xf32>
    %136 = math.tanh %135 : vector<2x128xf32>
    %137 = arith.mulf %132, %136 : vector<2x128xf32>
    %c8 = arith.constant 8 : index
    %c0_44 = arith.constant 0 : index
    %138 = vector.load %arg5[%c8, %c0_44] : memref<32x512xf32, #tpu.memory_space<vmem>>, vector<2x512xf32>
    %139 = arith.truncf %137 : vector<2x128xf32> to vector<2x128xbf16>
    %cst_45 = arith.constant dense<0.000000e+00> : vector<2x512xf32>
    %140 = tpu.matmul %139, %7, %cst_45 {dimension_numbers = #tpu.dot_dimension_numbers<[1], [0], [0], [1], [0, 0, 1, 1], [], []>} : vector<2x128xbf16>, vector<128x512xbf16>, vector<2x512xf32> -> vector<2x512xf32>
    %141 = arith.addf %138, %140 : vector<2x512xf32>
    %142 = vector.extract_strided_slice %141 {offsets = [0, 0], sizes = [2, 128], strides = [1, 1]} : vector<2x512xf32> to vector<2x128xf32>
    %cst_46 = arith.constant 0.000000e+00 : f32
    %143 = vector.broadcast %cst_46 : f32 to vector<2x128xf32>
    %144 = arith.subf %143, %142 : vector<2x128xf32>
    %145 = math.exp %144 : vector<2x128xf32>
    %cst_47 = arith.constant 1.000000e+00 : f32
    %146 = vector.broadcast %cst_47 : f32 to vector<2x128xf32>
    %147 = arith.addf %146, %145 : vector<2x128xf32>
    %148 = tpu.reciprocal %147 {approx = true} : vector<2x128xf32> -> vector<2x128xf32>
    %149 = vector.extract_strided_slice %141 {offsets = [0, 128], sizes = [2, 128], strides = [1, 1]} : vector<2x512xf32> to vector<2x128xf32>
    %cst_48 = arith.constant 0.000000e+00 : f32
    %150 = vector.broadcast %cst_48 : f32 to vector<2x128xf32>
    %151 = arith.subf %150, %149 : vector<2x128xf32>
    %152 = math.exp %151 : vector<2x128xf32>
    %cst_49 = arith.constant 1.000000e+00 : f32
    %153 = vector.broadcast %cst_49 : f32 to vector<2x128xf32>
    %154 = arith.addf %153, %152 : vector<2x128xf32>
    %155 = tpu.reciprocal %154 {approx = true} : vector<2x128xf32> -> vector<2x128xf32>
    %156 = vector.extract_strided_slice %141 {offsets = [0, 256], sizes = [2, 128], strides = [1, 1]} : vector<2x512xf32> to vector<2x128xf32>
    %157 = math.tanh %156 : vector<2x128xf32>
    %158 = vector.extract_strided_slice %141 {offsets = [0, 384], sizes = [2, 128], strides = [1, 1]} : vector<2x512xf32> to vector<2x128xf32>
    %cst_50 = arith.constant 0.000000e+00 : f32
    %159 = vector.broadcast %cst_50 : f32 to vector<2x128xf32>
    %160 = arith.subf %159, %158 : vector<2x128xf32>
    %161 = math.exp %160 : vector<2x128xf32>
    %cst_51 = arith.constant 1.000000e+00 : f32
    %162 = vector.broadcast %cst_51 : f32 to vector<2x128xf32>
    %163 = arith.addf %162, %161 : vector<2x128xf32>
    %164 = tpu.reciprocal %163 {approx = true} : vector<2x128xf32> -> vector<2x128xf32>
    %165 = arith.mulf %155, %135 : vector<2x128xf32>
    %166 = arith.mulf %148, %157 : vector<2x128xf32>
    %167 = arith.addf %165, %166 : vector<2x128xf32>
    %168 = math.tanh %167 : vector<2x128xf32>
    %169 = arith.mulf %164, %168 : vector<2x128xf32>
    %c10 = arith.constant 10 : index
    %c0_52 = arith.constant 0 : index
    %170 = vector.load %arg5[%c10, %c0_52] : memref<32x512xf32, #tpu.memory_space<vmem>>, vector<2x512xf32>
    %171 = arith.truncf %169 : vector<2x128xf32> to vector<2x128xbf16>
    %cst_53 = arith.constant dense<0.000000e+00> : vector<2x512xf32>
    %172 = tpu.matmul %171, %7, %cst_53 {dimension_numbers = #tpu.dot_dimension_numbers<[1], [0], [0], [1], [0, 0, 1, 1], [], []>} : vector<2x128xbf16>, vector<128x512xbf16>, vector<2x512xf32> -> vector<2x512xf32>
    %173 = arith.addf %170, %172 : vector<2x512xf32>
    %174 = vector.extract_strided_slice %173 {offsets = [0, 0], sizes = [2, 128], strides = [1, 1]} : vector<2x512xf32> to vector<2x128xf32>
    %cst_54 = arith.constant 0.000000e+00 : f32
    %175 = vector.broadcast %cst_54 : f32 to vector<2x128xf32>
    %176 = arith.subf %175, %174 : vector<2x128xf32>
    %177 = math.exp %176 : vector<2x128xf32>
    %cst_55 = arith.constant 1.000000e+00 : f32
    %178 = vector.broadcast %cst_55 : f32 to vector<2x128xf32>
    %179 = arith.addf %178, %177 : vector<2x128xf32>
    %180 = tpu.reciprocal %179 {approx = true} : vector<2x128xf32> -> vector<2x128xf32>
    %181 = vector.extract_strided_slice %173 {offsets = [0, 128], sizes = [2, 128], strides = [1, 1]} : vector<2x512xf32> to vector<2x128xf32>
    %cst_56 = arith.constant 0.000000e+00 : f32
    %182 = vector.broadcast %cst_56 : f32 to vector<2x128xf32>
    %183 = arith.subf %182, %181 : vector<2x128xf32>
    %184 = math.exp %183 : vector<2x128xf32>
    %cst_57 = arith.constant 1.000000e+00 : f32
    %185 = vector.broadcast %cst_57 : f32 to vector<2x128xf32>
    %186 = arith.addf %185, %184 : vector<2x128xf32>
    %187 = tpu.reciprocal %186 {approx = true} : vector<2x128xf32> -> vector<2x128xf32>
    %188 = vector.extract_strided_slice %173 {offsets = [0, 256], sizes = [2, 128], strides = [1, 1]} : vector<2x512xf32> to vector<2x128xf32>
    %189 = math.tanh %188 : vector<2x128xf32>
    %190 = vector.extract_strided_slice %173 {offsets = [0, 384], sizes = [2, 128], strides = [1, 1]} : vector<2x512xf32> to vector<2x128xf32>
    %cst_58 = arith.constant 0.000000e+00 : f32
    %191 = vector.broadcast %cst_58 : f32 to vector<2x128xf32>
    %192 = arith.subf %191, %190 : vector<2x128xf32>
    %193 = math.exp %192 : vector<2x128xf32>
    %cst_59 = arith.constant 1.000000e+00 : f32
    %194 = vector.broadcast %cst_59 : f32 to vector<2x128xf32>
    %195 = arith.addf %194, %193 : vector<2x128xf32>
    %196 = tpu.reciprocal %195 {approx = true} : vector<2x128xf32> -> vector<2x128xf32>
    %197 = arith.mulf %187, %167 : vector<2x128xf32>
    %198 = arith.mulf %180, %189 : vector<2x128xf32>
    %199 = arith.addf %197, %198 : vector<2x128xf32>
    %200 = math.tanh %199 : vector<2x128xf32>
    %201 = arith.mulf %196, %200 : vector<2x128xf32>
    %c12 = arith.constant 12 : index
    %c0_60 = arith.constant 0 : index
    %202 = vector.load %arg5[%c12, %c0_60] : memref<32x512xf32, #tpu.memory_space<vmem>>, vector<2x512xf32>
    %203 = arith.truncf %201 : vector<2x128xf32> to vector<2x128xbf16>
    %cst_61 = arith.constant dense<0.000000e+00> : vector<2x512xf32>
    %204 = tpu.matmul %203, %7, %cst_61 {dimension_numbers = #tpu.dot_dimension_numbers<[1], [0], [0], [1], [0, 0, 1, 1], [], []>} : vector<2x128xbf16>, vector<128x512xbf16>, vector<2x512xf32> -> vector<2x512xf32>
    %205 = arith.addf %202, %204 : vector<2x512xf32>
    %206 = vector.extract_strided_slice %205 {offsets = [0, 0], sizes = [2, 128], strides = [1, 1]} : vector<2x512xf32> to vector<2x128xf32>
    %cst_62 = arith.constant 0.000000e+00 : f32
    %207 = vector.broadcast %cst_62 : f32 to vector<2x128xf32>
    %208 = arith.subf %207, %206 : vector<2x128xf32>
    %209 = math.exp %208 : vector<2x128xf32>
    %cst_63 = arith.constant 1.000000e+00 : f32
    %210 = vector.broadcast %cst_63 : f32 to vector<2x128xf32>
    %211 = arith.addf %210, %209 : vector<2x128xf32>
    %212 = tpu.reciprocal %211 {approx = true} : vector<2x128xf32> -> vector<2x128xf32>
    %213 = vector.extract_strided_slice %205 {offsets = [0, 128], sizes = [2, 128], strides = [1, 1]} : vector<2x512xf32> to vector<2x128xf32>
    %cst_64 = arith.constant 0.000000e+00 : f32
    %214 = vector.broadcast %cst_64 : f32 to vector<2x128xf32>
    %215 = arith.subf %214, %213 : vector<2x128xf32>
    %216 = math.exp %215 : vector<2x128xf32>
    %cst_65 = arith.constant 1.000000e+00 : f32
    %217 = vector.broadcast %cst_65 : f32 to vector<2x128xf32>
    %218 = arith.addf %217, %216 : vector<2x128xf32>
    %219 = tpu.reciprocal %218 {approx = true} : vector<2x128xf32> -> vector<2x128xf32>
    %220 = vector.extract_strided_slice %205 {offsets = [0, 256], sizes = [2, 128], strides = [1, 1]} : vector<2x512xf32> to vector<2x128xf32>
    %221 = math.tanh %220 : vector<2x128xf32>
    %222 = vector.extract_strided_slice %205 {offsets = [0, 384], sizes = [2, 128], strides = [1, 1]} : vector<2x512xf32> to vector<2x128xf32>
    %cst_66 = arith.constant 0.000000e+00 : f32
    %223 = vector.broadcast %cst_66 : f32 to vector<2x128xf32>
    %224 = arith.subf %223, %222 : vector<2x128xf32>
    %225 = math.exp %224 : vector<2x128xf32>
    %cst_67 = arith.constant 1.000000e+00 : f32
    %226 = vector.broadcast %cst_67 : f32 to vector<2x128xf32>
    %227 = arith.addf %226, %225 : vector<2x128xf32>
    %228 = tpu.reciprocal %227 {approx = true} : vector<2x128xf32> -> vector<2x128xf32>
    %229 = arith.mulf %219, %199 : vector<2x128xf32>
    %230 = arith.mulf %212, %221 : vector<2x128xf32>
    %231 = arith.addf %229, %230 : vector<2x128xf32>
    %232 = math.tanh %231 : vector<2x128xf32>
    %233 = arith.mulf %228, %232 : vector<2x128xf32>
    %c14 = arith.constant 14 : index
    %c0_68 = arith.constant 0 : index
    %234 = vector.load %arg5[%c14, %c0_68] : memref<32x512xf32, #tpu.memory_space<vmem>>, vector<2x512xf32>
    %235 = arith.truncf %233 : vector<2x128xf32> to vector<2x128xbf16>
    %cst_69 = arith.constant dense<0.000000e+00> : vector<2x512xf32>
    %236 = tpu.matmul %235, %7, %cst_69 {dimension_numbers = #tpu.dot_dimension_numbers<[1], [0], [0], [1], [0, 0, 1, 1], [], []>} : vector<2x128xbf16>, vector<128x512xbf16>, vector<2x512xf32> -> vector<2x512xf32>
    %237 = arith.addf %234, %236 : vector<2x512xf32>
    %238 = vector.extract_strided_slice %237 {offsets = [0, 0], sizes = [2, 128], strides = [1, 1]} : vector<2x512xf32> to vector<2x128xf32>
    %cst_70 = arith.constant 0.000000e+00 : f32
    %239 = vector.broadcast %cst_70 : f32 to vector<2x128xf32>
    %240 = arith.subf %239, %238 : vector<2x128xf32>
    %241 = math.exp %240 : vector<2x128xf32>
    %cst_71 = arith.constant 1.000000e+00 : f32
    %242 = vector.broadcast %cst_71 : f32 to vector<2x128xf32>
    %243 = arith.addf %242, %241 : vector<2x128xf32>
    %244 = tpu.reciprocal %243 {approx = true} : vector<2x128xf32> -> vector<2x128xf32>
    %245 = vector.extract_strided_slice %237 {offsets = [0, 128], sizes = [2, 128], strides = [1, 1]} : vector<2x512xf32> to vector<2x128xf32>
    %cst_72 = arith.constant 0.000000e+00 : f32
    %246 = vector.broadcast %cst_72 : f32 to vector<2x128xf32>
    %247 = arith.subf %246, %245 : vector<2x128xf32>
    %248 = math.exp %247 : vector<2x128xf32>
    %cst_73 = arith.constant 1.000000e+00 : f32
    %249 = vector.broadcast %cst_73 : f32 to vector<2x128xf32>
    %250 = arith.addf %249, %248 : vector<2x128xf32>
    %251 = tpu.reciprocal %250 {approx = true} : vector<2x128xf32> -> vector<2x128xf32>
    %252 = vector.extract_strided_slice %237 {offsets = [0, 256], sizes = [2, 128], strides = [1, 1]} : vector<2x512xf32> to vector<2x128xf32>
    %253 = math.tanh %252 : vector<2x128xf32>
    %254 = vector.extract_strided_slice %237 {offsets = [0, 384], sizes = [2, 128], strides = [1, 1]} : vector<2x512xf32> to vector<2x128xf32>
    %cst_74 = arith.constant 0.000000e+00 : f32
    %255 = vector.broadcast %cst_74 : f32 to vector<2x128xf32>
    %256 = arith.subf %255, %254 : vector<2x128xf32>
    %257 = math.exp %256 : vector<2x128xf32>
    %cst_75 = arith.constant 1.000000e+00 : f32
    %258 = vector.broadcast %cst_75 : f32 to vector<2x128xf32>
    %259 = arith.addf %258, %257 : vector<2x128xf32>
    %260 = tpu.reciprocal %259 {approx = true} : vector<2x128xf32> -> vector<2x128xf32>
    %261 = arith.mulf %251, %231 : vector<2x128xf32>
    %262 = arith.mulf %244, %253 : vector<2x128xf32>
    %263 = arith.addf %261, %262 : vector<2x128xf32>
    %264 = math.tanh %263 : vector<2x128xf32>
    %265 = arith.mulf %260, %264 : vector<2x128xf32>
    %c16 = arith.constant 16 : index
    %c0_76 = arith.constant 0 : index
    %266 = vector.load %arg5[%c16, %c0_76] : memref<32x512xf32, #tpu.memory_space<vmem>>, vector<2x512xf32>
    %267 = arith.truncf %265 : vector<2x128xf32> to vector<2x128xbf16>
    %cst_77 = arith.constant dense<0.000000e+00> : vector<2x512xf32>
    %268 = tpu.matmul %267, %7, %cst_77 {dimension_numbers = #tpu.dot_dimension_numbers<[1], [0], [0], [1], [0, 0, 1, 1], [], []>} : vector<2x128xbf16>, vector<128x512xbf16>, vector<2x512xf32> -> vector<2x512xf32>
    %269 = arith.addf %266, %268 : vector<2x512xf32>
    %270 = vector.extract_strided_slice %269 {offsets = [0, 0], sizes = [2, 128], strides = [1, 1]} : vector<2x512xf32> to vector<2x128xf32>
    %cst_78 = arith.constant 0.000000e+00 : f32
    %271 = vector.broadcast %cst_78 : f32 to vector<2x128xf32>
    %272 = arith.subf %271, %270 : vector<2x128xf32>
    %273 = math.exp %272 : vector<2x128xf32>
    %cst_79 = arith.constant 1.000000e+00 : f32
    %274 = vector.broadcast %cst_79 : f32 to vector<2x128xf32>
    %275 = arith.addf %274, %273 : vector<2x128xf32>
    %276 = tpu.reciprocal %275 {approx = true} : vector<2x128xf32> -> vector<2x128xf32>
    %277 = vector.extract_strided_slice %269 {offsets = [0, 128], sizes = [2, 128], strides = [1, 1]} : vector<2x512xf32> to vector<2x128xf32>
    %cst_80 = arith.constant 0.000000e+00 : f32
    %278 = vector.broadcast %cst_80 : f32 to vector<2x128xf32>
    %279 = arith.subf %278, %277 : vector<2x128xf32>
    %280 = math.exp %279 : vector<2x128xf32>
    %cst_81 = arith.constant 1.000000e+00 : f32
    %281 = vector.broadcast %cst_81 : f32 to vector<2x128xf32>
    %282 = arith.addf %281, %280 : vector<2x128xf32>
    %283 = tpu.reciprocal %282 {approx = true} : vector<2x128xf32> -> vector<2x128xf32>
    %284 = vector.extract_strided_slice %269 {offsets = [0, 256], sizes = [2, 128], strides = [1, 1]} : vector<2x512xf32> to vector<2x128xf32>
    %285 = math.tanh %284 : vector<2x128xf32>
    %286 = vector.extract_strided_slice %269 {offsets = [0, 384], sizes = [2, 128], strides = [1, 1]} : vector<2x512xf32> to vector<2x128xf32>
    %cst_82 = arith.constant 0.000000e+00 : f32
    %287 = vector.broadcast %cst_82 : f32 to vector<2x128xf32>
    %288 = arith.subf %287, %286 : vector<2x128xf32>
    %289 = math.exp %288 : vector<2x128xf32>
    %cst_83 = arith.constant 1.000000e+00 : f32
    %290 = vector.broadcast %cst_83 : f32 to vector<2x128xf32>
    %291 = arith.addf %290, %289 : vector<2x128xf32>
    %292 = tpu.reciprocal %291 {approx = true} : vector<2x128xf32> -> vector<2x128xf32>
    %293 = arith.mulf %283, %263 : vector<2x128xf32>
    %294 = arith.mulf %276, %285 : vector<2x128xf32>
    %295 = arith.addf %293, %294 : vector<2x128xf32>
    %296 = math.tanh %295 : vector<2x128xf32>
    %297 = arith.mulf %292, %296 : vector<2x128xf32>
    %c18 = arith.constant 18 : index
    %c0_84 = arith.constant 0 : index
    %298 = vector.load %arg5[%c18, %c0_84] : memref<32x512xf32, #tpu.memory_space<vmem>>, vector<2x512xf32>
    %299 = arith.truncf %297 : vector<2x128xf32> to vector<2x128xbf16>
    %cst_85 = arith.constant dense<0.000000e+00> : vector<2x512xf32>
    %300 = tpu.matmul %299, %7, %cst_85 {dimension_numbers = #tpu.dot_dimension_numbers<[1], [0], [0], [1], [0, 0, 1, 1], [], []>} : vector<2x128xbf16>, vector<128x512xbf16>, vector<2x512xf32> -> vector<2x512xf32>
    %301 = arith.addf %298, %300 : vector<2x512xf32>
    %302 = vector.extract_strided_slice %301 {offsets = [0, 0], sizes = [2, 128], strides = [1, 1]} : vector<2x512xf32> to vector<2x128xf32>
    %cst_86 = arith.constant 0.000000e+00 : f32
    %303 = vector.broadcast %cst_86 : f32 to vector<2x128xf32>
    %304 = arith.subf %303, %302 : vector<2x128xf32>
    %305 = math.exp %304 : vector<2x128xf32>
    %cst_87 = arith.constant 1.000000e+00 : f32
    %306 = vector.broadcast %cst_87 : f32 to vector<2x128xf32>
    %307 = arith.addf %306, %305 : vector<2x128xf32>
    %308 = tpu.reciprocal %307 {approx = true} : vector<2x128xf32> -> vector<2x128xf32>
    %309 = vector.extract_strided_slice %301 {offsets = [0, 128], sizes = [2, 128], strides = [1, 1]} : vector<2x512xf32> to vector<2x128xf32>
    %cst_88 = arith.constant 0.000000e+00 : f32
    %310 = vector.broadcast %cst_88 : f32 to vector<2x128xf32>
    %311 = arith.subf %310, %309 : vector<2x128xf32>
    %312 = math.exp %311 : vector<2x128xf32>
    %cst_89 = arith.constant 1.000000e+00 : f32
    %313 = vector.broadcast %cst_89 : f32 to vector<2x128xf32>
    %314 = arith.addf %313, %312 : vector<2x128xf32>
    %315 = tpu.reciprocal %314 {approx = true} : vector<2x128xf32> -> vector<2x128xf32>
    %316 = vector.extract_strided_slice %301 {offsets = [0, 256], sizes = [2, 128], strides = [1, 1]} : vector<2x512xf32> to vector<2x128xf32>
    %317 = math.tanh %316 : vector<2x128xf32>
    %318 = vector.extract_strided_slice %301 {offsets = [0, 384], sizes = [2, 128], strides = [1, 1]} : vector<2x512xf32> to vector<2x128xf32>
    %cst_90 = arith.constant 0.000000e+00 : f32
    %319 = vector.broadcast %cst_90 : f32 to vector<2x128xf32>
    %320 = arith.subf %319, %318 : vector<2x128xf32>
    %321 = math.exp %320 : vector<2x128xf32>
    %cst_91 = arith.constant 1.000000e+00 : f32
    %322 = vector.broadcast %cst_91 : f32 to vector<2x128xf32>
    %323 = arith.addf %322, %321 : vector<2x128xf32>
    %324 = tpu.reciprocal %323 {approx = true} : vector<2x128xf32> -> vector<2x128xf32>
    %325 = arith.mulf %315, %295 : vector<2x128xf32>
    %326 = arith.mulf %308, %317 : vector<2x128xf32>
    %327 = arith.addf %325, %326 : vector<2x128xf32>
    %328 = math.tanh %327 : vector<2x128xf32>
    %329 = arith.mulf %324, %328 : vector<2x128xf32>
    %c20 = arith.constant 20 : index
    %c0_92 = arith.constant 0 : index
    %330 = vector.load %arg5[%c20, %c0_92] : memref<32x512xf32, #tpu.memory_space<vmem>>, vector<2x512xf32>
    %331 = arith.truncf %329 : vector<2x128xf32> to vector<2x128xbf16>
    %cst_93 = arith.constant dense<0.000000e+00> : vector<2x512xf32>
    %332 = tpu.matmul %331, %7, %cst_93 {dimension_numbers = #tpu.dot_dimension_numbers<[1], [0], [0], [1], [0, 0, 1, 1], [], []>} : vector<2x128xbf16>, vector<128x512xbf16>, vector<2x512xf32> -> vector<2x512xf32>
    %333 = arith.addf %330, %332 : vector<2x512xf32>
    %334 = vector.extract_strided_slice %333 {offsets = [0, 0], sizes = [2, 128], strides = [1, 1]} : vector<2x512xf32> to vector<2x128xf32>
    %cst_94 = arith.constant 0.000000e+00 : f32
    %335 = vector.broadcast %cst_94 : f32 to vector<2x128xf32>
    %336 = arith.subf %335, %334 : vector<2x128xf32>
    %337 = math.exp %336 : vector<2x128xf32>
    %cst_95 = arith.constant 1.000000e+00 : f32
    %338 = vector.broadcast %cst_95 : f32 to vector<2x128xf32>
    %339 = arith.addf %338, %337 : vector<2x128xf32>
    %340 = tpu.reciprocal %339 {approx = true} : vector<2x128xf32> -> vector<2x128xf32>
    %341 = vector.extract_strided_slice %333 {offsets = [0, 128], sizes = [2, 128], strides = [1, 1]} : vector<2x512xf32> to vector<2x128xf32>
    %cst_96 = arith.constant 0.000000e+00 : f32
    %342 = vector.broadcast %cst_96 : f32 to vector<2x128xf32>
    %343 = arith.subf %342, %341 : vector<2x128xf32>
    %344 = math.exp %343 : vector<2x128xf32>
    %cst_97 = arith.constant 1.000000e+00 : f32
    %345 = vector.broadcast %cst_97 : f32 to vector<2x128xf32>
    %346 = arith.addf %345, %344 : vector<2x128xf32>
    %347 = tpu.reciprocal %346 {approx = true} : vector<2x128xf32> -> vector<2x128xf32>
    %348 = vector.extract_strided_slice %333 {offsets = [0, 256], sizes = [2, 128], strides = [1, 1]} : vector<2x512xf32> to vector<2x128xf32>
    %349 = math.tanh %348 : vector<2x128xf32>
    %350 = vector.extract_strided_slice %333 {offsets = [0, 384], sizes = [2, 128], strides = [1, 1]} : vector<2x512xf32> to vector<2x128xf32>
    %cst_98 = arith.constant 0.000000e+00 : f32
    %351 = vector.broadcast %cst_98 : f32 to vector<2x128xf32>
    %352 = arith.subf %351, %350 : vector<2x128xf32>
    %353 = math.exp %352 : vector<2x128xf32>
    %cst_99 = arith.constant 1.000000e+00 : f32
    %354 = vector.broadcast %cst_99 : f32 to vector<2x128xf32>
    %355 = arith.addf %354, %353 : vector<2x128xf32>
    %356 = tpu.reciprocal %355 {approx = true} : vector<2x128xf32> -> vector<2x128xf32>
    %357 = arith.mulf %347, %327 : vector<2x128xf32>
    %358 = arith.mulf %340, %349 : vector<2x128xf32>
    %359 = arith.addf %357, %358 : vector<2x128xf32>
    %360 = math.tanh %359 : vector<2x128xf32>
    %361 = arith.mulf %356, %360 : vector<2x128xf32>
    %c22 = arith.constant 22 : index
    %c0_100 = arith.constant 0 : index
    %362 = vector.load %arg5[%c22, %c0_100] : memref<32x512xf32, #tpu.memory_space<vmem>>, vector<2x512xf32>
    %363 = arith.truncf %361 : vector<2x128xf32> to vector<2x128xbf16>
    %cst_101 = arith.constant dense<0.000000e+00> : vector<2x512xf32>
    %364 = tpu.matmul %363, %7, %cst_101 {dimension_numbers = #tpu.dot_dimension_numbers<[1], [0], [0], [1], [0, 0, 1, 1], [], []>} : vector<2x128xbf16>, vector<128x512xbf16>, vector<2x512xf32> -> vector<2x512xf32>
    %365 = arith.addf %362, %364 : vector<2x512xf32>
    %366 = vector.extract_strided_slice %365 {offsets = [0, 0], sizes = [2, 128], strides = [1, 1]} : vector<2x512xf32> to vector<2x128xf32>
    %cst_102 = arith.constant 0.000000e+00 : f32
    %367 = vector.broadcast %cst_102 : f32 to vector<2x128xf32>
    %368 = arith.subf %367, %366 : vector<2x128xf32>
    %369 = math.exp %368 : vector<2x128xf32>
    %cst_103 = arith.constant 1.000000e+00 : f32
    %370 = vector.broadcast %cst_103 : f32 to vector<2x128xf32>
    %371 = arith.addf %370, %369 : vector<2x128xf32>
    %372 = tpu.reciprocal %371 {approx = true} : vector<2x128xf32> -> vector<2x128xf32>
    %373 = vector.extract_strided_slice %365 {offsets = [0, 128], sizes = [2, 128], strides = [1, 1]} : vector<2x512xf32> to vector<2x128xf32>
    %cst_104 = arith.constant 0.000000e+00 : f32
    %374 = vector.broadcast %cst_104 : f32 to vector<2x128xf32>
    %375 = arith.subf %374, %373 : vector<2x128xf32>
    %376 = math.exp %375 : vector<2x128xf32>
    %cst_105 = arith.constant 1.000000e+00 : f32
    %377 = vector.broadcast %cst_105 : f32 to vector<2x128xf32>
    %378 = arith.addf %377, %376 : vector<2x128xf32>
    %379 = tpu.reciprocal %378 {approx = true} : vector<2x128xf32> -> vector<2x128xf32>
    %380 = vector.extract_strided_slice %365 {offsets = [0, 256], sizes = [2, 128], strides = [1, 1]} : vector<2x512xf32> to vector<2x128xf32>
    %381 = math.tanh %380 : vector<2x128xf32>
    %382 = vector.extract_strided_slice %365 {offsets = [0, 384], sizes = [2, 128], strides = [1, 1]} : vector<2x512xf32> to vector<2x128xf32>
    %cst_106 = arith.constant 0.000000e+00 : f32
    %383 = vector.broadcast %cst_106 : f32 to vector<2x128xf32>
    %384 = arith.subf %383, %382 : vector<2x128xf32>
    %385 = math.exp %384 : vector<2x128xf32>
    %cst_107 = arith.constant 1.000000e+00 : f32
    %386 = vector.broadcast %cst_107 : f32 to vector<2x128xf32>
    %387 = arith.addf %386, %385 : vector<2x128xf32>
    %388 = tpu.reciprocal %387 {approx = true} : vector<2x128xf32> -> vector<2x128xf32>
    %389 = arith.mulf %379, %359 : vector<2x128xf32>
    %390 = arith.mulf %372, %381 : vector<2x128xf32>
    %391 = arith.addf %389, %390 : vector<2x128xf32>
    %392 = math.tanh %391 : vector<2x128xf32>
    %393 = arith.mulf %388, %392 : vector<2x128xf32>
    %c24 = arith.constant 24 : index
    %c0_108 = arith.constant 0 : index
    %394 = vector.load %arg5[%c24, %c0_108] : memref<32x512xf32, #tpu.memory_space<vmem>>, vector<2x512xf32>
    %395 = arith.truncf %393 : vector<2x128xf32> to vector<2x128xbf16>
    %cst_109 = arith.constant dense<0.000000e+00> : vector<2x512xf32>
    %396 = tpu.matmul %395, %7, %cst_109 {dimension_numbers = #tpu.dot_dimension_numbers<[1], [0], [0], [1], [0, 0, 1, 1], [], []>} : vector<2x128xbf16>, vector<128x512xbf16>, vector<2x512xf32> -> vector<2x512xf32>
    %397 = arith.addf %394, %396 : vector<2x512xf32>
    %398 = vector.extract_strided_slice %397 {offsets = [0, 0], sizes = [2, 128], strides = [1, 1]} : vector<2x512xf32> to vector<2x128xf32>
    %cst_110 = arith.constant 0.000000e+00 : f32
    %399 = vector.broadcast %cst_110 : f32 to vector<2x128xf32>
    %400 = arith.subf %399, %398 : vector<2x128xf32>
    %401 = math.exp %400 : vector<2x128xf32>
    %cst_111 = arith.constant 1.000000e+00 : f32
    %402 = vector.broadcast %cst_111 : f32 to vector<2x128xf32>
    %403 = arith.addf %402, %401 : vector<2x128xf32>
    %404 = tpu.reciprocal %403 {approx = true} : vector<2x128xf32> -> vector<2x128xf32>
    %405 = vector.extract_strided_slice %397 {offsets = [0, 128], sizes = [2, 128], strides = [1, 1]} : vector<2x512xf32> to vector<2x128xf32>
    %cst_112 = arith.constant 0.000000e+00 : f32
    %406 = vector.broadcast %cst_112 : f32 to vector<2x128xf32>
    %407 = arith.subf %406, %405 : vector<2x128xf32>
    %408 = math.exp %407 : vector<2x128xf32>
    %cst_113 = arith.constant 1.000000e+00 : f32
    %409 = vector.broadcast %cst_113 : f32 to vector<2x128xf32>
    %410 = arith.addf %409, %408 : vector<2x128xf32>
    %411 = tpu.reciprocal %410 {approx = true} : vector<2x128xf32> -> vector<2x128xf32>
    %412 = vector.extract_strided_slice %397 {offsets = [0, 256], sizes = [2, 128], strides = [1, 1]} : vector<2x512xf32> to vector<2x128xf32>
    %413 = math.tanh %412 : vector<2x128xf32>
    %414 = vector.extract_strided_slice %397 {offsets = [0, 384], sizes = [2, 128], strides = [1, 1]} : vector<2x512xf32> to vector<2x128xf32>
    %cst_114 = arith.constant 0.000000e+00 : f32
    %415 = vector.broadcast %cst_114 : f32 to vector<2x128xf32>
    %416 = arith.subf %415, %414 : vector<2x128xf32>
    %417 = math.exp %416 : vector<2x128xf32>
    %cst_115 = arith.constant 1.000000e+00 : f32
    %418 = vector.broadcast %cst_115 : f32 to vector<2x128xf32>
    %419 = arith.addf %418, %417 : vector<2x128xf32>
    %420 = tpu.reciprocal %419 {approx = true} : vector<2x128xf32> -> vector<2x128xf32>
    %421 = arith.mulf %411, %391 : vector<2x128xf32>
    %422 = arith.mulf %404, %413 : vector<2x128xf32>
    %423 = arith.addf %421, %422 : vector<2x128xf32>
    %424 = math.tanh %423 : vector<2x128xf32>
    %425 = arith.mulf %420, %424 : vector<2x128xf32>
    %c26 = arith.constant 26 : index
    %c0_116 = arith.constant 0 : index
    %426 = vector.load %arg5[%c26, %c0_116] : memref<32x512xf32, #tpu.memory_space<vmem>>, vector<2x512xf32>
    %427 = arith.truncf %425 : vector<2x128xf32> to vector<2x128xbf16>
    %cst_117 = arith.constant dense<0.000000e+00> : vector<2x512xf32>
    %428 = tpu.matmul %427, %7, %cst_117 {dimension_numbers = #tpu.dot_dimension_numbers<[1], [0], [0], [1], [0, 0, 1, 1], [], []>} : vector<2x128xbf16>, vector<128x512xbf16>, vector<2x512xf32> -> vector<2x512xf32>
    %429 = arith.addf %426, %428 : vector<2x512xf32>
    %430 = vector.extract_strided_slice %429 {offsets = [0, 0], sizes = [2, 128], strides = [1, 1]} : vector<2x512xf32> to vector<2x128xf32>
    %cst_118 = arith.constant 0.000000e+00 : f32
    %431 = vector.broadcast %cst_118 : f32 to vector<2x128xf32>
    %432 = arith.subf %431, %430 : vector<2x128xf32>
    %433 = math.exp %432 : vector<2x128xf32>
    %cst_119 = arith.constant 1.000000e+00 : f32
    %434 = vector.broadcast %cst_119 : f32 to vector<2x128xf32>
    %435 = arith.addf %434, %433 : vector<2x128xf32>
    %436 = tpu.reciprocal %435 {approx = true} : vector<2x128xf32> -> vector<2x128xf32>
    %437 = vector.extract_strided_slice %429 {offsets = [0, 128], sizes = [2, 128], strides = [1, 1]} : vector<2x512xf32> to vector<2x128xf32>
    %cst_120 = arith.constant 0.000000e+00 : f32
    %438 = vector.broadcast %cst_120 : f32 to vector<2x128xf32>
    %439 = arith.subf %438, %437 : vector<2x128xf32>
    %440 = math.exp %439 : vector<2x128xf32>
    %cst_121 = arith.constant 1.000000e+00 : f32
    %441 = vector.broadcast %cst_121 : f32 to vector<2x128xf32>
    %442 = arith.addf %441, %440 : vector<2x128xf32>
    %443 = tpu.reciprocal %442 {approx = true} : vector<2x128xf32> -> vector<2x128xf32>
    %444 = vector.extract_strided_slice %429 {offsets = [0, 256], sizes = [2, 128], strides = [1, 1]} : vector<2x512xf32> to vector<2x128xf32>
    %445 = math.tanh %444 : vector<2x128xf32>
    %446 = vector.extract_strided_slice %429 {offsets = [0, 384], sizes = [2, 128], strides = [1, 1]} : vector<2x512xf32> to vector<2x128xf32>
    %cst_122 = arith.constant 0.000000e+00 : f32
    %447 = vector.broadcast %cst_122 : f32 to vector<2x128xf32>
    %448 = arith.subf %447, %446 : vector<2x128xf32>
    %449 = math.exp %448 : vector<2x128xf32>
    %cst_123 = arith.constant 1.000000e+00 : f32
    %450 = vector.broadcast %cst_123 : f32 to vector<2x128xf32>
    %451 = arith.addf %450, %449 : vector<2x128xf32>
    %452 = tpu.reciprocal %451 {approx = true} : vector<2x128xf32> -> vector<2x128xf32>
    %453 = arith.mulf %443, %423 : vector<2x128xf32>
    %454 = arith.mulf %436, %445 : vector<2x128xf32>
    %455 = arith.addf %453, %454 : vector<2x128xf32>
    %456 = math.tanh %455 : vector<2x128xf32>
    %457 = arith.mulf %452, %456 : vector<2x128xf32>
    %c28 = arith.constant 28 : index
    %c0_124 = arith.constant 0 : index
    %458 = vector.load %arg5[%c28, %c0_124] : memref<32x512xf32, #tpu.memory_space<vmem>>, vector<2x512xf32>
    %459 = arith.truncf %457 : vector<2x128xf32> to vector<2x128xbf16>
    %cst_125 = arith.constant dense<0.000000e+00> : vector<2x512xf32>
    %460 = tpu.matmul %459, %7, %cst_125 {dimension_numbers = #tpu.dot_dimension_numbers<[1], [0], [0], [1], [0, 0, 1, 1], [], []>} : vector<2x128xbf16>, vector<128x512xbf16>, vector<2x512xf32> -> vector<2x512xf32>
    %461 = arith.addf %458, %460 : vector<2x512xf32>
    %462 = vector.extract_strided_slice %461 {offsets = [0, 0], sizes = [2, 128], strides = [1, 1]} : vector<2x512xf32> to vector<2x128xf32>
    %cst_126 = arith.constant 0.000000e+00 : f32
    %463 = vector.broadcast %cst_126 : f32 to vector<2x128xf32>
    %464 = arith.subf %463, %462 : vector<2x128xf32>
    %465 = math.exp %464 : vector<2x128xf32>
    %cst_127 = arith.constant 1.000000e+00 : f32
    %466 = vector.broadcast %cst_127 : f32 to vector<2x128xf32>
    %467 = arith.addf %466, %465 : vector<2x128xf32>
    %468 = tpu.reciprocal %467 {approx = true} : vector<2x128xf32> -> vector<2x128xf32>
    %469 = vector.extract_strided_slice %461 {offsets = [0, 128], sizes = [2, 128], strides = [1, 1]} : vector<2x512xf32> to vector<2x128xf32>
    %cst_128 = arith.constant 0.000000e+00 : f32
    %470 = vector.broadcast %cst_128 : f32 to vector<2x128xf32>
    %471 = arith.subf %470, %469 : vector<2x128xf32>
    %472 = math.exp %471 : vector<2x128xf32>
    %cst_129 = arith.constant 1.000000e+00 : f32
    %473 = vector.broadcast %cst_129 : f32 to vector<2x128xf32>
    %474 = arith.addf %473, %472 : vector<2x128xf32>
    %475 = tpu.reciprocal %474 {approx = true} : vector<2x128xf32> -> vector<2x128xf32>
    %476 = vector.extract_strided_slice %461 {offsets = [0, 256], sizes = [2, 128], strides = [1, 1]} : vector<2x512xf32> to vector<2x128xf32>
    %477 = math.tanh %476 : vector<2x128xf32>
    %478 = vector.extract_strided_slice %461 {offsets = [0, 384], sizes = [2, 128], strides = [1, 1]} : vector<2x512xf32> to vector<2x128xf32>
    %cst_130 = arith.constant 0.000000e+00 : f32
    %479 = vector.broadcast %cst_130 : f32 to vector<2x128xf32>
    %480 = arith.subf %479, %478 : vector<2x128xf32>
    %481 = math.exp %480 : vector<2x128xf32>
    %cst_131 = arith.constant 1.000000e+00 : f32
    %482 = vector.broadcast %cst_131 : f32 to vector<2x128xf32>
    %483 = arith.addf %482, %481 : vector<2x128xf32>
    %484 = tpu.reciprocal %483 {approx = true} : vector<2x128xf32> -> vector<2x128xf32>
    %485 = arith.mulf %475, %455 : vector<2x128xf32>
    %486 = arith.mulf %468, %477 : vector<2x128xf32>
    %487 = arith.addf %485, %486 : vector<2x128xf32>
    %488 = math.tanh %487 : vector<2x128xf32>
    %489 = arith.mulf %484, %488 : vector<2x128xf32>
    %c30 = arith.constant 30 : index
    %c0_132 = arith.constant 0 : index
    %490 = vector.load %arg5[%c30, %c0_132] : memref<32x512xf32, #tpu.memory_space<vmem>>, vector<2x512xf32>
    %491 = arith.truncf %489 : vector<2x128xf32> to vector<2x128xbf16>
    %cst_133 = arith.constant dense<0.000000e+00> : vector<2x512xf32>
    %492 = tpu.matmul %491, %7, %cst_133 {dimension_numbers = #tpu.dot_dimension_numbers<[1], [0], [0], [1], [0, 0, 1, 1], [], []>} : vector<2x128xbf16>, vector<128x512xbf16>, vector<2x512xf32> -> vector<2x512xf32>
    %493 = arith.addf %490, %492 : vector<2x512xf32>
    %494 = vector.extract_strided_slice %493 {offsets = [0, 0], sizes = [2, 128], strides = [1, 1]} : vector<2x512xf32> to vector<2x128xf32>
    %cst_134 = arith.constant 0.000000e+00 : f32
    %495 = vector.broadcast %cst_134 : f32 to vector<2x128xf32>
    %496 = arith.subf %495, %494 : vector<2x128xf32>
    %497 = math.exp %496 : vector<2x128xf32>
    %cst_135 = arith.constant 1.000000e+00 : f32
    %498 = vector.broadcast %cst_135 : f32 to vector<2x128xf32>
    %499 = arith.addf %498, %497 : vector<2x128xf32>
    %500 = tpu.reciprocal %499 {approx = true} : vector<2x128xf32> -> vector<2x128xf32>
    %501 = vector.extract_strided_slice %493 {offsets = [0, 128], sizes = [2, 128], strides = [1, 1]} : vector<2x512xf32> to vector<2x128xf32>
    %cst_136 = arith.constant 0.000000e+00 : f32
    %502 = vector.broadcast %cst_136 : f32 to vector<2x128xf32>
    %503 = arith.subf %502, %501 : vector<2x128xf32>
    %504 = math.exp %503 : vector<2x128xf32>
    %cst_137 = arith.constant 1.000000e+00 : f32
    %505 = vector.broadcast %cst_137 : f32 to vector<2x128xf32>
    %506 = arith.addf %505, %504 : vector<2x128xf32>
    %507 = tpu.reciprocal %506 {approx = true} : vector<2x128xf32> -> vector<2x128xf32>
    %508 = vector.extract_strided_slice %493 {offsets = [0, 256], sizes = [2, 128], strides = [1, 1]} : vector<2x512xf32> to vector<2x128xf32>
    %509 = math.tanh %508 : vector<2x128xf32>
    %510 = vector.extract_strided_slice %493 {offsets = [0, 384], sizes = [2, 128], strides = [1, 1]} : vector<2x512xf32> to vector<2x128xf32>
    %cst_138 = arith.constant 0.000000e+00 : f32
    %511 = vector.broadcast %cst_138 : f32 to vector<2x128xf32>
    %512 = arith.subf %511, %510 : vector<2x128xf32>
    %513 = math.exp %512 : vector<2x128xf32>
    %cst_139 = arith.constant 1.000000e+00 : f32
    %514 = vector.broadcast %cst_139 : f32 to vector<2x128xf32>
    %515 = arith.addf %514, %513 : vector<2x128xf32>
    %516 = tpu.reciprocal %515 {approx = true} : vector<2x128xf32> -> vector<2x128xf32>
    %517 = arith.mulf %507, %487 : vector<2x128xf32>
    %518 = arith.mulf %500, %509 : vector<2x128xf32>
    %519 = arith.addf %517, %518 : vector<2x128xf32>
    %520 = math.tanh %519 : vector<2x128xf32>
    %521 = arith.mulf %516, %520 : vector<2x128xf32>
    %c0_140 = arith.constant 0 : index
    %c0_141 = arith.constant 0 : index
    %522 = vector.load %arg4[%c0_140, %c0_141] : memref<2x128xf32, #tpu.memory_space<vmem>>, vector<2x128xf32>
    tpu.vector_store %arg4[%c0_140, %c0_141], %521 {strides = array<i32>} : memref<2x128xf32, #tpu.memory_space<vmem>>, vector<2x128xf32>,
    return
  }
}

</mosaic_0001>

<bundles_post_ra>
// kernel: a_call__.1
= control target key start
LH: loop header
LB: loop body
LE: loop exit
PB: predicated region body
PF: predicated region fallthrough
CT: control target
= control target key end

     0   :  { %vm49_vm0 = vcmask 64512   ;;  %v2911_v5 = vmov 0.0   ;;  %s4068_s0 = inlined_call_operand.vmem [shape: f32[32,8], index: 0, kind: input, shape index: {}]   ;;  %s4069_s1 = inlined_call_operand.vmem [shape: f32[8,512], index: 1, kind: input, shape index: {}]   ;;  %s4070_s2 = inlined_call_operand.vmem [shape: bf16[128,512], index: 2, kind: input, shape index: {}]   ;;  %s4071_s3 = inlined_call_operand.vmem [shape: f32[1,512], index: 3, kind: input, shape index: {}]   ;;  %s4072_s4 = inlined_call_operand.hbm [shape: f32[2,128], index: 4, kind: output, shape index: {}]  }
   0x1   :  { %v24_v0 = vld [vmem:[%s4069_s1 + $0x8] sm:$0xff]  ;;  %v26_v1 = vld [vmem:[%s4069_s1 + $0x18] sm:$0xff]  ;;  %v23_v2 = vld [vmem:[%s4069_s1] sm:$0xff]  ;;  %126 = vmatprep.mubr.f32.mxu0 %v2911_v5  ;;  %215 = vmatprep.mubr.f32.mxu1 %v2911_v5 }
   0x2   :  { %62 = vmatprep.subr.mxu0 %v24_v0  ;;  %151 = vmatprep.subr.mxu1 %v26_v1  ;;  %v25_v3 = vld [vmem:[%s4069_s1 + $0x10] sm:$0xff]  ;;  %v19_v4 = vld [vmem:[%s4068_s0] sm:$0xff]  ;;  %v2963_v7 = vld [vmem:[%s4070_s2 + $0xc] ss:$16 sps:$4 sm:$0xff]  }
   0x3   :  { %63 = vmatpush1.msra.mxu0 %v23_v2  ;;  %v2957_v6 = vld [vmem:[%s4070_s2 + $0x4] ss:$16 sps:$4 sm:$0xff]   ;;  %152 = vmatpush1.msra.mxu1 %v25_v3  ;;  %v2968_v8 = vld [vmem:[%s4070_s2] ss:$16 sps:$4 sm:$0xff]   ;;  %v2974_v9 = vld [vmem:[%s4070_s2 + $0x8] ss:$16 sps:$4 sm:$0xff]  }
   0x4   :  { %2476 = vmatmul.mubr.msk.f32.vlgmr.msra.gmra.mrb[0].mxu0 %vm49_vm0, %v19_v4  ;;  %452 = vmatprep.subr.bf16.mxu0 %v2957_v6  ;;  %v2981_v10 = vld [vmem:[%s4070_s2 + $0x24] ss:$16 sps:$4 sm:$0xff]   ;;  %v2988_v11 = vld [vmem:[%s4070_s2 + $0x2c] ss:$16 sps:$4 sm:$0xff]   ;;  %v2993_v12 = vld [vmem:[%s4070_s2 + $0x20] ss:$16 sps:$4 sm:$0xff]  }
   0x5   :  { %493 = vmatprep.subr.bf16.mxu1 %v2963_v7  ;;  %2480 = vmatmul.mubr.msk.f32.vlgmr.msra.gmra.mrb[0].mxu1 %vm49_vm0, %v19_v4  ;;  %v2998_v13 = vld [vmem:[%s4070_s2 + $0x28] ss:$16 sps:$4 sm:$0xff]   ;;  %v3004_v14 = vld [vmem:[%s4070_s2 + $0x44] ss:$16 sps:$4 sm:$0xff]   ;;  %v3010_v15 = vld [vmem:[%s4070_s2 + $0x4c] ss:$16 sps:$4 sm:$0xff]  }
   0x6   :  { %453 = vmatpush1.bf16.msra.mxu0 %v2968_v8  ;;  %494 = vmatpush1.bf16.msra.mxu1 %v2974_v9  ;;  %v3015_v16 = vld [vmem:[%s4070_s2 + $0x40] ss:$16 sps:$4 sm:$0xff]   ;;  %v3022_v17 = vld [vmem:[%s4070_s2 + $0x48] ss:$16 sps:$4 sm:$0xff]   ;;  %v3029_v18 = vld [vmem:[%s4070_s2 + $0x64] ss:$16 sps:$4 sm:$0xff]  }
   0x7   :  { %454 = vmatprep.subr.bf16.mxu0 %v2981_v10  ;;  %132 = vmatprep.mubr.f32.mxu0 %v2911_v5  ;;  %v3034_v19 = vld [vmem:[%s4070_s2 + $0x6c] ss:$16 sps:$4 sm:$0xff]   ;;  %v3039_v20 = vld [vmem:[%s4070_s2 + $0x60] ss:$16 sps:$4 sm:$0xff]   ;;  %v3046_v21 = vld [vmem:[%s4070_s2 + $0x68] ss:$16 sps:$4 sm:$0xff]  }
   0x8   :  { %495 = vmatprep.subr.bf16.mxu1 %v2988_v11  ;;  %221 = vmatprep.mubr.f32.mxu1 %v2911_v5  ;;  %v3051_v22 = vld [vmem:[%s4070_s2 + $0x84] ss:$16 sps:$4 sm:$0xff]   ;;  %v3056_v23 = vld [vmem:[%s4070_s2 + $0x8c] ss:$16 sps:$4 sm:$0xff]   ;;  %v3068_v25 = vld [vmem:[%s4070_s2 + $0x80] ss:$16 sps:$4 sm:$0xff]  }
   0x9   :  { %v20_v24 = vld [vmem:[%s4068_s0 + $0x8] sm:$0xff]  ;;  %v3078_v27 = vld [vmem:[%s4070_s2 + $0xa4] ss:$16 sps:$4 sm:$0xff]   ;;  %v3095_v30 = vld [vmem:[%s4070_s2 + $0xa0] ss:$16 sps:$4 sm:$0xff]  }
   0xa   :  { %455 = vmatpush1.bf16.msra.mxu0 %v2993_v12  ;;  %496 = vmatpush1.bf16.msra.mxu1 %v2998_v13  ;;  %v3073_v26 = vld [vmem:[%s4070_s2 + $0x88] ss:$16 sps:$4 sm:$0xff]   ;;  %v21_v28 = vld [vmem:[%s4068_s0 + $0x10] sm:$0xff]  ;;  %v3090_v29 = vld [vmem:[%s4070_s2 + $0xac] ss:$16 sps:$4 sm:$0xff]  }
   0xb   :  { %456 = vmatprep.subr.bf16.mxu0 %v3004_v14  ;;  %497 = vmatprep.subr.bf16.mxu1 %v3010_v15  ;;  %v22_v31 = vld [vmem:[%s4068_s0 + $0x18] sm:$0xff]  ;;  %v3114_v33 = vld [vmem:[%s4070_s2 + $0xc4] ss:$16 sps:$4 sm:$0xff]  }
   0xc   :  { %2477 = vmatmul.mubr.msk.f32.gmra.mrb[2].mxu0 %vm49_vm0, %v20_v24  ;;  %2481 = vmatmul.mubr.msk.f32.gmra.mrb[2].mxu1 %vm49_vm0, %v20_v24  ;;  %v3107_v32 = vld [vmem:[%s4070_s2 + $0xa8] ss:$16 sps:$4 sm:$0xff]   ;;  %v3119_v34 = vld [vmem:[%s4070_s2 + $0xcc] ss:$16 sps:$4 sm:$0xff]  }
   0xd   :  { %138 = vmatprep.mubr.f32.mxu0 %v2911_v5  ;;  %227 = vmatprep.mubr.f32.mxu1 %v2911_v5 }
   0xe   :  { %457 = vmatpush1.bf16.msra.mxu0 %v3015_v16  ;;  %498 = vmatpush1.bf16.msra.mxu1 %v3022_v17 }
   0xf   :  { %458 = vmatprep.subr.bf16.mxu0 %v3029_v18  ;;  %499 = vmatprep.subr.bf16.mxu1 %v3034_v19 }
  0x10   :  { %2478 = vmatmul.mubr.msk.f32.gmra.mrb[4].mxu0 %vm49_vm0, %v21_v28  ;;  %2482 = vmatmul.mubr.msk.f32.gmra.mrb[4].mxu1 %vm49_vm0, %v21_v28 }
  0x11   :  { %144 = vmatprep.mubr.f32.mxu0 %v2911_v5  ;;  %233 = vmatprep.mubr.f32.mxu1 %v2911_v5 }
  0x12   :  { %459 = vmatpush1.bf16.msra.mxu0 %v3039_v20  ;;  %500 = vmatpush1.bf16.msra.mxu1 %v3046_v21 }
  0x13   :  { %460 = vmatprep.subr.bf16.mxu0 %v3051_v22  ;;  %501 = vmatprep.subr.bf16.mxu1 %v3056_v23 }
  0x14   :  { %2479 = vmatmul.mubr.msk.f32.gmra.mrb[6].mxu0 %vm49_vm0, %v22_v31  ;;  %2483 = vmatmul.mubr.msk.f32.gmra.mrb[6].mxu1 %vm49_vm0, %v22_v31 }
  0x16   :  { %461 = vmatpush1.bf16.msra.mxu0 %v3068_v25  ;;  %502 = vmatpush1.bf16.msra.mxu1 %v3073_v26 }
  0x17   :  { %462 = vmatprep.subr.bf16.mxu0 %v3078_v27  ;;  %503 = vmatprep.subr.bf16.mxu1 %v3090_v29 }
  0x18   :  { %9 = vsyncpa [#allocation4], 0  ;;  %v2912_v35 = vmov 0   ;;  %v3130_v36 = vld [vmem:[%s4070_s2 + $0xc0] ss:$16 sps:$4 sm:$0xff]   ;;  %v29_v42 = vlaneseq }
  0x19   :  { %484 = vmatprep.mubr.bf16.mxu0 %v2912_v35  ;;  %525 = vmatprep.mubr.bf16.mxu1 %v2912_v35  ;;  %v3135_v37 = vld [vmem:[%s4070_s2 + $0xc8] ss:$16 sps:$4 sm:$0xff]   ;;  %v3142_v38 = vld [vmem:[%s4070_s2 + $0xe4] ss:$16 sps:$4 sm:$0xff]   ;;  %v3147_v39 = vld [vmem:[%s4070_s2 + $0xec] ss:$16 sps:$4 sm:$0xff]  }
  0x1a   :  { %463 = vmatpush1.bf16.msra.mxu0 %v3095_v30  ;;  %504 = vmatpush1.bf16.msra.mxu1 %v3107_v32  ;;  %v3154_v40 = vld [vmem:[%s4070_s2 + $0xe0] ss:$16 sps:$4 sm:$0xff]   ;;  %v3159_v41 = vld [vmem:[%s4070_s2 + $0xe8] ss:$16 sps:$4 sm:$0xff]   ;;  %v30_v43 = vshrl.u32 %v29_v42, 7 }
  0x1b   :  { %464 = vmatprep.subr.bf16.mxu0 %v3114_v33  ;;  %505 = vmatprep.subr.bf16.mxu1 %v3119_v34  ;;  %v27_v45 = vld [vmem:[%s4071_s3] sm:$0xf] }
  0x1c   :  { %v31_v44 = vsub.s32 0, %v30_v43  ;;  %v35_v46 = vsub.s32 1, %v30_v43  ;;  %v39_v47 = vsub.s32 2, %v30_v43  ;;  %v43_v48 = vsub.s32 3, %v30_v43 }
  0x1e   :  { %465 = vmatpush1.bf16.msra.mxu0 %v3130_v36  ;;  %506 = vmatpush1.bf16.msra.mxu1 %v3135_v37  ;;  %v32_v49 = vrot.slane %v27_v45, %v31_v44  ;;  %v36_v50 = vrot.slane %v27_v45, %v35_v46  ;;  %v40_v51 = vrot.slane %v27_v45, %v39_v47 }
  0x1f   :  { %466 = vmatprep.subr.bf16.mxu0 %v3142_v38  ;;  %507 = vmatprep.subr.bf16.mxu1 %v3147_v39  ;;  %v44_v53 = vrot.slane %v27_v45, %v43_v48 }
  0x22   :  { %467 = vmatpush1.bf16.msra.mxu0 %v3154_v40  ;;  %508 = vmatpush1.bf16.msra.mxu1 %v3159_v41 }
  0x23   :  { %564 = vmatprep.subr.bf16.mxu0 %v2957_v6  ;;  %605 = vmatprep.subr.bf16.mxu1 %v2963_v7 }
  0x25   :  { %485 = vmatmul.mubr.bf16.vlgmr.msra.gmra.mrb[8].mxu0 %v2912_v35  ;;  %526 = vmatmul.mubr.bf16.vlgmr.msra.gmra.mrb[8].mxu1 %v2912_v35 }
  0x26   :  { %565 = vmatpush1.bf16.msra.mxu0 %v2968_v8  ;;  %606 = vmatpush1.bf16.msra.mxu1 %v2974_v9 }
  0x27   :  { %566 = vmatprep.subr.bf16.mxu0 %v2981_v10  ;;  %607 = vmatprep.subr.bf16.mxu1 %v2988_v11 }
  0x28   :  { %596 = vmatprep.mubr.bf16.mxu0 %v2912_v35  ;;  %637 = vmatprep.mubr.bf16.mxu1 %v2912_v35 }
  0x2a   :  { %567 = vmatpush1.bf16.msra.mxu0 %v2993_v12  ;;  %608 = vmatpush1.bf16.msra.mxu1 %v2998_v13 }
  0x2b   :  { %568 = vmatprep.subr.bf16.mxu0 %v3004_v14  ;;  %609 = vmatprep.subr.bf16.mxu1 %v3010_v15 }
  0x2e   :  { %569 = vmatpush1.bf16.msra.mxu0 %v3015_v16  ;;  %610 = vmatpush1.bf16.msra.mxu1 %v3022_v17 }
  0x2f   :  { %570 = vmatprep.subr.bf16.mxu0 %v3029_v18  ;;  %611 = vmatprep.subr.bf16.mxu1 %v3034_v19 }
  0x32   :  { %571 = vmatpush1.bf16.msra.mxu0 %v3039_v20  ;;  %612 = vmatpush1.bf16.msra.mxu1 %v3046_v21 }
  0x33   :  { %572 = vmatprep.subr.bf16.mxu0 %v3051_v22  ;;  %613 = vmatprep.subr.bf16.mxu1 %v3056_v23 }
  0x36   :  { %573 = vmatpush1.bf16.msra.mxu0 %v3068_v25  ;;  %614 = vmatpush1.bf16.msra.mxu1 %v3073_v26 }
  0x37   :  { %574 = vmatprep.subr.bf16.mxu0 %v3078_v27  ;;  %615 = vmatprep.subr.bf16.mxu1 %v3090_v29 }
  0x3a   :  { %575 = vmatpush1.bf16.msra.mxu0 %v3095_v30  ;;  %616 = vmatpush1.bf16.msra.mxu1 %v3107_v32 }
  0x3b   :  { %576 = vmatprep.subr.bf16.mxu0 %v3114_v33  ;;  %617 = vmatprep.subr.bf16.mxu1 %v3119_v34 }
  0x3e   :  { %577 = vmatpush1.bf16.msra.mxu0 %v3130_v36  ;;  %618 = vmatpush1.bf16.msra.mxu1 %v3135_v37 }
  0x3f   :  { %578 = vmatprep.subr.bf16.mxu0 %v3142_v38  ;;  %619 = vmatprep.subr.bf16.mxu1 %v3147_v39 }
  0x42   :  { %579 = vmatpush1.bf16.msra.mxu0 %v3154_v40  ;;  %620 = vmatpush1.bf16.msra.mxu1 %v3159_v41 }
  0x43   :  { %694 = vmatprep.subr.bf16.mxu0 %v2957_v6  ;;  %735 = vmatprep.subr.bf16.mxu1 %v2963_v7 }
  0xd7   :  { %v128_v52 = vpop.f32.mrb[0].mxu0 }
  0xd8   :  { %v129_v54 = vadd.f32 %v128_v52, %v32_v49  ;;  %v130_v55 = vpop.f32.mrb[1].mxu0  ;;  %v217_v57 = vpop.f32.mrb[0].mxu1 }
  0xd9   :  { %v131_v56 = vadd.f32 %v130_v55, %v36_v50  ;;  %v218_v58 = vadd.f32 %v217_v57, %v40_v51  ;;  %v219_v59 = vpop.f32.mrb[1].mxu1 }
  0xda   :  { %240 = vst [vmem:[#allocation2] sm:$0xff] %v129_v54  ;;  %v220_v60 = vadd.f32 %v219_v59, %v44_v53 }
  0xdb   :  { %241 = vst [vmem:[#allocation2 + $0x8] sm:$0xff] %v131_v56  ;;  %242 = vst [vmem:[#allocation2 + $0x10] sm:$0xff] %v218_v58 }
  0xdc   :  { %243 = vst [vmem:[#allocation2 + $0x18] sm:$0xff] %v220_v60 }
  0xdf   :  { %v134_v61 = vpop.f32.mrb[2].mxu0  ;;  %v223_v62 = vpop.f32.mrb[2].mxu1 }
  0xe0   :  { %v135_v63 = vadd.f32 %v134_v61, %v32_v49  ;;  %v136_v0 = vpop.f32.mrb[3].mxu0  ;;  %v224_v1 = vadd.f32 %v223_v62, %v40_v51  ;;  %v225_v2 = vpop.f32.mrb[3].mxu1 }
  0xe1   :  { %v137_v3 = vadd.f32 %v136_v0, %v36_v50  ;;  %v226_v4 = vadd.f32 %v225_v2, %v44_v53  ;;  %v288_v58 = vld [vmem:[#allocation2] sm:$0x3] }
  0xe2   :  { %244 = vst [vmem:[#allocation2 + $0x20] sm:$0xff] %v135_v63  ;;  %246 = vst [vmem:[#allocation2 + $0x30] sm:$0xff] %v224_v1  ;;  %v289_v62 = vld [vmem:[#allocation2 + $0x8] sm:$0x3] }
  0xe3   :  { %245 = vst [vmem:[#allocation2 + $0x28] sm:$0xff] %v137_v3  ;;  %v140_v5 = vpop.f32.mrb[4].mxu0  ;;  %247 = vst [vmem:[#allocation2 + $0x38] sm:$0xff] %v226_v4  ;;  %v229_v24 = vpop.f32.mrb[4].mxu1 }
  0xe4   :  { %v141_v28 = vadd.f32 %v140_v5, %v32_v49  ;;  %v142_v31 = vpop.f32.mrb[5].mxu0  ;;  %v230_v42 = vadd.f32 %v229_v24, %v40_v51  ;;  %v231_v43 = vpop.f32.mrb[5].mxu1 }
  0xe5   :  { %v143_v44 = vadd.f32 %v142_v31, %v36_v50  ;;  %v232_v45 = vadd.f32 %v231_v43, %v44_v53 }
  0xe6   :  { %248 = vst [vmem:[#allocation2 + $0x40] sm:$0xff] %v141_v28  ;;  %250 = vst [vmem:[#allocation2 + $0x50] sm:$0xff] %v230_v42  ;;  %v290_v42 = vld [vmem:[#allocation2 + $0x10] sm:$0x3] }
  0xe7   :  { %249 = vst [vmem:[#allocation2 + $0x48] sm:$0xff] %v143_v44  ;;  %v146_v46 = vpop.f32.mrb[6].mxu0  ;;  %251 = vst [vmem:[#allocation2 + $0x58] sm:$0xff] %v232_v45  ;;  %v235_v47 = vpop.f32.mrb[6].mxu1 }
  0xe8   :  { %v147_v48 = vadd.f32 %v146_v46, %v32_v49  ;;  %v148_v52 = vpop.f32.mrb[7].mxu0  ;;  %v236_v54 = vadd.f32 %v235_v47, %v40_v51  ;;  %v237_v55 = vpop.f32.mrb[7].mxu1 }
  0xe9   :  { %v149_v56 = vadd.f32 %v148_v52, %v36_v50  ;;  %v238_v57 = vadd.f32 %v237_v55, %v44_v53  ;;  %v291_v53 = vld [vmem:[#allocation2 + $0x18] sm:$0x3] }
  0xea   :  { %252 = vst [vmem:[#allocation2 + $0x60] sm:$0xff] %v147_v48  ;;  %254 = vst [vmem:[#allocation2 + $0x70] sm:$0xff] %v236_v54 }
  0xeb   :  { %253 = vst [vmem:[#allocation2 + $0x68] sm:$0xff] %v149_v56  ;;  %255 = vst [vmem:[#allocation2 + $0x78] sm:$0xff] %v238_v57 }
  0xf8   :  { %v486_v59 = vpop.f32.mrb[8].mxu0  ;;  %v527_v60 = vpop.f32.mrb[8].mxu1 }
  0xf9   :  { %v534_v61 = vadd.f32 %v486_v59, %v288_v58  ;;  %v488_v63 = vpop.f32.mrb[9].mxu0  ;;  %v529_v0 = vpop.f32.mrb[9].mxu1  ;;  %v536_v44 = vadd.f32 %v527_v60, %v290_v42 }
  0xfa   :  { %v535_v1 = vadd.f32 %v488_v63, %v289_v62  ;;  %v490_v2 = vpop.f32.mrb[10].mxu0  ;;  %v531_v3 = vpop.f32.mrb[10].mxu1  ;;  %v537_v28 = vadd.f32 %v529_v0, %v291_v53 }
  0xfb   :  { %v538_v49 = vsub.f32 0.0, %v534_v61  ;;  %v491_v4 = vpop.f32.mrb[11].mxu0  ;;  %v532_v51 = vpop.f32.mrb[11].mxu1 }
  0xfc   :  { %v543_v5 = vsub.f32 0.0, %v535_v1  ;;  %v549_v31 = vsub.f32 0.0, %v537_v28  ;;  %v559_v51 = vld [vmem:[#allocation2] sm:$0xc]  ;;  %v560_v28 = vld [vmem:[#allocation2 + $0x8] sm:$0xc] }
  0xfd   :  { %v539_v50 = vmul.f32 1.442695, %v538_v49 }
  0xfe   :  { %v544_v24 = vmul.f32 1.442695, %v543_v5  ;;  %v550_v43 = vmul.f32 1.442695, %v549_v31 }
  0xff   :  { %2567 = vpow2.f32 %v539_v50 }
 0x100   :  { %2569 = vpow2.f32 %v544_v24 }
 0x101   :  { %2571 = vpow2.f32 %v550_v43 }
 0x102   :  { %2573 = vtanh.f32 %v536_v44 }
 0x109   :  { %v2568_v45 = vpop.eup %2567 }
 0x10a   :  { %v2570_v46 = vpop.eup %2569  ;;  %v541_v47 = vadd.f32 1.0, %v2568_v45 }
 0x10b   :  { %v546_v48 = vadd.f32 1.0, %v2570_v46  ;;  %v2572_v52 = vpop.eup %2571 }
 0x10c   :  { %2575 = vrcp.f32 %v541_v47  ;;  %v2574_v54 = vpop.eup %2573  ;;  %v552_v58 = vadd.f32 1.0, %v2572_v52 }
 0x10d   :  { %2577 = vrcp.f32 %v546_v48  ;;  %v562_v48 = vld [vmem:[#allocation2 + $0x18] sm:$0xc] }
 0x10e   :  { %2579 = vrcp.f32 %v552_v58 }
 0x116   :  { %v2576_v55 = vpop.eup %2575 }
 0x117   :  { %v2578_v56 = vpop.eup %2577  ;;  %v555_v57 = vmul.f32 %v2576_v55, %v2574_v54 }
 0x118   :  { %v554_v59 = vmul.f32 0.0, %v2578_v56  ;;  %v2580_v60 = vpop.eup %2579 }
 0x11a   :  { %v3206_v61 = vadd.f32 %v555_v57, %v554_v59  ;;  %v561_v57 = vld [vmem:[#allocation2 + $0x10] sm:$0xc] }
 0x11c   :  { %2581 = vtanh.f32 %v3206_v61 }
 0x126   :  { %v2582_v62 = vpop.eup %2581 }
 0x127   :  { %v558_v63 = vmul.f32 %v2582_v62, %v2580_v60 }
 0x129   :  { %v563_v0 = vpack.c.bf16 %v558_v63, %v558_v63 }
 0x12b   :  { %597 = vmatmul.mubr.bf16.vlgmr.msra.gmra.mrb[12].mxu0 %v563_v0  ;;  %638 = vmatmul.mubr.bf16.vlgmr.msra.gmra.mrb[12].mxu1 %v563_v0 }
 0x12c   :  { %695 = vmatpush1.bf16.msra.mxu0 %v2968_v8  ;;  %736 = vmatpush1.bf16.msra.mxu1 %v2974_v9 }
 0x12d   :  { %696 = vmatprep.subr.bf16.mxu0 %v2981_v10  ;;  %737 = vmatprep.subr.bf16.mxu1 %v2988_v11 }
 0x12e   :  { %726 = vmatprep.mubr.bf16.mxu0 %v2912_v35  ;;  %767 = vmatprep.mubr.bf16.mxu1 %v2912_v35 }
 0x130   :  { %697 = vmatpush1.bf16.msra.mxu0 %v2993_v12  ;;  %738 = vmatpush1.bf16.msra.mxu1 %v2998_v13 }
 0x131   :  { %698 = vmatprep.subr.bf16.mxu0 %v3004_v14  ;;  %739 = vmatprep.subr.bf16.mxu1 %v3010_v15 }
 0x134   :  { %699 = vmatpush1.bf16.msra.mxu0 %v3015_v16  ;;  %740 = vmatpush1.bf16.msra.mxu1 %v3022_v17 }
 0x135   :  { %700 = vmatprep.subr.bf16.mxu0 %v3029_v18  ;;  %741 = vmatprep.subr.bf16.mxu1 %v3034_v19 }
 0x138   :  { %701 = vmatpush1.bf16.msra.mxu0 %v3039_v20  ;;  %742 = vmatpush1.bf16.msra.mxu1 %v3046_v21 }
 0x139   :  { %702 = vmatprep.subr.bf16.mxu0 %v3051_v22  ;;  %743 = vmatprep.subr.bf16.mxu1 %v3056_v23 }
 0x13c   :  { %703 = vmatpush1.bf16.msra.mxu0 %v3068_v25  ;;  %744 = vmatpush1.bf16.msra.mxu1 %v3073_v26 }
 0x13d   :  { %704 = vmatprep.subr.bf16.mxu0 %v3078_v27  ;;  %745 = vmatprep.subr.bf16.mxu1 %v3090_v29 }
 0x140   :  { %705 = vmatpush1.bf16.msra.mxu0 %v3095_v30  ;;  %746 = vmatpush1.bf16.msra.mxu1 %v3107_v32 }
 0x141   :  { %706 = vmatprep.subr.bf16.mxu0 %v3114_v33  ;;  %747 = vmatprep.subr.bf16.mxu1 %v3119_v34 }
 0x144   :  { %707 = vmatpush1.bf16.msra.mxu0 %v3130_v36  ;;  %748 = vmatpush1.bf16.msra.mxu1 %v3135_v37 }
 0x145   :  { %708 = vmatprep.subr.bf16.mxu0 %v3142_v38  ;;  %749 = vmatprep.subr.bf16.mxu1 %v3147_v39 }
 0x148   :  { %709 = vmatpush1.bf16.msra.mxu0 %v3154_v40  ;;  %750 = vmatpush1.bf16.msra.mxu1 %v3159_v41 }
 0x149   :  { %824 = vmatprep.subr.bf16.mxu0 %v2957_v6  ;;  %865 = vmatprep.subr.bf16.mxu1 %v2963_v7 }
 0x1fe   :  { %v598_v1 = vpop.f32.mrb[12].mxu0  ;;  %v639_v2 = vpop.f32.mrb[12].mxu1 }
 0x1ff   :  { %v650_v3 = vrot.slane %v598_v1, 6  ;;  %v600_v49 = vpop.f32.mrb[13].mxu0  ;;  %v641_v4 = vpop.f32.mrb[13].mxu1  ;;  %v652_v56 = vrot.slane %v639_v2, 6 }
 0x200   :  { %v651_v5 = vrot.slane %v600_v49, 6  ;;  %v602_v50 = vpop.f32.mrb[14].mxu0  ;;  %v643_v53 = vpop.f32.mrb[14].mxu1  ;;  %v653_v44 = vrot.slane %v641_v4, 6  ;;  %v679_v4 = vrot.slane %v3206_v61, 6 }
 0x201   :  { %v658_v24 = vadd.f32 %v650_v3, %v559_v51  ;;  %v603_v31 = vpop.f32.mrb[15].mxu0  ;;  %v644_v42 = vpop.f32.mrb[15].mxu1  ;;  %v660_v59 = vadd.f32 %v652_v56, %v561_v57  ;;  %v687_v57 = vld [vmem:[#allocation2 + $0x8] sm:$0x30] }
 0x202   :  { %v659_v43 = vadd.f32 %v651_v5, %v560_v28  ;;  %v661_v54 = vadd.f32 %v653_v44, %v562_v48  ;;  %v686_v48 = vld [vmem:[#allocation2] sm:$0x30] }
 0x203   :  { %v662_v45 = vsub.f32 0.0, %v658_v24 }
 0x204   :  { %v667_v46 = vsub.f32 0.0, %v659_v43  ;;  %v673_v55 = vsub.f32 0.0, %v661_v54 }
 0x205   :  { %v663_v47 = vmul.f32 1.442695, %v662_v45 }
 0x206   :  { %v668_v52 = vmul.f32 1.442695, %v667_v46  ;;  %v674_v58 = vmul.f32 1.442695, %v673_v55 }
 0x207   :  { %2583 = vpow2.f32 %v663_v47 }
 0x208   :  { %2585 = vpow2.f32 %v668_v52 }
 0x209   :  { %2587 = vpow2.f32 %v674_v58 }
 0x20a   :  { %2589 = vtanh.f32 %v660_v59 }
 0x211   :  { %v2584_v60 = vpop.eup %2583 }
 0x212   :  { %v2586_v62 = vpop.eup %2585  ;;  %v665_v63 = vadd.f32 1.0, %v2584_v60 }
 0x213   :  { %v670_v0 = vadd.f32 1.0, %v2586_v62  ;;  %v2588_v1 = vpop.eup %2587 }
 0x214   :  { %2591 = vrcp.f32 %v665_v63  ;;  %v2590_v3 = vpop.eup %2589  ;;  %v676_v50 = vadd.f32 1.0, %v2588_v1 }
 0x215   :  { %2593 = vrcp.f32 %v670_v0 }
 0x216   :  { %2595 = vrcp.f32 %v676_v50  ;;  %v688_v50 = vld [vmem:[#allocation2 + $0x10] sm:$0x30] }
 0x21e   :  { %v2592_v49 = vpop.eup %2591 }
 0x21f   :  { %v2594_v51 = vpop.eup %2593  ;;  %v682_v5 = vmul.f32 %v2592_v49, %v2590_v3  ;;  %v689_v3 = vld [vmem:[#allocation2 + $0x18] sm:$0x30] }
 0x220   :  { %v681_v2 = vmul.f32 %v2594_v51, %v679_v4  ;;  %v2596_v24 = vpop.eup %2595 }
 0x222   :  { %v3244_v53 = vadd.f32 %v682_v5, %v681_v2 }
 0x224   :  { %2597 = vtanh.f32 %v3244_v53 }
 0x22e   :  { %v2598_v28 = vpop.eup %2597 }
 0x22f   :  { %v685_v31 = vmul.f32 %v2598_v28, %v2596_v24 }
 0x231   :  { %v690_v42 = vpack.c.bf16 %v685_v31, %v685_v31 }
 0x233   :  { %v692_v43 = vrot.slane %v690_v42, 1 }
 0x235   :  { %727 = vmatmul.mubr.bf16.vlgmr.msra.gmra.mrb[16].mxu0 %v692_v43  ;;  %768 = vmatmul.mubr.bf16.vlgmr.msra.gmra.mrb[16].mxu1 %v692_v43 }
 0x236   :  { %825 = vmatpush1.bf16.msra.mxu0 %v2968_v8  ;;  %866 = vmatpush1.bf16.msra.mxu1 %v2974_v9 }
 0x237   :  { %826 = vmatprep.subr.bf16.mxu0 %v2981_v10  ;;  %867 = vmatprep.subr.bf16.mxu1 %v2988_v11 }
 0x238   :  { %856 = vmatprep.mubr.bf16.mxu0 %v2912_v35  ;;  %897 = vmatprep.mubr.bf16.mxu1 %v2912_v35 }
 0x23a   :  { %827 = vmatpush1.bf16.msra.mxu0 %v2993_v12  ;;  %868 = vmatpush1.bf16.msra.mxu1 %v2998_v13 }
 0x23b   :  { %828 = vmatprep.subr.bf16.mxu0 %v3004_v14  ;;  %869 = vmatprep.subr.bf16.mxu1 %v3010_v15 }
 0x23e   :  { %829 = vmatpush1.bf16.msra.mxu0 %v3015_v16  ;;  %870 = vmatpush1.bf16.msra.mxu1 %v3022_v17 }
 0x23f   :  { %830 = vmatprep.subr.bf16.mxu0 %v3029_v18  ;;  %871 = vmatprep.subr.bf16.mxu1 %v3034_v19 }
 0x242   :  { %831 = vmatpush1.bf16.msra.mxu0 %v3039_v20  ;;  %872 = vmatpush1.bf16.msra.mxu1 %v3046_v21 }
 0x243   :  { %832 = vmatprep.subr.bf16.mxu0 %v3051_v22  ;;  %873 = vmatprep.subr.bf16.mxu1 %v3056_v23 }
 0x246   :  { %833 = vmatpush1.bf16.msra.mxu0 %v3068_v25  ;;  %874 = vmatpush1.bf16.msra.mxu1 %v3073_v26 }
 0x247   :  { %834 = vmatprep.subr.bf16.mxu0 %v3078_v27  ;;  %875 = vmatprep.subr.bf16.mxu1 %v3090_v29 }
 0x24a   :  { %835 = vmatpush1.bf16.msra.mxu0 %v3095_v30  ;;  %876 = vmatpush1.bf16.msra.mxu1 %v3107_v32 }
 0x24b   :  { %836 = vmatprep.subr.bf16.mxu0 %v3114_v33  ;;  %877 = vmatprep.subr.bf16.mxu1 %v3119_v34 }
 0x24e   :  { %837 = vmatpush1.bf16.msra.mxu0 %v3130_v36  ;;  %878 = vmatpush1.bf16.msra.mxu1 %v3135_v37 }
 0x24f   :  { %838 = vmatprep.subr.bf16.mxu0 %v3142_v38  ;;  %879 = vmatprep.subr.bf16.mxu1 %v3147_v39 }
 0x252   :  { %839 = vmatpush1.bf16.msra.mxu0 %v3154_v40  ;;  %880 = vmatpush1.bf16.msra.mxu1 %v3159_v41 }
 0x253   :  { %954 = vmatprep.subr.bf16.mxu0 %v2957_v6  ;;  %995 = vmatprep.subr.bf16.mxu1 %v2963_v7 }
 0x308   :  { %v728_v61 = vpop.f32.mrb[16].mxu0  ;;  %v769_v44 = vpop.f32.mrb[16].mxu1 }
 0x309   :  { %v780_v45 = vrot.slane %v728_v61, 4  ;;  %v730_v46 = vpop.f32.mrb[17].mxu0  ;;  %v771_v47 = vpop.f32.mrb[17].mxu1  ;;  %v782_v5 = vrot.slane %v769_v44, 4 }
 0x30a   :  { %v781_v52 = vrot.slane %v730_v46, 4  ;;  %v732_v54 = vpop.f32.mrb[18].mxu0  ;;  %v773_v55 = vpop.f32.mrb[18].mxu1  ;;  %v783_v62 = vrot.slane %v771_v47, 4  ;;  %v809_v47 = vrot.slane %v3244_v53, 6 }
 0x30b   :  { %v788_v56 = vadd.f32 %v780_v45, %v686_v48  ;;  %v733_v58 = vpop.f32.mrb[19].mxu0  ;;  %v774_v59 = vpop.f32.mrb[19].mxu1  ;;  %v790_v24 = vadd.f32 %v782_v5, %v688_v50  ;;  %v816_v53 = vld [vmem:[#allocation2] sm:$0xc0] }
 0x30c   :  { %v789_v60 = vadd.f32 %v781_v52, %v687_v57  ;;  %v791_v4 = vadd.f32 %v783_v62, %v689_v3  ;;  %v817_v3 = vld [vmem:[#allocation2 + $0x8] sm:$0xc0] }
 0x30d   :  { %v792_v63 = vsub.f32 0.0, %v788_v56 }
 0x30e   :  { %v797_v0 = vsub.f32 0.0, %v789_v60  ;;  %v803_v51 = vsub.f32 0.0, %v791_v4 }
 0x30f   :  { %v793_v1 = vmul.f32 1.442695, %v792_v63 }
 0x310   :  { %v798_v49 = vmul.f32 1.442695, %v797_v0  ;;  %v804_v2 = vmul.f32 1.442695, %v803_v51 }
 0x311   :  { %2599 = vpow2.f32 %v793_v1 }
 0x312   :  { %2601 = vpow2.f32 %v798_v49 }
 0x313   :  { %2603 = vpow2.f32 %v804_v2 }
 0x314   :  { %2605 = vtanh.f32 %v790_v24  ;;  %v819_v24 = vld [vmem:[#allocation2 + $0x18] sm:$0xc0] }
 0x31b   :  { %v2600_v28 = vpop.eup %2599 }
 0x31c   :  { %v2602_v31 = vpop.eup %2601  ;;  %v795_v42 = vadd.f32 1.0, %v2600_v28 }
 0x31d   :  { %v800_v43 = vadd.f32 1.0, %v2602_v31  ;;  %v2604_v61 = vpop.eup %2603 }
 0x31e   :  { %2607 = vrcp.f32 %v795_v42  ;;  %v2606_v45 = vpop.eup %2605  ;;  %v806_v54 = vadd.f32 1.0, %v2604_v61 }
 0x31f   :  { %2609 = vrcp.f32 %v800_v43  ;;  %v818_v43 = vld [vmem:[#allocation2 + $0x10] sm:$0xc0] }
 0x320   :  { %2611 = vrcp.f32 %v806_v54 }
 0x328   :  { %v2608_v46 = vpop.eup %2607 }
 0x329   :  { %v2610_v48 = vpop.eup %2609  ;;  %v812_v52 = vmul.f32 %v2608_v46, %v2606_v45 }
 0x32a   :  { %v811_v44 = vmul.f32 %v2610_v48, %v809_v47  ;;  %v2612_v56 = vpop.eup %2611 }
 0x32c   :  { %v3282_v55 = vadd.f32 %v812_v52, %v811_v44 }
 0x32e   :  { %2613 = vtanh.f32 %v3282_v55 }
 0x338   :  { %v2614_v57 = vpop.eup %2613 }
 0x339   :  { %v815_v58 = vmul.f32 %v2614_v57, %v2612_v56  ;;  %v939_v57 = vrot.slane %v3282_v55, 6  ;;  %v3326_v55 = vld [vmem:[%s4070_s2] ss:$16 sps:$4 sm:$0xff]  }
 0x33b   :  { %v820_v59 = vpack.c.bf16 %v815_v58, %v815_v58 }
 0x33d   :  { %v822_v60 = vrot.slane %v820_v59, 2 }
 0x33f   :  { %857 = vmatmul.mubr.bf16.vlgmr.msra.gmra.mrb[20].mxu0 %v822_v60  ;;  %898 = vmatmul.mubr.bf16.vlgmr.msra.gmra.mrb[20].mxu1 %v822_v60 }
 0x340   :  { %955 = vmatpush1.bf16.msra.mxu0 %v2968_v8  ;;  %996 = vmatpush1.bf16.msra.mxu1 %v2974_v9 }
 0x341   :  { %956 = vmatprep.subr.bf16.mxu0 %v2981_v10  ;;  %997 = vmatprep.subr.bf16.mxu1 %v2988_v11 }
 0x342   :  { %986 = vmatprep.mubr.bf16.mxu0 %v2912_v35  ;;  %1027 = vmatprep.mubr.bf16.mxu1 %v2912_v35 }
 0x344   :  { %957 = vmatpush1.bf16.msra.mxu0 %v2993_v12  ;;  %998 = vmatpush1.bf16.msra.mxu1 %v2998_v13 }
 0x345   :  { %958 = vmatprep.subr.bf16.mxu0 %v3004_v14  ;;  %999 = vmatprep.subr.bf16.mxu1 %v3010_v15 }
 0x348   :  { %959 = vmatpush1.bf16.msra.mxu0 %v3015_v16  ;;  %1000 = vmatpush1.bf16.msra.mxu1 %v3022_v17 }
 0x349   :  { %960 = vmatprep.subr.bf16.mxu0 %v3029_v18  ;;  %1001 = vmatprep.subr.bf16.mxu1 %v3034_v19 }
 0x34c   :  { %961 = vmatpush1.bf16.msra.mxu0 %v3039_v20  ;;  %1002 = vmatpush1.bf16.msra.mxu1 %v3046_v21 }
 0x34d   :  { %962 = vmatprep.subr.bf16.mxu0 %v3051_v22  ;;  %1003 = vmatprep.subr.bf16.mxu1 %v3056_v23 }
 0x350   :  { %963 = vmatpush1.bf16.msra.mxu0 %v3068_v25  ;;  %1004 = vmatpush1.bf16.msra.mxu1 %v3073_v26 }
 0x351   :  { %964 = vmatprep.subr.bf16.mxu0 %v3078_v27  ;;  %1005 = vmatprep.subr.bf16.mxu1 %v3090_v29 }
 0x354   :  { %965 = vmatpush1.bf16.msra.mxu0 %v3095_v30  ;;  %1006 = vmatpush1.bf16.msra.mxu1 %v3107_v32 }
 0x355   :  { %966 = vmatprep.subr.bf16.mxu0 %v3114_v33  ;;  %1007 = vmatprep.subr.bf16.mxu1 %v3119_v34 }
 0x358   :  { %967 = vmatpush1.bf16.msra.mxu0 %v3130_v36  ;;  %1008 = vmatpush1.bf16.msra.mxu1 %v3135_v37 }
 0x359   :  { %968 = vmatprep.subr.bf16.mxu0 %v3142_v38  ;;  %1009 = vmatprep.subr.bf16.mxu1 %v3147_v39 }
 0x35c   :  { %969 = vmatpush1.bf16.msra.mxu0 %v3154_v40  ;;  %1010 = vmatpush1.bf16.msra.mxu1 %v3159_v41 }
 0x35d   :  { %1069 = vmatprep.subr.bf16.mxu0 %v2957_v6  ;;  %1110 = vmatprep.subr.bf16.mxu1 %v2963_v7 }
 0x412   :  { %v858_v8 = vpop.f32.mrb[20].mxu0  ;;  %v899_v9 = vpop.f32.mrb[20].mxu1 }
 0x413   :  { %v910_v10 = vrot.slane %v858_v8, 2  ;;  %v860_v12 = vpop.f32.mrb[21].mxu0  ;;  %v901_v13 = vpop.f32.mrb[21].mxu1  ;;  %v912_v42 = vrot.slane %v899_v9, 2 }
 0x414   :  { %v911_v62 = vrot.slane %v860_v12, 2  ;;  %v862_v63 = vpop.f32.mrb[22].mxu0  ;;  %v903_v0 = vpop.f32.mrb[22].mxu1  ;;  %v913_v5 = vrot.slane %v901_v13, 2 }
 0x415   :  { %v918_v1 = vadd.f32 %v910_v10, %v816_v53  ;;  %v863_v49 = vpop.f32.mrb[23].mxu0  ;;  %v904_v4 = vpop.f32.mrb[23].mxu1  ;;  %v920_v45 = vadd.f32 %v912_v42, %v818_v43  ;;  %v3332_v63 = vld [vmem:[%s4070_s2 + $0x8] ss:$16 sps:$4 sm:$0xff]   ;;  %v3338_v0 = vld [vmem:[%s4070_s2 + $0x24] ss:$16 sps:$4 sm:$0xff]  }
 0x416   :  { %v919_v51 = vadd.f32 %v911_v62, %v817_v3  ;;  %v921_v28 = vadd.f32 %v913_v5, %v819_v24  ;;  %v3353_v3 = vld [vmem:[%s4070_s2 + $0x28] ss:$16 sps:$4 sm:$0xff]  }
 0x417   :  { %v922_v50 = vsub.f32 0.0, %v918_v1  ;;  %v3347_v1 = vld [vmem:[%s4070_s2 + $0x20] ss:$16 sps:$4 sm:$0xff]  }
 0x418   :  { %v927_v2 = vsub.f32 0.0, %v919_v51  ;;  %v933_v31 = vsub.f32 0.0, %v921_v28 }
 0x419   :  { %v923_v6 = vmul.f32 1.442695, %v922_v50 }
 0x41a   :  { %v928_v7 = vmul.f32 1.442695, %v927_v2  ;;  %v934_v61 = vmul.f32 1.442695, %v933_v31 }
 0x41b   :  { %2615 = vpow2.f32 %v923_v6 }
 0x41c   :  { %2617 = vpow2.f32 %v928_v7 }
 0x41d   :  { %2619 = vpow2.f32 %v934_v61 }
 0x41e   :  { %2621 = vtanh.f32 %v920_v45 }
 0x425   :  { %v2616_v46 = vpop.eup %2615 }
 0x426   :  { %v2618_v47 = vpop.eup %2617  ;;  %v925_v48 = vadd.f32 1.0, %v2616_v46 }
 0x427   :  { %v930_v52 = vadd.f32 1.0, %v2618_v47  ;;  %v2620_v54 = vpop.eup %2619  ;;  %v3402_v47 = vld [vmem:[%s4070_s2 + $0x2c] ss:$16 sps:$4 sm:$0xff]  }
 0x428   :  { %2623 = vrcp.f32 %v925_v48  ;;  %v2622_v44 = vpop.eup %2621  ;;  %v936_v60 = vadd.f32 1.0, %v2620_v54  ;;  %v3412_v48 = vld [vmem:[%s4070_s2 + $0x44] ss:$16 sps:$4 sm:$0xff]   ;;  %v3424_v54 = vld [vmem:[%s4070_s2 + $0x40] ss:$16 sps:$4 sm:$0xff]  }
 0x429   :  { %2625 = vrcp.f32 %v930_v52  ;;  %v3418_v52 = vld [vmem:[%s4070_s2 + $0x4c] ss:$16 sps:$4 sm:$0xff]  }
 0x42a   :  { %2627 = vrcp.f32 %v936_v60  ;;  %v3460_v60 = vld [vmem:[%s4070_s2 + $0x84] ss:$16 sps:$4 sm:$0xff]  }
 0x432   :  { %v2624_v56 = vpop.eup %2623 }
 0x433   :  { %v2626_v58 = vpop.eup %2625  ;;  %v942_v59 = vmul.f32 %v2624_v56, %v2622_v44  ;;  %v3430_v44 = vld [vmem:[%s4070_s2 + $0x48] ss:$16 sps:$4 sm:$0xff]   ;;  %v3436_v56 = vld [vmem:[%s4070_s2 + $0x64] ss:$16 sps:$4 sm:$0xff]  }
 0x434   :  { %v941_v8 = vmul.f32 %v2626_v58, %v939_v57  ;;  %v2628_v10 = vpop.eup %2627  ;;  %v3442_v57 = vld [vmem:[%s4070_s2 + $0x6c] ss:$16 sps:$4 sm:$0xff]   ;;  %v3448_v58 = vld [vmem:[%s4070_s2 + $0x60] ss:$16 sps:$4 sm:$0xff]  }
 0x436   :  { %v3320_v9 = vadd.f32 %v942_v59, %v941_v8  ;;  %v3454_v59 = vld [vmem:[%s4070_s2 + $0x68] ss:$16 sps:$4 sm:$0xff]   ;;  %v3466_v8 = vld [vmem:[%s4070_s2 + $0x8c] ss:$16 sps:$4 sm:$0xff]  }
 0x438   :  { %2629 = vtanh.f32 %v3320_v9  ;;  %v1057_v6 = vrot.slane %v3320_v9, 6  ;;  %v3472_v9 = vld [vmem:[%s4070_s2 + $0x80] ss:$16 sps:$4 sm:$0xff]  }
 0x442   :  { %v2630_v12 = vpop.eup %2629 }
 0x443   :  { %v945_v13 = vmul.f32 %v2630_v12, %v2628_v10  ;;  %v3478_v10 = vld [vmem:[%s4070_s2 + $0x88] ss:$16 sps:$4 sm:$0xff]   ;;  %v3484_v12 = vld [vmem:[%s4070_s2 + $0xa4] ss:$16 sps:$4 sm:$0xff]  }
 0x445   :  { %v950_v53 = vpack.c.bf16 %v945_v13, %v945_v13  ;;  %v3490_v13 = vld [vmem:[%s4070_s2 + $0xac] ss:$16 sps:$4 sm:$0xff]  }
 0x447   :  { %v952_v62 = vrot.slane %v950_v53, 3  ;;  %v3496_v53 = vld [vmem:[%s4070_s2 + $0xa0] ss:$16 sps:$4 sm:$0xff]  }
 0x449   :  { %987 = vmatmul.mubr.bf16.vlgmr.msra.gmra.mrb[24].mxu0 %v952_v62  ;;  %1028 = vmatmul.mubr.bf16.vlgmr.msra.gmra.mrb[24].mxu1 %v952_v62  ;;  %v3502_v62 = vld [vmem:[%s4070_s2 + $0xa8] ss:$16 sps:$4 sm:$0xff]  }
 0x44a   :  { %1070 = vmatpush1.bf16.msra.mxu0 %v3326_v55  ;;  %1111 = vmatpush1.bf16.msra.mxu1 %v3332_v63 }
 0x44b   :  { %1071 = vmatprep.subr.bf16.mxu0 %v3338_v0  ;;  %1112 = vmatprep.subr.bf16.mxu1 %v2988_v11  ;;  %v3383_v11 = vld [vmem:[%s4070_s2 + $0x4] ss:$16 sps:$4 sm:$0xff]  }
 0x44c   :  { %1101 = vmatprep.mubr.bf16.mxu0 %v2912_v35  ;;  %1142 = vmatprep.mubr.bf16.mxu1 %v2912_v35 }
 0x44e   :  { %1072 = vmatpush1.bf16.msra.mxu0 %v3347_v1  ;;  %1113 = vmatpush1.bf16.msra.mxu1 %v3353_v3 }
 0x44f   :  { %1073 = vmatprep.subr.bf16.mxu0 %v3004_v14  ;;  %1114 = vmatprep.subr.bf16.mxu1 %v3010_v15  ;;  %v3389_v14 = vld [vmem:[%s4070_s2 + $0xc] ss:$16 sps:$4 sm:$0xff]   ;;  %v946_v15 = vld [vmem:[#allocation2 + $0x20] sm:$0x3] }
 0x452   :  { %1074 = vmatpush1.bf16.msra.mxu0 %v3015_v16  ;;  %1115 = vmatpush1.bf16.msra.mxu1 %v3022_v17 }
 0x453   :  { %1075 = vmatprep.subr.bf16.mxu0 %v3029_v18  ;;  %1116 = vmatprep.subr.bf16.mxu1 %v3034_v19  ;;  %v947_v19 = vld [vmem:[#allocation2 + $0x28] sm:$0x3] }
 0x456   :  { %1076 = vmatpush1.bf16.msra.mxu0 %v3039_v20  ;;  %1117 = vmatpush1.bf16.msra.mxu1 %v3046_v21 }
 0x457   :  { %1077 = vmatprep.subr.bf16.mxu0 %v3051_v22  ;;  %1118 = vmatprep.subr.bf16.mxu1 %v3056_v23 }
 0x45a   :  { %1078 = vmatpush1.bf16.msra.mxu0 %v3068_v25  ;;  %1119 = vmatpush1.bf16.msra.mxu1 %v3073_v26 }
 0x45b   :  { %1079 = vmatprep.subr.bf16.mxu0 %v3078_v27  ;;  %1120 = vmatprep.subr.bf16.mxu1 %v3090_v29 }
 0x45e   :  { %1080 = vmatpush1.bf16.msra.mxu0 %v3095_v30  ;;  %1121 = vmatpush1.bf16.msra.mxu1 %v3107_v32 }
 0x45f   :  { %1081 = vmatprep.subr.bf16.mxu0 %v3114_v33  ;;  %1122 = vmatprep.subr.bf16.mxu1 %v3119_v34  ;;  %v949_v33 = vld [vmem:[#allocation2 + $0x38] sm:$0x3] }
 0x462   :  { %1082 = vmatpush1.bf16.msra.mxu0 %v3130_v36  ;;  %1123 = vmatpush1.bf16.msra.mxu1 %v3135_v37 }
 0x463   :  { %1083 = vmatprep.subr.bf16.mxu0 %v3142_v38  ;;  %1124 = vmatprep.subr.bf16.mxu1 %v3147_v39  ;;  %v948_v38 = vld [vmem:[#allocation2 + $0x30] sm:$0x3] }
 0x466   :  { %1084 = vmatpush1.bf16.msra.mxu0 %v3154_v40  ;;  %1125 = vmatpush1.bf16.msra.mxu1 %v3159_v41 }
 0x467   :  { %1199 = vmatprep.subr.bf16.mxu0 %v3383_v11  ;;  %1240 = vmatprep.subr.bf16.mxu1 %v3389_v14 }
 0x51c   :  { %v988_v16 = vpop.f32.mrb[24].mxu0  ;;  %v1029_v17 = vpop.f32.mrb[24].mxu1 }
 0x51d   :  { %v1036_v18 = vadd.f32 %v988_v16, %v946_v15  ;;  %v990_v20 = vpop.f32.mrb[25].mxu0  ;;  %v1031_v21 = vpop.f32.mrb[25].mxu1  ;;  %v1038_v40 = vadd.f32 %v1029_v17, %v948_v38  ;;  %v3508_v15 = vld [vmem:[%s4070_s2 + $0xc4] ss:$16 sps:$4 sm:$0xff]   ;;  %v3514_v16 = vld [vmem:[%s4070_s2 + $0xcc] ss:$16 sps:$4 sm:$0xff]  }
 0x51e   :  { %v1037_v22 = vadd.f32 %v990_v20, %v947_v19  ;;  %v992_v23 = vpop.f32.mrb[26].mxu0  ;;  %v1033_v25 = vpop.f32.mrb[26].mxu1  ;;  %v1039_v36 = vadd.f32 %v1031_v21, %v949_v33  ;;  %v3520_v17 = vld [vmem:[%s4070_s2 + $0xc0] ss:$16 sps:$4 sm:$0xff]   ;;  %v3532_v19 = vld [vmem:[%s4070_s2 + $0xe4] ss:$16 sps:$4 sm:$0xff]  }
 0x51f   :  { %v1040_v26 = vsub.f32 0.0, %v1036_v18  ;;  %v993_v27 = vpop.f32.mrb[27].mxu0  ;;  %v1034_v29 = vpop.f32.mrb[27].mxu1  ;;  %v3526_v18 = vld [vmem:[%s4070_s2 + $0xc8] ss:$16 sps:$4 sm:$0xff]  }
 0x520   :  { %v1045_v30 = vsub.f32 0.0, %v1037_v22  ;;  %v1051_v37 = vsub.f32 0.0, %v1039_v36  ;;  %v3538_v20 = vld [vmem:[%s4070_s2 + $0xec] ss:$16 sps:$4 sm:$0xff]   ;;  %v3544_v21 = vld [vmem:[%s4070_s2 + $0xe0] ss:$16 sps:$4 sm:$0xff]  }
 0x521   :  { %v1041_v32 = vmul.f32 1.442695, %v1040_v26  ;;  %v3550_v22 = vld [vmem:[%s4070_s2 + $0xe8] ss:$16 sps:$4 sm:$0xff]  }
 0x522   :  { %v1046_v34 = vmul.f32 1.442695, %v1045_v30  ;;  %v1052_v39 = vmul.f32 1.442695, %v1051_v37  ;;  %v1064_v30 = vld [vmem:[#allocation2 + $0x20] sm:$0xc] }
 0x523   :  { %2631 = vpow2.f32 %v1041_v32  ;;  %v1065_v37 = vld [vmem:[#allocation2 + $0x28] sm:$0xc] }
 0x524   :  { %2633 = vpow2.f32 %v1046_v34 }
 0x525   :  { %2635 = vpow2.f32 %v1052_v39 }
 0x526   :  { %2637 = vtanh.f32 %v1038_v40 }
 0x52d   :  { %v2632_v41 = vpop.eup %2631 }
 0x52e   :  { %v2634_v49 = vpop.eup %2633  ;;  %v1043_v4 = vadd.f32 1.0, %v2632_v41 }
 0x52f   :  { %v1048_v51 = vadd.f32 1.0, %v2634_v49  ;;  %v2636_v5 = vpop.eup %2635 }
 0x530   :  { %2639 = vrcp.f32 %v1043_v4  ;;  %v2638_v50 = vpop.eup %2637  ;;  %v1054_v28 = vadd.f32 1.0, %v2636_v5  ;;  %v1067_v5 = vld [vmem:[#allocation2 + $0x38] sm:$0xc] }
 0x531   :  { %2641 = vrcp.f32 %v1048_v51 }
 0x532   :  { %2643 = vrcp.f32 %v1054_v28 }
 0x53a   :  { %v2640_v2 = vpop.eup %2639 }
 0x53b   :  { %v2642_v24 = vpop.eup %2641  ;;  %v1060_v7 = vmul.f32 %v2640_v2, %v2638_v50 }
 0x53c   :  { %v1059_v31 = vmul.f32 %v2642_v24, %v1057_v6  ;;  %v2644_v43 = vpop.eup %2643 }
 0x53e   :  { %v3393_v42 = vadd.f32 %v1060_v7, %v1059_v31  ;;  %v1066_v7 = vld [vmem:[#allocation2 + $0x30] sm:$0xc] }
 0x540   :  { %2645 = vtanh.f32 %v3393_v42 }
 0x54a   :  { %v2646_v61 = vpop.eup %2645 }
 0x54b   :  { %v1063_v45 = vmul.f32 %v2646_v61, %v2644_v43 }
 0x54d   :  { %v1068_v46 = vpack.c.bf16 %v1063_v45, %v1063_v45 }
 0x54f   :  { %1102 = vmatmul.mubr.bf16.vlgmr.msra.gmra.mrb[28].mxu0 %v1068_v46  ;;  %1143 = vmatmul.mubr.bf16.vlgmr.msra.gmra.mrb[28].mxu1 %v1068_v46 }
 0x550   :  { %1200 = vmatpush1.bf16.msra.mxu0 %v3326_v55  ;;  %1241 = vmatpush1.bf16.msra.mxu1 %v3332_v63 }
 0x551   :  { %1201 = vmatprep.subr.bf16.mxu0 %v3338_v0  ;;  %1242 = vmatprep.subr.bf16.mxu1 %v3402_v47 }
 0x552   :  { %1231 = vmatprep.mubr.bf16.mxu0 %v2912_v35  ;;  %1272 = vmatprep.mubr.bf16.mxu1 %v2912_v35 }
 0x554   :  { %1202 = vmatpush1.bf16.msra.mxu0 %v3347_v1  ;;  %1243 = vmatpush1.bf16.msra.mxu1 %v3353_v3 }
 0x555   :  { %1203 = vmatprep.subr.bf16.mxu0 %v3412_v48  ;;  %1244 = vmatprep.subr.bf16.mxu1 %v3418_v52 }
 0x558   :  { %1204 = vmatpush1.bf16.msra.mxu0 %v3424_v54  ;;  %1245 = vmatpush1.bf16.msra.mxu1 %v3430_v44 }
 0x559   :  { %1205 = vmatprep.subr.bf16.mxu0 %v3436_v56  ;;  %1246 = vmatprep.subr.bf16.mxu1 %v3442_v57 }
 0x55c   :  { %1206 = vmatpush1.bf16.msra.mxu0 %v3448_v58  ;;  %1247 = vmatpush1.bf16.msra.mxu1 %v3454_v59 }
 0x55d   :  { %1207 = vmatprep.subr.bf16.mxu0 %v3460_v60  ;;  %1248 = vmatprep.subr.bf16.mxu1 %v3466_v8 }
 0x560   :  { %1208 = vmatpush1.bf16.msra.mxu0 %v3472_v9  ;;  %1249 = vmatpush1.bf16.msra.mxu1 %v3478_v10 }
 0x561   :  { %1209 = vmatprep.subr.bf16.mxu0 %v3484_v12  ;;  %1250 = vmatprep.subr.bf16.mxu1 %v3490_v13 }
 0x564   :  { %1210 = vmatpush1.bf16.msra.mxu0 %v3496_v53  ;;  %1251 = vmatpush1.bf16.msra.mxu1 %v3502_v62 }
 0x565   :  { %1211 = vmatprep.subr.bf16.mxu0 %v3508_v15  ;;  %1252 = vmatprep.subr.bf16.mxu1 %v3514_v16 }
 0x568   :  { %1212 = vmatpush1.bf16.msra.mxu0 %v3520_v17  ;;  %1253 = vmatpush1.bf16.msra.mxu1 %v3526_v18 }
 0x569   :  { %1213 = vmatprep.subr.bf16.mxu0 %v3532_v19  ;;  %1254 = vmatprep.subr.bf16.mxu1 %v3538_v20 }
 0x56c   :  { %1214 = vmatpush1.bf16.msra.mxu0 %v3544_v21  ;;  %1255 = vmatpush1.bf16.msra.mxu1 %v3550_v22 }
 0x56d   :  { %1329 = vmatprep.subr.bf16.mxu0 %v3383_v11  ;;  %1370 = vmatprep.subr.bf16.mxu1 %v3389_v14 }
 0x622   :  { %v1103_v23 = vpop.f32.mrb[28].mxu0  ;;  %v1144_v25 = vpop.f32.mrb[28].mxu1 }
 0x623   :  { %v1155_v26 = vrot.slane %v1103_v23, 6  ;;  %v1105_v27 = vpop.f32.mrb[29].mxu0  ;;  %v1146_v29 = vpop.f32.mrb[29].mxu1  ;;  %v1157_v24 = vrot.slane %v1144_v25, 6 }
 0x624   :  { %v1156_v32 = vrot.slane %v1105_v27, 6  ;;  %v1107_v33 = vpop.f32.mrb[30].mxu0  ;;  %v1148_v34 = vpop.f32.mrb[30].mxu1  ;;  %v1158_v41 = vrot.slane %v1146_v29, 6  ;;  %v1184_v29 = vrot.slane %v3393_v42, 6 }
 0x625   :  { %v1163_v36 = vadd.f32 %v1155_v26, %v1064_v30  ;;  %v1108_v38 = vpop.f32.mrb[31].mxu0  ;;  %v1149_v39 = vpop.f32.mrb[31].mxu1  ;;  %v1165_v31 = vadd.f32 %v1157_v24, %v1066_v7  ;;  %v1192_v7 = vld [vmem:[#allocation2 + $0x28] sm:$0x30] }
 0x626   :  { %v1164_v40 = vadd.f32 %v1156_v32, %v1065_v37  ;;  %v1166_v2 = vadd.f32 %v1158_v41, %v1067_v5  ;;  %v1191_v5 = vld [vmem:[#allocation2 + $0x20] sm:$0x30] }
 0x627   :  { %v1167_v49 = vsub.f32 0.0, %v1163_v36 }
 0x628   :  { %v1172_v4 = vsub.f32 0.0, %v1164_v40  ;;  %v1178_v6 = vsub.f32 0.0, %v1166_v2 }
 0x629   :  { %v1168_v51 = vmul.f32 1.442695, %v1167_v49 }
 0x62a   :  { %v1173_v50 = vmul.f32 1.442695, %v1172_v4  ;;  %v1179_v28 = vmul.f32 1.442695, %v1178_v6 }
 0x62b   :  { %2647 = vpow2.f32 %v1168_v51 }
 0x62c   :  { %2649 = vpow2.f32 %v1173_v50 }
 0x62d   :  { %2651 = vpow2.f32 %v1179_v28 }
 0x62e   :  { %2653 = vtanh.f32 %v1165_v31 }
 0x635   :  { %v2648_v43 = vpop.eup %2647 }
 0x636   :  { %v2650_v61 = vpop.eup %2649  ;;  %v1170_v45 = vadd.f32 1.0, %v2648_v43 }
 0x637   :  { %v1175_v46 = vadd.f32 1.0, %v2650_v61  ;;  %v2652_v23 = vpop.eup %2651 }
 0x638   :  { %2655 = vrcp.f32 %v1170_v45  ;;  %v2654_v26 = vpop.eup %2653  ;;  %v1181_v33 = vadd.f32 1.0, %v2652_v23 }
 0x639   :  { %2657 = vrcp.f32 %v1175_v46 }
 0x63a   :  { %2659 = vrcp.f32 %v1181_v33  ;;  %v1193_v33 = vld [vmem:[#allocation2 + $0x30] sm:$0x30] }
 0x642   :  { %v2656_v27 = vpop.eup %2655 }
 0x643   :  { %v2658_v30 = vpop.eup %2657  ;;  %v1187_v32 = vmul.f32 %v2656_v27, %v2654_v26  ;;  %v1194_v26 = vld [vmem:[#allocation2 + $0x38] sm:$0x30] }
 0x644   :  { %v1186_v25 = vmul.f32 %v2658_v30, %v1184_v29  ;;  %v2660_v36 = vpop.eup %2659 }
 0x646   :  { %v3556_v34 = vadd.f32 %v1187_v32, %v1186_v25 }
 0x648   :  { %2661 = vtanh.f32 %v3556_v34 }
 0x652   :  { %v2662_v37 = vpop.eup %2661 }
 0x653   :  { %v1190_v38 = vmul.f32 %v2662_v37, %v2660_v36 }
 0x655   :  { %v1195_v39 = vpack.c.bf16 %v1190_v38, %v1190_v38 }
 0x657   :  { %v1197_v40 = vrot.slane %v1195_v39, 1 }
 0x659   :  { %1232 = vmatmul.mubr.bf16.vlgmr.msra.gmra.mrb[32].mxu0 %v1197_v40  ;;  %1273 = vmatmul.mubr.bf16.vlgmr.msra.gmra.mrb[32].mxu1 %v1197_v40 }
 0x65a   :  { %1330 = vmatpush1.bf16.msra.mxu0 %v3326_v55  ;;  %1371 = vmatpush1.bf16.msra.mxu1 %v3332_v63 }
 0x65b   :  { %1331 = vmatprep.subr.bf16.mxu0 %v3338_v0  ;;  %1372 = vmatprep.subr.bf16.mxu1 %v3402_v47 }
 0x65c   :  { %1361 = vmatprep.mubr.bf16.mxu0 %v2912_v35  ;;  %1402 = vmatprep.mubr.bf16.mxu1 %v2912_v35 }
 0x65e   :  { %1332 = vmatpush1.bf16.msra.mxu0 %v3347_v1  ;;  %1373 = vmatpush1.bf16.msra.mxu1 %v3353_v3 }
 0x65f   :  { %1333 = vmatprep.subr.bf16.mxu0 %v3412_v48  ;;  %1374 = vmatprep.subr.bf16.mxu1 %v3418_v52 }
 0x662   :  { %1334 = vmatpush1.bf16.msra.mxu0 %v3424_v54  ;;  %1375 = vmatpush1.bf16.msra.mxu1 %v3430_v44 }
 0x663   :  { %1335 = vmatprep.subr.bf16.mxu0 %v3436_v56  ;;  %1376 = vmatprep.subr.bf16.mxu1 %v3442_v57 }
 0x666   :  { %1336 = vmatpush1.bf16.msra.mxu0 %v3448_v58  ;;  %1377 = vmatpush1.bf16.msra.mxu1 %v3454_v59 }
 0x667   :  { %1337 = vmatprep.subr.bf16.mxu0 %v3460_v60  ;;  %1378 = vmatprep.subr.bf16.mxu1 %v3466_v8 }
 0x66a   :  { %1338 = vmatpush1.bf16.msra.mxu0 %v3472_v9  ;;  %1379 = vmatpush1.bf16.msra.mxu1 %v3478_v10 }
 0x66b   :  { %1339 = vmatprep.subr.bf16.mxu0 %v3484_v12  ;;  %1380 = vmatprep.subr.bf16.mxu1 %v3490_v13 }
 0x66e   :  { %1340 = vmatpush1.bf16.msra.mxu0 %v3496_v53  ;;  %1381 = vmatpush1.bf16.msra.mxu1 %v3502_v62 }
 0x66f   :  { %1341 = vmatprep.subr.bf16.mxu0 %v3508_v15  ;;  %1382 = vmatprep.subr.bf16.mxu1 %v3514_v16 }
 0x672   :  { %1342 = vmatpush1.bf16.msra.mxu0 %v3520_v17  ;;  %1383 = vmatpush1.bf16.msra.mxu1 %v3526_v18 }
 0x673   :  { %1343 = vmatprep.subr.bf16.mxu0 %v3532_v19  ;;  %1384 = vmatprep.subr.bf16.mxu1 %v3538_v20 }
 0x676   :  { %1344 = vmatpush1.bf16.msra.mxu0 %v3544_v21  ;;  %1385 = vmatpush1.bf16.msra.mxu1 %v3550_v22 }
 0x677   :  { %1459 = vmatprep.subr.bf16.mxu0 %v3383_v11  ;;  %1500 = vmatprep.subr.bf16.mxu1 %v3389_v14 }
 0x72c   :  { %v1233_v42 = vpop.f32.mrb[32].mxu0  ;;  %v1274_v41 = vpop.f32.mrb[32].mxu1 }
 0x72d   :  { %v1285_v49 = vrot.slane %v1233_v42, 4  ;;  %v1235_v4 = vpop.f32.mrb[33].mxu0  ;;  %v1276_v51 = vpop.f32.mrb[33].mxu1  ;;  %v1287_v32 = vrot.slane %v1274_v41, 4 }
 0x72e   :  { %v1286_v50 = vrot.slane %v1235_v4, 4  ;;  %v1237_v2 = vpop.f32.mrb[34].mxu0  ;;  %v1278_v6 = vpop.f32.mrb[34].mxu1  ;;  %v1288_v61 = vrot.slane %v1276_v51, 4  ;;  %v1314_v51 = vrot.slane %v3556_v34, 6 }
 0x72f   :  { %v1293_v24 = vadd.f32 %v1285_v49, %v1191_v5  ;;  %v1238_v28 = vpop.f32.mrb[35].mxu0  ;;  %v1279_v31 = vpop.f32.mrb[35].mxu1  ;;  %v1295_v36 = vadd.f32 %v1287_v32, %v1193_v33  ;;  %v1322_v33 = vld [vmem:[#allocation2 + $0x28] sm:$0xc0] }
 0x730   :  { %v1294_v43 = vadd.f32 %v1286_v50, %v1192_v7  ;;  %v1296_v29 = vadd.f32 %v1288_v61, %v1194_v26  ;;  %v1321_v26 = vld [vmem:[#allocation2 + $0x20] sm:$0xc0] }
 0x731   :  { %v1297_v45 = vsub.f32 0.0, %v1293_v24 }
 0x732   :  { %v1302_v46 = vsub.f32 0.0, %v1294_v43  ;;  %v1308_v30 = vsub.f32 0.0, %v1296_v29 }
 0x733   :  { %v1298_v23 = vmul.f32 1.442695, %v1297_v45 }
 0x734   :  { %v1303_v27 = vmul.f32 1.442695, %v1302_v46  ;;  %v1309_v25 = vmul.f32 1.442695, %v1308_v30 }
 0x735   :  { %2663 = vpow2.f32 %v1298_v23 }
 0x736   :  { %2665 = vpow2.f32 %v1303_v27 }
 0x737   :  { %2667 = vpow2.f32 %v1309_v25 }
 0x738   :  { %2669 = vtanh.f32 %v1295_v36 }
 0x73f   :  { %v2664_v37 = vpop.eup %2663 }
 0x740   :  { %v2666_v38 = vpop.eup %2665  ;;  %v1300_v39 = vadd.f32 1.0, %v2664_v37 }
 0x741   :  { %v1305_v40 = vadd.f32 1.0, %v2666_v38  ;;  %v2668_v42 = vpop.eup %2667 }
 0x742   :  { %2671 = vrcp.f32 %v1300_v39  ;;  %v2670_v49 = vpop.eup %2669  ;;  %v1311_v2 = vadd.f32 1.0, %v2668_v42 }
 0x743   :  { %2673 = vrcp.f32 %v1305_v40 }
 0x744   :  { %2675 = vrcp.f32 %v1311_v2  ;;  %v1323_v2 = vld [vmem:[#allocation2 + $0x30] sm:$0xc0] }
 0x74c   :  { %v2672_v4 = vpop.eup %2671 }
 0x74d   :  { %v2674_v5 = vpop.eup %2673  ;;  %v1317_v50 = vmul.f32 %v2672_v4, %v2670_v49  ;;  %v1324_v49 = vld [vmem:[#allocation2 + $0x38] sm:$0xc0] }
 0x74e   :  { %v1316_v41 = vmul.f32 %v2674_v5, %v1314_v51  ;;  %v2676_v24 = vpop.eup %2675 }
 0x750   :  { %v3594_v6 = vadd.f32 %v1317_v50, %v1316_v41 }
 0x752   :  { %2677 = vtanh.f32 %v3594_v6 }
 0x75c   :  { %v2678_v7 = vpop.eup %2677 }
 0x75d   :  { %v1320_v28 = vmul.f32 %v2678_v7, %v2676_v24 }
 0x75f   :  { %v1325_v31 = vpack.c.bf16 %v1320_v28, %v1320_v28 }
 0x761   :  { %v1327_v43 = vrot.slane %v1325_v31, 2 }
 0x763   :  { %1362 = vmatmul.mubr.bf16.vlgmr.msra.gmra.mrb[36].mxu0 %v1327_v43  ;;  %1403 = vmatmul.mubr.bf16.vlgmr.msra.gmra.mrb[36].mxu1 %v1327_v43 }
 0x764   :  { %1460 = vmatpush1.bf16.msra.mxu0 %v3326_v55  ;;  %1501 = vmatpush1.bf16.msra.mxu1 %v3332_v63 }
 0x765   :  { %1461 = vmatprep.subr.bf16.mxu0 %v3338_v0  ;;  %1502 = vmatprep.subr.bf16.mxu1 %v3402_v47 }
 0x766   :  { %1491 = vmatprep.mubr.bf16.mxu0 %v2912_v35  ;;  %1532 = vmatprep.mubr.bf16.mxu1 %v2912_v35 }
 0x768   :  { %1462 = vmatpush1.bf16.msra.mxu0 %v3347_v1  ;;  %1503 = vmatpush1.bf16.msra.mxu1 %v3353_v3 }
 0x769   :  { %1463 = vmatprep.subr.bf16.mxu0 %v3412_v48  ;;  %1504 = vmatprep.subr.bf16.mxu1 %v3418_v52 }
 0x76c   :  { %1464 = vmatpush1.bf16.msra.mxu0 %v3424_v54  ;;  %1505 = vmatpush1.bf16.msra.mxu1 %v3430_v44 }
 0x76d   :  { %1465 = vmatprep.subr.bf16.mxu0 %v3436_v56  ;;  %1506 = vmatprep.subr.bf16.mxu1 %v3442_v57 }
 0x770   :  { %1466 = vmatpush1.bf16.msra.mxu0 %v3448_v58  ;;  %1507 = vmatpush1.bf16.msra.mxu1 %v3454_v59 }
 0x771   :  { %1467 = vmatprep.subr.bf16.mxu0 %v3460_v60  ;;  %1508 = vmatprep.subr.bf16.mxu1 %v3466_v8 }
 0x774   :  { %1468 = vmatpush1.bf16.msra.mxu0 %v3472_v9  ;;  %1509 = vmatpush1.bf16.msra.mxu1 %v3478_v10 }
 0x775   :  { %1469 = vmatprep.subr.bf16.mxu0 %v3484_v12  ;;  %1510 = vmatprep.subr.bf16.mxu1 %v3490_v13 }
 0x778   :  { %1470 = vmatpush1.bf16.msra.mxu0 %v3496_v53  ;;  %1511 = vmatpush1.bf16.msra.mxu1 %v3502_v62 }
 0x779   :  { %1471 = vmatprep.subr.bf16.mxu0 %v3508_v15  ;;  %1512 = vmatprep.subr.bf16.mxu1 %v3514_v16 }
 0x77c   :  { %1472 = vmatpush1.bf16.msra.mxu0 %v3520_v17  ;;  %1513 = vmatpush1.bf16.msra.mxu1 %v3526_v18 }
 0x77d   :  { %1473 = vmatprep.subr.bf16.mxu0 %v3532_v19  ;;  %1514 = vmatprep.subr.bf16.mxu1 %v3538_v20 }
 0x780   :  { %1474 = vmatpush1.bf16.msra.mxu0 %v3544_v21  ;;  %1515 = vmatpush1.bf16.msra.mxu1 %v3550_v22 }
 0x781   :  { %1574 = vmatprep.subr.bf16.mxu0 %v3383_v11  ;;  %1615 = vmatprep.subr.bf16.mxu1 %v3389_v14 }
 0x836   :  { %v1363_v34 = vpop.f32.mrb[36].mxu0  ;;  %v1404_v61 = vpop.f32.mrb[36].mxu1 }
 0x837   :  { %v1415_v45 = vrot.slane %v1363_v34, 2  ;;  %v1365_v46 = vpop.f32.mrb[37].mxu0  ;;  %v1406_v23 = vpop.f32.mrb[37].mxu1  ;;  %v1417_v50 = vrot.slane %v1404_v61, 2 }
 0x838   :  { %v1416_v27 = vrot.slane %v1365_v46, 2  ;;  %v1367_v29 = vpop.f32.mrb[38].mxu0  ;;  %v1408_v30 = vpop.f32.mrb[38].mxu1  ;;  %v1418_v38 = vrot.slane %v1406_v23, 2  ;;  %v1444_v23 = vrot.slane %v3594_v6, 6 }
 0x839   :  { %v1423_v32 = vadd.f32 %v1415_v45, %v1321_v26  ;;  %v1368_v25 = vpop.f32.mrb[39].mxu0  ;;  %v1409_v36 = vpop.f32.mrb[39].mxu1  ;;  %v1425_v24 = vadd.f32 %v1417_v50, %v1323_v2  ;;  %v1451_v6 = vld [vmem:[#allocation2 + $0x40] sm:$0x3] }
 0x83a   :  { %v1424_v37 = vadd.f32 %v1416_v27, %v1322_v33  ;;  %v1426_v51 = vadd.f32 %v1418_v38, %v1324_v49 }
 0x83b   :  { %v1427_v39 = vsub.f32 0.0, %v1423_v32 }
 0x83c   :  { %v1432_v40 = vsub.f32 0.0, %v1424_v37  ;;  %v1438_v5 = vsub.f32 0.0, %v1426_v51 }
 0x83d   :  { %v1428_v42 = vmul.f32 1.442695, %v1427_v39 }
 0x83e   :  { %v1433_v4 = vmul.f32 1.442695, %v1432_v40  ;;  %v1439_v41 = vmul.f32 1.442695, %v1438_v5 }
 0x83f   :  { %2679 = vpow2.f32 %v1428_v42  ;;  %v1452_v42 = vld [vmem:[#allocation2 + $0x48] sm:$0x3] }
 0x840   :  { %2681 = vpow2.f32 %v1433_v4 }
 0x841   :  { %2683 = vpow2.f32 %v1439_v41 }
 0x842   :  { %2685 = vtanh.f32 %v1425_v24 }
 0x849   :  { %v2680_v7 = vpop.eup %2679 }
 0x84a   :  { %v2682_v28 = vpop.eup %2681  ;;  %v1430_v31 = vadd.f32 1.0, %v2680_v7 }
 0x84b   :  { %v1435_v43 = vadd.f32 1.0, %v2682_v28  ;;  %v2684_v34 = vpop.eup %2683 }
 0x84c   :  { %2687 = vrcp.f32 %v1430_v31  ;;  %v2686_v45 = vpop.eup %2685  ;;  %v1441_v29 = vadd.f32 1.0, %v2684_v34  ;;  %v1454_v31 = vld [vmem:[#allocation2 + $0x58] sm:$0x3] }
 0x84d   :  { %2689 = vrcp.f32 %v1435_v43 }
 0x84e   :  { %2691 = vrcp.f32 %v1441_v29 }
 0x856   :  { %v2688_v46 = vpop.eup %2687 }
 0x857   :  { %v2690_v26 = vpop.eup %2689  ;;  %v1447_v27 = vmul.f32 %v2688_v46, %v2686_v45  ;;  %v1453_v46 = vld [vmem:[#allocation2 + $0x50] sm:$0x3] }
 0x858   :  { %v1446_v61 = vmul.f32 %v2690_v26, %v1444_v23  ;;  %v2692_v32 = vpop.eup %2691 }
 0x85a   :  { %v3632_v30 = vadd.f32 %v1447_v27, %v1446_v61 }
 0x85c   :  { %2693 = vtanh.f32 %v3632_v30 }
 0x866   :  { %v2694_v33 = vpop.eup %2693 }
 0x867   :  { %v1450_v25 = vmul.f32 %v2694_v33, %v2692_v32 }
 0x869   :  { %v1455_v36 = vpack.c.bf16 %v1450_v25, %v1450_v25 }
 0x86b   :  { %v1457_v37 = vrot.slane %v1455_v36, 3 }
 0x86d   :  { %1492 = vmatmul.mubr.bf16.vlgmr.msra.gmra.mrb[40].mxu0 %v1457_v37  ;;  %1533 = vmatmul.mubr.bf16.vlgmr.msra.gmra.mrb[40].mxu1 %v1457_v37  ;;  %v1562_v37 = vrot.slane %v3632_v30, 6  ;;  %v1569_v30 = vld [vmem:[#allocation2 + $0x40] sm:$0xc] }
 0x86e   :  { %1575 = vmatpush1.bf16.msra.mxu0 %v3326_v55  ;;  %1616 = vmatpush1.bf16.msra.mxu1 %v3332_v63 }
 0x86f   :  { %1576 = vmatprep.subr.bf16.mxu0 %v3338_v0  ;;  %1617 = vmatprep.subr.bf16.mxu1 %v3402_v47 }
 0x870   :  { %1606 = vmatprep.mubr.bf16.mxu0 %v2912_v35  ;;  %1647 = vmatprep.mubr.bf16.mxu1 %v2912_v35 }
 0x872   :  { %1577 = vmatpush1.bf16.msra.mxu0 %v3347_v1  ;;  %1618 = vmatpush1.bf16.msra.mxu1 %v3353_v3 }
 0x873   :  { %1578 = vmatprep.subr.bf16.mxu0 %v3412_v48  ;;  %1619 = vmatprep.subr.bf16.mxu1 %v3418_v52 }
 0x876   :  { %1579 = vmatpush1.bf16.msra.mxu0 %v3424_v54  ;;  %1620 = vmatpush1.bf16.msra.mxu1 %v3430_v44 }
 0x877   :  { %1580 = vmatprep.subr.bf16.mxu0 %v3436_v56  ;;  %1621 = vmatprep.subr.bf16.mxu1 %v3442_v57 }
 0x87a   :  { %1581 = vmatpush1.bf16.msra.mxu0 %v3448_v58  ;;  %1622 = vmatpush1.bf16.msra.mxu1 %v3454_v59 }
 0x87b   :  { %1582 = vmatprep.subr.bf16.mxu0 %v3460_v60  ;;  %1623 = vmatprep.subr.bf16.mxu1 %v3466_v8 }
 0x87e   :  { %1583 = vmatpush1.bf16.msra.mxu0 %v3472_v9  ;;  %1624 = vmatpush1.bf16.msra.mxu1 %v3478_v10 }
 0x87f   :  { %1584 = vmatprep.subr.bf16.mxu0 %v3484_v12  ;;  %1625 = vmatprep.subr.bf16.mxu1 %v3490_v13 }
 0x882   :  { %1585 = vmatpush1.bf16.msra.mxu0 %v3496_v53  ;;  %1626 = vmatpush1.bf16.msra.mxu1 %v3502_v62 }
 0x883   :  { %1586 = vmatprep.subr.bf16.mxu0 %v3508_v15  ;;  %1627 = vmatprep.subr.bf16.mxu1 %v3514_v16 }
 0x886   :  { %1587 = vmatpush1.bf16.msra.mxu0 %v3520_v17  ;;  %1628 = vmatpush1.bf16.msra.mxu1 %v3526_v18 }
 0x887   :  { %1588 = vmatprep.subr.bf16.mxu0 %v3532_v19  ;;  %1629 = vmatprep.subr.bf16.mxu1 %v3538_v20 }
 0x88a   :  { %1589 = vmatpush1.bf16.msra.mxu0 %v3544_v21  ;;  %1630 = vmatpush1.bf16.msra.mxu1 %v3550_v22 }
 0x88b   :  { %1704 = vmatprep.subr.bf16.mxu0 %v3383_v11  ;;  %1745 = vmatprep.subr.bf16.mxu1 %v3389_v14 }
 0x940   :  { %v1493_v38 = vpop.f32.mrb[40].mxu0  ;;  %v1534_v39 = vpop.f32.mrb[40].mxu1 }
 0x941   :  { %v1541_v40 = vadd.f32 %v1493_v38, %v1451_v6  ;;  %v1495_v49 = vpop.f32.mrb[41].mxu0  ;;  %v1536_v4 = vpop.f32.mrb[41].mxu1  ;;  %v1543_v26 = vadd.f32 %v1534_v39, %v1453_v46 }
 0x942   :  { %v1542_v51 = vadd.f32 %v1495_v49, %v1452_v42  ;;  %v1497_v5 = vpop.f32.mrb[42].mxu0  ;;  %v1538_v50 = vpop.f32.mrb[42].mxu1  ;;  %v1544_v34 = vadd.f32 %v1536_v4, %v1454_v31 }
 0x943   :  { %v1545_v2 = vsub.f32 0.0, %v1541_v40  ;;  %v1498_v41 = vpop.f32.mrb[43].mxu0  ;;  %v1539_v24 = vpop.f32.mrb[43].mxu1 }
 0x944   :  { %v1550_v7 = vsub.f32 0.0, %v1542_v51  ;;  %v1556_v45 = vsub.f32 0.0, %v1544_v34 }
 0x945   :  { %v1546_v28 = vmul.f32 1.442695, %v1545_v2 }
 0x946   :  { %v1551_v43 = vmul.f32 1.442695, %v1550_v7  ;;  %v1557_v23 = vmul.f32 1.442695, %v1556_v45  ;;  %v1570_v7 = vld [vmem:[#allocation2 + $0x48] sm:$0xc] }
 0x947   :  { %2695 = vpow2.f32 %v1546_v28 }
 0x948   :  { %2697 = vpow2.f32 %v1551_v43 }
 0x949   :  { %2699 = vpow2.f32 %v1557_v23  ;;  %v1572_v23 = vld [vmem:[#allocation2 + $0x58] sm:$0xc] }
 0x94a   :  { %2701 = vtanh.f32 %v1543_v26 }
 0x951   :  { %v2696_v27 = vpop.eup %2695 }
 0x952   :  { %v2698_v29 = vpop.eup %2697  ;;  %v1548_v61 = vadd.f32 1.0, %v2696_v27 }
 0x953   :  { %v1553_v32 = vadd.f32 1.0, %v2698_v29  ;;  %v2700_v33 = vpop.eup %2699 }
 0x954   :  { %2703 = vrcp.f32 %v1548_v61  ;;  %v2702_v25 = vpop.eup %2701  ;;  %v1559_v40 = vadd.f32 1.0, %v2700_v33  ;;  %v1571_v61 = vld [vmem:[#allocation2 + $0x50] sm:$0xc] }
 0x955   :  { %2705 = vrcp.f32 %v1553_v32 }
 0x956   :  { %2707 = vrcp.f32 %v1559_v40 }
 0x95e   :  { %v2704_v36 = vpop.eup %2703 }
 0x95f   :  { %v2706_v6 = vpop.eup %2705  ;;  %v1565_v38 = vmul.f32 %v2704_v36, %v2702_v25 }
 0x960   :  { %v1564_v42 = vmul.f32 %v2706_v6, %v1562_v37  ;;  %v2708_v39 = vpop.eup %2707 }
 0x962   :  { %v3670_v49 = vadd.f32 %v1565_v38, %v1564_v42 }
 0x964   :  { %2709 = vtanh.f32 %v3670_v49 }
 0x96e   :  { %v2710_v4 = vpop.eup %2709 }
 0x96f   :  { %v1568_v51 = vmul.f32 %v2710_v4, %v2708_v39  ;;  %v1689_v39 = vrot.slane %v3670_v49, 6  ;;  %v3714_v49 = vld [vmem:[%s4070_s2] ss:$16 sps:$4 sm:$0xff]  }
 0x971   :  { %v1573_v5 = vpack.c.bf16 %v1568_v51, %v1568_v51 }
 0x973   :  { %1607 = vmatmul.mubr.bf16.vlgmr.msra.gmra.mrb[44].mxu0 %v1573_v5  ;;  %1648 = vmatmul.mubr.bf16.vlgmr.msra.gmra.mrb[44].mxu1 %v1573_v5 }
 0x974   :  { %1705 = vmatpush1.bf16.msra.mxu0 %v3326_v55  ;;  %1746 = vmatpush1.bf16.msra.mxu1 %v3332_v63 }
 0x975   :  { %1706 = vmatprep.subr.bf16.mxu0 %v3338_v0  ;;  %1747 = vmatprep.subr.bf16.mxu1 %v3402_v47 }
 0x976   :  { %1736 = vmatprep.mubr.bf16.mxu0 %v2912_v35  ;;  %1777 = vmatprep.mubr.bf16.mxu1 %v2912_v35 }
 0x978   :  { %1707 = vmatpush1.bf16.msra.mxu0 %v3347_v1  ;;  %1748 = vmatpush1.bf16.msra.mxu1 %v3353_v3 }
 0x979   :  { %1708 = vmatprep.subr.bf16.mxu0 %v3412_v48  ;;  %1749 = vmatprep.subr.bf16.mxu1 %v3418_v52 }
 0x97c   :  { %1709 = vmatpush1.bf16.msra.mxu0 %v3424_v54  ;;  %1750 = vmatpush1.bf16.msra.mxu1 %v3430_v44 }
 0x97d   :  { %1710 = vmatprep.subr.bf16.mxu0 %v3436_v56  ;;  %1751 = vmatprep.subr.bf16.mxu1 %v3442_v57 }
 0x980   :  { %1711 = vmatpush1.bf16.msra.mxu0 %v3448_v58  ;;  %1752 = vmatpush1.bf16.msra.mxu1 %v3454_v59 }
 0x981   :  { %1712 = vmatprep.subr.bf16.mxu0 %v3460_v60  ;;  %1753 = vmatprep.subr.bf16.mxu1 %v3466_v8 }
 0x984   :  { %1713 = vmatpush1.bf16.msra.mxu0 %v3472_v9  ;;  %1754 = vmatpush1.bf16.msra.mxu1 %v3478_v10 }
 0x985   :  { %1714 = vmatprep.subr.bf16.mxu0 %v3484_v12  ;;  %1755 = vmatprep.subr.bf16.mxu1 %v3490_v13 }
 0x988   :  { %1715 = vmatpush1.bf16.msra.mxu0 %v3496_v53  ;;  %1756 = vmatpush1.bf16.msra.mxu1 %v3502_v62 }
 0x989   :  { %1716 = vmatprep.subr.bf16.mxu0 %v3508_v15  ;;  %1757 = vmatprep.subr.bf16.mxu1 %v3514_v16 }
 0x98c   :  { %1717 = vmatpush1.bf16.msra.mxu0 %v3520_v17  ;;  %1758 = vmatpush1.bf16.msra.mxu1 %v3526_v18 }
 0x98d   :  { %1718 = vmatprep.subr.bf16.mxu0 %v3532_v19  ;;  %1759 = vmatprep.subr.bf16.mxu1 %v3538_v20 }
 0x990   :  { %1719 = vmatpush1.bf16.msra.mxu0 %v3544_v21  ;;  %1760 = vmatpush1.bf16.msra.mxu1 %v3550_v22 }
 0x991   :  { %1834 = vmatprep.subr.bf16.mxu0 %v3383_v11  ;;  %1875 = vmatprep.subr.bf16.mxu1 %v3389_v14 }
 0xa46   :  { %v1608_v55 = vpop.f32.mrb[44].mxu0  ;;  %v1649_v63 = vpop.f32.mrb[44].mxu1 }
 0xa47   :  { %v1660_v0 = vrot.slane %v1608_v55, 6  ;;  %v1610_v1 = vpop.f32.mrb[45].mxu0  ;;  %v1651_v3 = vpop.f32.mrb[45].mxu1  ;;  %v1662_v29 = vrot.slane %v1649_v63, 6 }
 0xa48   :  { %v1661_v50 = vrot.slane %v1610_v1, 6  ;;  %v1612_v2 = vpop.f32.mrb[46].mxu0  ;;  %v1653_v41 = vpop.f32.mrb[46].mxu1  ;;  %v1663_v34 = vrot.slane %v1651_v3, 6 }
 0xa49   :  { %v1668_v24 = vadd.f32 %v1660_v0, %v1569_v30  ;;  %v1613_v28 = vpop.f32.mrb[47].mxu0  ;;  %v1654_v31 = vpop.f32.mrb[47].mxu1  ;;  %v1670_v33 = vadd.f32 %v1662_v29, %v1571_v61  ;;  %v3720_v2 = vld [vmem:[%s4070_s2 + $0x8] ss:$16 sps:$4 sm:$0xff]   ;;  %v3726_v41 = vld [vmem:[%s4070_s2 + $0x24] ss:$16 sps:$4 sm:$0xff]  }
 0xa4a   :  { %v1669_v43 = vadd.f32 %v1661_v50, %v1570_v7  ;;  %v1671_v26 = vadd.f32 %v1663_v34, %v1572_v23  ;;  %v3741_v7 = vld [vmem:[%s4070_s2 + $0x28] ss:$16 sps:$4 sm:$0xff]   ;;  %v1698_v28 = vld [vmem:[#allocation2 + $0x50] sm:$0x30] }
 0xa4b   :  { %v1672_v45 = vsub.f32 0.0, %v1668_v24  ;;  %v3735_v24 = vld [vmem:[%s4070_s2 + $0x20] ss:$16 sps:$4 sm:$0xff]  }
 0xa4c   :  { %v1677_v46 = vsub.f32 0.0, %v1669_v43  ;;  %v1683_v27 = vsub.f32 0.0, %v1671_v26 }
 0xa4d   :  { %v1673_v11 = vmul.f32 1.442695, %v1672_v45 }
 0xa4e   :  { %v1678_v14 = vmul.f32 1.442695, %v1677_v46  ;;  %v1684_v32 = vmul.f32 1.442695, %v1683_v27 }
 0xa4f   :  { %2711 = vpow2.f32 %v1673_v11 }
 0xa50   :  { %2713 = vpow2.f32 %v1678_v14 }
 0xa51   :  { %2715 = vpow2.f32 %v1684_v32 }
 0xa52   :  { %2717 = vtanh.f32 %v1670_v33 }
 0xa59   :  { %v2712_v25 = vpop.eup %2711 }
 0xa5a   :  { %v2714_v36 = vpop.eup %2713  ;;  %v1675_v37 = vadd.f32 1.0, %v2712_v25 }
 0xa5b   :  { %v1680_v6 = vadd.f32 1.0, %v2714_v36  ;;  %v2716_v38 = vpop.eup %2715 }
 0xa5c   :  { %2719 = vrcp.f32 %v1675_v37  ;;  %v2718_v40 = vpop.eup %2717  ;;  %v1686_v5 = vadd.f32 1.0, %v2716_v38 }
 0xa5d   :  { %2721 = vrcp.f32 %v1680_v6 }
 0xa5e   :  { %2723 = vrcp.f32 %v1686_v5  ;;  %v3818_v5 = vld [vmem:[%s4070_s2 + $0x48] ss:$16 sps:$4 sm:$0xff]  }
 0xa66   :  { %v2720_v42 = vpop.eup %2719 }
 0xa67   :  { %v2722_v4 = vpop.eup %2721  ;;  %v1692_v51 = vmul.f32 %v2720_v42, %v2718_v40  ;;  %v3790_v42 = vld [vmem:[%s4070_s2 + $0x2c] ss:$16 sps:$4 sm:$0xff]  }
 0xa68   :  { %v1691_v55 = vmul.f32 %v2722_v4, %v1689_v39  ;;  %v2724_v0 = vpop.eup %2723  ;;  %v3800_v39 = vld [vmem:[%s4070_s2 + $0x44] ss:$16 sps:$4 sm:$0xff]   ;;  %v3806_v4 = vld [vmem:[%s4070_s2 + $0x4c] ss:$16 sps:$4 sm:$0xff]  }
 0xa6a   :  { %v3708_v63 = vadd.f32 %v1692_v51, %v1691_v55  ;;  %v3812_v51 = vld [vmem:[%s4070_s2 + $0x40] ss:$16 sps:$4 sm:$0xff]   ;;  %v3824_v55 = vld [vmem:[%s4070_s2 + $0x64] ss:$16 sps:$4 sm:$0xff]  }
 0xa6c   :  { %2725 = vtanh.f32 %v3708_v63  ;;  %v1819_v27 = vrot.slane %v3708_v63, 6  ;;  %v3830_v63 = vld [vmem:[%s4070_s2 + $0x6c] ss:$16 sps:$4 sm:$0xff]  }
 0xa76   :  { %v2726_v1 = vpop.eup %2725 }
 0xa77   :  { %v1695_v3 = vmul.f32 %v2726_v1, %v2724_v0  ;;  %v3836_v0 = vld [vmem:[%s4070_s2 + $0x60] ss:$16 sps:$4 sm:$0xff]   ;;  %v3842_v1 = vld [vmem:[%s4070_s2 + $0x68] ss:$16 sps:$4 sm:$0xff]  }
 0xa79   :  { %v1700_v30 = vpack.c.bf16 %v1695_v3, %v1695_v3  ;;  %v3848_v3 = vld [vmem:[%s4070_s2 + $0x84] ss:$16 sps:$4 sm:$0xff]  }
 0xa7b   :  { %v1702_v50 = vrot.slane %v1700_v30, 1  ;;  %v3854_v30 = vld [vmem:[%s4070_s2 + $0x8c] ss:$16 sps:$4 sm:$0xff]  }
 0xa7d   :  { %1737 = vmatmul.mubr.bf16.vlgmr.msra.gmra.mrb[48].mxu0 %v1702_v50  ;;  %1778 = vmatmul.mubr.bf16.vlgmr.msra.gmra.mrb[48].mxu1 %v1702_v50  ;;  %v3860_v50 = vld [vmem:[%s4070_s2 + $0x80] ss:$16 sps:$4 sm:$0xff]  }
 0xa7e   :  { %1835 = vmatpush1.bf16.msra.mxu0 %v3714_v49  ;;  %1876 = vmatpush1.bf16.msra.mxu1 %v3720_v2 }
 0xa7f   :  { %1836 = vmatprep.subr.bf16.mxu0 %v3726_v41  ;;  %1877 = vmatprep.subr.bf16.mxu1 %v3402_v47  ;;  %v3771_v47 = vld [vmem:[%s4070_s2 + $0x4] ss:$16 sps:$4 sm:$0xff]  }
 0xa80   :  { %1866 = vmatprep.mubr.bf16.mxu0 %v2912_v35  ;;  %1907 = vmatprep.mubr.bf16.mxu1 %v2912_v35 }
 0xa82   :  { %1837 = vmatpush1.bf16.msra.mxu0 %v3735_v24  ;;  %1878 = vmatpush1.bf16.msra.mxu1 %v3741_v7 }
 0xa83   :  { %1838 = vmatprep.subr.bf16.mxu0 %v3412_v48  ;;  %1879 = vmatprep.subr.bf16.mxu1 %v3418_v52  ;;  %v3777_v48 = vld [vmem:[%s4070_s2 + $0xc] ss:$16 sps:$4 sm:$0xff]  }
 0xa86   :  { %1839 = vmatpush1.bf16.msra.mxu0 %v3424_v54  ;;  %1880 = vmatpush1.bf16.msra.mxu1 %v3430_v44 }
 0xa87   :  { %1840 = vmatprep.subr.bf16.mxu0 %v3436_v56  ;;  %1881 = vmatprep.subr.bf16.mxu1 %v3442_v57 }
 0xa8a   :  { %1841 = vmatpush1.bf16.msra.mxu0 %v3448_v58  ;;  %1882 = vmatpush1.bf16.msra.mxu1 %v3454_v59  ;;  %v1696_v58 = vld [vmem:[#allocation2 + $0x40] sm:$0x30] }
 0xa8b   :  { %1842 = vmatprep.subr.bf16.mxu0 %v3460_v60  ;;  %1883 = vmatprep.subr.bf16.mxu1 %v3466_v8 }
 0xa8e   :  { %1843 = vmatpush1.bf16.msra.mxu0 %v3472_v9  ;;  %1884 = vmatpush1.bf16.msra.mxu1 %v3478_v10  ;;  %v1697_v10 = vld [vmem:[#allocation2 + $0x48] sm:$0x30] }
 0xa8f   :  { %1844 = vmatprep.subr.bf16.mxu0 %v3484_v12  ;;  %1885 = vmatprep.subr.bf16.mxu1 %v3490_v13 }
 0xa92   :  { %1845 = vmatpush1.bf16.msra.mxu0 %v3496_v53  ;;  %1886 = vmatpush1.bf16.msra.mxu1 %v3502_v62 }
 0xa93   :  { %1846 = vmatprep.subr.bf16.mxu0 %v3508_v15  ;;  %1887 = vmatprep.subr.bf16.mxu1 %v3514_v16 }
 0xa96   :  { %1847 = vmatpush1.bf16.msra.mxu0 %v3520_v17  ;;  %1888 = vmatpush1.bf16.msra.mxu1 %v3526_v18  ;;  %v1699_v18 = vld [vmem:[#allocation2 + $0x58] sm:$0x30] }
 0xa97   :  { %1848 = vmatprep.subr.bf16.mxu0 %v3532_v19  ;;  %1889 = vmatprep.subr.bf16.mxu1 %v3538_v20 }
 0xa9a   :  { %1849 = vmatpush1.bf16.msra.mxu0 %v3544_v21  ;;  %1890 = vmatpush1.bf16.msra.mxu1 %v3550_v22 }
 0xa9b   :  { %1964 = vmatprep.subr.bf16.mxu0 %v3771_v47  ;;  %2005 = vmatprep.subr.bf16.mxu1 %v3777_v48 }
 0xb50   :  { %v1738_v52 = vpop.f32.mrb[48].mxu0  ;;  %v1779_v54 = vpop.f32.mrb[48].mxu1 }
 0xb51   :  { %v1790_v44 = vrot.slane %v1738_v52, 4  ;;  %v1740_v56 = vpop.f32.mrb[49].mxu0  ;;  %v1781_v57 = vpop.f32.mrb[49].mxu1  ;;  %v1792_v22 = vrot.slane %v1779_v54, 4  ;;  %v3866_v52 = vld [vmem:[%s4070_s2 + $0x88] ss:$16 sps:$4 sm:$0xff]  }
 0xb52   :  { %v1791_v59 = vrot.slane %v1740_v56, 4  ;;  %v1742_v60 = vpop.f32.mrb[50].mxu0  ;;  %v1783_v8 = vpop.f32.mrb[50].mxu1  ;;  %v1793_v62 = vrot.slane %v1781_v57, 4  ;;  %v3872_v54 = vld [vmem:[%s4070_s2 + $0xa4] ss:$16 sps:$4 sm:$0xff]  }
 0xb53   :  { %v1798_v9 = vadd.f32 %v1790_v44, %v1696_v58  ;;  %v1743_v12 = vpop.f32.mrb[51].mxu0  ;;  %v1784_v13 = vpop.f32.mrb[51].mxu1  ;;  %v1800_v43 = vadd.f32 %v1792_v22, %v1698_v28  ;;  %v3878_v44 = vld [vmem:[%s4070_s2 + $0xac] ss:$16 sps:$4 sm:$0xff]   ;;  %v3884_v56 = vld [vmem:[%s4070_s2 + $0xa0] ss:$16 sps:$4 sm:$0xff]  }
 0xb54   :  { %v1799_v53 = vadd.f32 %v1791_v59, %v1697_v10  ;;  %v1801_v20 = vadd.f32 %v1793_v62, %v1699_v18  ;;  %v3890_v57 = vld [vmem:[%s4070_s2 + $0xa8] ss:$16 sps:$4 sm:$0xff]   ;;  %v3896_v58 = vld [vmem:[%s4070_s2 + $0xc4] ss:$16 sps:$4 sm:$0xff]   ;;  %v3902_v59 = vld [vmem:[%s4070_s2 + $0xcc] ss:$16 sps:$4 sm:$0xff]  }
 0xb55   :  { %v1802_v15 = vsub.f32 0.0, %v1798_v9  ;;  %v3908_v60 = vld [vmem:[%s4070_s2 + $0xc0] ss:$16 sps:$4 sm:$0xff]   ;;  %v3914_v8 = vld [vmem:[%s4070_s2 + $0xc8] ss:$16 sps:$4 sm:$0xff]  }
 0xb56   :  { %v1807_v16 = vsub.f32 0.0, %v1799_v53  ;;  %v1813_v21 = vsub.f32 0.0, %v1801_v20  ;;  %v3920_v9 = vld [vmem:[%s4070_s2 + $0xe4] ss:$16 sps:$4 sm:$0xff]   ;;  %v3926_v10 = vld [vmem:[%s4070_s2 + $0xec] ss:$16 sps:$4 sm:$0xff]  }
 0xb57   :  { %v1803_v17 = vmul.f32 1.442695, %v1802_v15  ;;  %v3932_v12 = vld [vmem:[%s4070_s2 + $0xe0] ss:$16 sps:$4 sm:$0xff]   ;;  %v3938_v13 = vld [vmem:[%s4070_s2 + $0xe8] ss:$16 sps:$4 sm:$0xff]  }
 0xb58   :  { %v1808_v19 = vmul.f32 1.442695, %v1807_v16  ;;  %v1814_v31 = vmul.f32 1.442695, %v1813_v21  ;;  %v1826_v18 = vld [vmem:[#allocation2 + $0x40] sm:$0xc0] }
 0xb59   :  { %2727 = vpow2.f32 %v1803_v17  ;;  %v1827_v28 = vld [vmem:[#allocation2 + $0x48] sm:$0xc0]  ;;  %s2913_s2 = smov [#allocation3]  }
 0xb5a   :  { %2729 = vpow2.f32 %v1808_v19  ;;  %s2468_s26 = sshll.u32 %s2913_s2, 4  ;;  %s2469_s26 = int_to_ptr.vmem [resolvable:$true] %s2468_s26 }
 0xb5b   :  { %2731 = vpow2.f32 %v1814_v31  ;;  %s2887_s0 = scalar_lea.vmem %s2469_s26, 32  ;;  %p2892_p1 = scmp.lt.s32.totalorder %s2469_s26, %s2469_s26 }
 0xb5c   :  { %2733 = vtanh.f32 %v1800_v43  ;;  %p2888_p0 = scmp.ne.s32.totalorder %s2469_s26, %s2887_s0  ;;  %p2893_p2 = scmp.lt.s32.totalorder %s2887_s0, %s2887_s0 }
 0xb5e   :  { %p2894_p3 = por %p2893_p2, %p2892_p1 }
 0xb60   :  { %p2895_p4 = pnand %p2894_p3, %p2888_p0 }
 0xb63   :  { %v2728_v34 = vpop.eup %2727 }
 0xb64   :  { %v2730_v45 = vpop.eup %2729  ;;  %v1805_v46 = vadd.f32 1.0, %v2728_v34 }
 0xb65   :  { %v1810_v11 = vadd.f32 1.0, %v2730_v45  ;;  %v2732_v23 = vpop.eup %2731 }
 0xb66   :  { %2735 = vrcp.f32 %v1805_v46  ;;  %v2734_v14 = vpop.eup %2733  ;;  %v1816_v32 = vadd.f32 1.0, %v2732_v23 }
 0xb67   :  { %2737 = vrcp.f32 %v1810_v11 }
 0xb68   :  { %2739 = vrcp.f32 %v1816_v32  ;;  %v1828_v32 = vld [vmem:[#allocation2 + $0x50] sm:$0xc0] }
 0xb70   :  { %v2736_v26 = vpop.eup %2735 }
 0xb71   :  { %v2738_v29 = vpop.eup %2737  ;;  %v1822_v61 = vmul.f32 %v2736_v26, %v2734_v14  ;;  %v1829_v14 = vld [vmem:[#allocation2 + $0x58] sm:$0xc0] }
 0xb72   :  { %v1821_v33 = vmul.f32 %v2738_v29, %v1819_v27  ;;  %v2740_v36 = vpop.eup %2739 }
 0xb74   :  { %v3781_v25 = vadd.f32 %v1822_v61, %v1821_v33 }
 0xb76   :  { %2741 = vtanh.f32 %v3781_v25 }
 0xb80   :  { %v2742_v37 = vpop.eup %2741 }
 0xb81   :  { %v1825_v6 = vmul.f32 %v2742_v37, %v2740_v36 }
 0xb83   :  { %v1830_v38 = vpack.c.bf16 %v1825_v6, %v1825_v6 }
 0xb85   :  { %v1832_v40 = vrot.slane %v1830_v38, 2 }
 0xb87   :  { %1867 = vmatmul.mubr.bf16.vlgmr.msra.gmra.mrb[52].mxu0 %v1832_v40  ;;  %1908 = vmatmul.mubr.bf16.vlgmr.msra.gmra.mrb[52].mxu1 %v1832_v40 }
 0xb88   :  { %1965 = vmatpush1.bf16.msra.mxu0 %v3714_v49  ;;  %2006 = vmatpush1.bf16.msra.mxu1 %v3720_v2 }
 0xb89   :  { %1966 = vmatprep.subr.bf16.mxu0 %v3726_v41  ;;  %2007 = vmatprep.subr.bf16.mxu1 %v3790_v42 }
 0xb8a   :  { %1996 = vmatprep.mubr.bf16.mxu0 %v2912_v35  ;;  %2037 = vmatprep.mubr.bf16.mxu1 %v2912_v35 }
 0xb8c   :  { %1967 = vmatpush1.bf16.msra.mxu0 %v3735_v24  ;;  %2008 = vmatpush1.bf16.msra.mxu1 %v3741_v7 }
 0xb8d   :  { %1968 = vmatprep.subr.bf16.mxu0 %v3800_v39  ;;  %2009 = vmatprep.subr.bf16.mxu1 %v3806_v4 }
 0xb90   :  { %1969 = vmatpush1.bf16.msra.mxu0 %v3812_v51  ;;  %2010 = vmatpush1.bf16.msra.mxu1 %v3818_v5 }
 0xb91   :  { %1970 = vmatprep.subr.bf16.mxu0 %v3824_v55  ;;  %2011 = vmatprep.subr.bf16.mxu1 %v3830_v63 }
 0xb94   :  { %1971 = vmatpush1.bf16.msra.mxu0 %v3836_v0  ;;  %2012 = vmatpush1.bf16.msra.mxu1 %v3842_v1 }
 0xb95   :  { %1972 = vmatprep.subr.bf16.mxu0 %v3848_v3  ;;  %2013 = vmatprep.subr.bf16.mxu1 %v3854_v30 }
 0xb98   :  { %1973 = vmatpush1.bf16.msra.mxu0 %v3860_v50  ;;  %2014 = vmatpush1.bf16.msra.mxu1 %v3866_v52 }
 0xb99   :  { %1974 = vmatprep.subr.bf16.mxu0 %v3872_v54  ;;  %2015 = vmatprep.subr.bf16.mxu1 %v3878_v44 }
 0xb9c   :  { %1975 = vmatpush1.bf16.msra.mxu0 %v3884_v56  ;;  %2016 = vmatpush1.bf16.msra.mxu1 %v3890_v57 }
 0xb9d   :  { %1976 = vmatprep.subr.bf16.mxu0 %v3896_v58  ;;  %2017 = vmatprep.subr.bf16.mxu1 %v3902_v59 }
 0xba0   :  { %1977 = vmatpush1.bf16.msra.mxu0 %v3908_v60  ;;  %2018 = vmatpush1.bf16.msra.mxu1 %v3914_v8 }
 0xba1   :  { %1978 = vmatprep.subr.bf16.mxu0 %v3920_v9  ;;  %2019 = vmatprep.subr.bf16.mxu1 %v3926_v10 }
 0xba4   :  { %1979 = vmatpush1.bf16.msra.mxu0 %v3932_v12  ;;  %2020 = vmatpush1.bf16.msra.mxu1 %v3938_v13 }
 0xba5   :  { %2079 = vmatprep.subr.bf16.mxu0 %v3771_v47  ;;  %2120 = vmatprep.subr.bf16.mxu1 %v3777_v48 }
 0xc5a   :  { %v1868_v53 = vpop.f32.mrb[52].mxu0  ;;  %v1909_v62 = vpop.f32.mrb[52].mxu1 }
 0xc5b   :  { %v1920_v15 = vrot.slane %v1868_v53, 2  ;;  %v1870_v16 = vpop.f32.mrb[53].mxu0  ;;  %v1911_v17 = vpop.f32.mrb[53].mxu1  ;;  %v1922_v61 = vrot.slane %v1909_v62, 2 }
 0xc5c   :  { %v1921_v19 = vrot.slane %v1870_v16, 2  ;;  %v1872_v20 = vpop.f32.mrb[54].mxu0  ;;  %v1913_v21 = vpop.f32.mrb[54].mxu1  ;;  %v1923_v45 = vrot.slane %v1911_v17, 2  ;;  %v1949_v17 = vrot.slane %v3781_v25, 6 }
 0xc5d   :  { %v1928_v22 = vadd.f32 %v1920_v15, %v1826_v18  ;;  %v1873_v31 = vpop.f32.mrb[55].mxu0  ;;  %v1914_v43 = vpop.f32.mrb[55].mxu1  ;;  %v1930_v36 = vadd.f32 %v1922_v61, %v1828_v32  ;;  %v1956_v25 = vld [vmem:[#allocation2 + $0x60] sm:$0x3] }
 0xc5e   :  { %v1929_v34 = vadd.f32 %v1921_v19, %v1827_v28  ;;  %v1931_v27 = vadd.f32 %v1923_v45, %v1829_v14 }
 0xc5f   :  { %v1932_v46 = vsub.f32 0.0, %v1928_v22 }
 0xc60   :  { %v1937_v11 = vsub.f32 0.0, %v1929_v34  ;;  %v1943_v29 = vsub.f32 0.0, %v1931_v27 }
 0xc61   :  { %v1933_v23 = vmul.f32 1.442695, %v1932_v46 }
 0xc62   :  { %v1938_v26 = vmul.f32 1.442695, %v1937_v11  ;;  %v1944_v33 = vmul.f32 1.442695, %v1943_v29 }
 0xc63   :  { %2743 = vpow2.f32 %v1933_v23  ;;  %v1957_v23 = vld [vmem:[#allocation2 + $0x68] sm:$0x3] }
 0xc64   :  { %2745 = vpow2.f32 %v1938_v26 }
 0xc65   :  { %2747 = vpow2.f32 %v1944_v33 }
 0xc66   :  { %2749 = vtanh.f32 %v1930_v36 }
 0xc6d   :  { %v2744_v37 = vpop.eup %2743 }
 0xc6e   :  { %v2746_v6 = vpop.eup %2745  ;;  %v1935_v38 = vadd.f32 1.0, %v2744_v37 }
 0xc6f   :  { %v1940_v40 = vadd.f32 1.0, %v2746_v6  ;;  %v2748_v53 = vpop.eup %2747 }
 0xc70   :  { %2751 = vrcp.f32 %v1935_v38  ;;  %v2750_v15 = vpop.eup %2749  ;;  %v1946_v20 = vadd.f32 1.0, %v2748_v53  ;;  %v1959_v38 = vld [vmem:[#allocation2 + $0x78] sm:$0x3] }
 0xc71   :  { %2753 = vrcp.f32 %v1940_v40 }
 0xc72   :  { %2755 = vrcp.f32 %v1946_v20 }
 0xc7a   :  { %v2752_v16 = vpop.eup %2751 }
 0xc7b   :  { %v2754_v18 = vpop.eup %2753  ;;  %v1952_v19 = vmul.f32 %v2752_v16, %v2750_v15  ;;  %v1958_v16 = vld [vmem:[#allocation2 + $0x70] sm:$0x3] }
 0xc7c   :  { %v1951_v62 = vmul.f32 %v2754_v18, %v1949_v17  ;;  %v2756_v22 = vpop.eup %2755 }
 0xc7e   :  { %v3944_v21 = vadd.f32 %v1952_v19, %v1951_v62 }
 0xc80   :  { %2757 = vtanh.f32 %v3944_v21 }
 0xc8a   :  { %v2758_v28 = vpop.eup %2757 }
 0xc8b   :  { %v1955_v31 = vmul.f32 %v2758_v28, %v2756_v22 }
 0xc8d   :  { %v1960_v43 = vpack.c.bf16 %v1955_v31, %v1955_v31 }
 0xc8f   :  { %v1962_v34 = vrot.slane %v1960_v43, 3 }
 0xc91   :  { %1997 = vmatmul.mubr.bf16.vlgmr.msra.gmra.mrb[56].mxu0 %v1962_v34  ;;  %2038 = vmatmul.mubr.bf16.vlgmr.msra.gmra.mrb[56].mxu1 %v1962_v34  ;;  %v2067_v34 = vrot.slane %v3944_v21, 6 }
 0xc92   :  { %2080 = vmatpush1.bf16.msra.mxu0 %v3714_v49  ;;  %2121 = vmatpush1.bf16.msra.mxu1 %v3720_v2 }
 0xc93   :  { %2081 = vmatprep.subr.bf16.mxu0 %v3726_v41  ;;  %2122 = vmatprep.subr.bf16.mxu1 %v3790_v42 }
 0xc94   :  { %2111 = vmatprep.mubr.bf16.mxu0 %v2912_v35  ;;  %2152 = vmatprep.mubr.bf16.mxu1 %v2912_v35 }
 0xc96   :  { %2082 = vmatpush1.bf16.msra.mxu0 %v3735_v24  ;;  %2123 = vmatpush1.bf16.msra.mxu1 %v3741_v7 }
 0xc97   :  { %2083 = vmatprep.subr.bf16.mxu0 %v3800_v39  ;;  %2124 = vmatprep.subr.bf16.mxu1 %v3806_v4 }
 0xc9a   :  { %2084 = vmatpush1.bf16.msra.mxu0 %v3812_v51  ;;  %2125 = vmatpush1.bf16.msra.mxu1 %v3818_v5 }
 0xc9b   :  { %2085 = vmatprep.subr.bf16.mxu0 %v3824_v55  ;;  %2126 = vmatprep.subr.bf16.mxu1 %v3830_v63 }
 0xc9e   :  { %2086 = vmatpush1.bf16.msra.mxu0 %v3836_v0  ;;  %2127 = vmatpush1.bf16.msra.mxu1 %v3842_v1 }
 0xc9f   :  { %2087 = vmatprep.subr.bf16.mxu0 %v3848_v3  ;;  %2128 = vmatprep.subr.bf16.mxu1 %v3854_v30 }
 0xca2   :  { %2088 = vmatpush1.bf16.msra.mxu0 %v3860_v50  ;;  %2129 = vmatpush1.bf16.msra.mxu1 %v3866_v52 }
 0xca3   :  { %2089 = vmatprep.subr.bf16.mxu0 %v3872_v54  ;;  %2130 = vmatprep.subr.bf16.mxu1 %v3878_v44 }
 0xca6   :  { %2090 = vmatpush1.bf16.msra.mxu0 %v3884_v56  ;;  %2131 = vmatpush1.bf16.msra.mxu1 %v3890_v57 }
 0xca7   :  { %2091 = vmatprep.subr.bf16.mxu0 %v3896_v58  ;;  %2132 = vmatprep.subr.bf16.mxu1 %v3902_v59 }
 0xcaa   :  { %2092 = vmatpush1.bf16.msra.mxu0 %v3908_v60  ;;  %2133 = vmatpush1.bf16.msra.mxu1 %v3914_v8 }
 0xcab   :  { %2093 = vmatprep.subr.bf16.mxu0 %v3920_v9  ;;  %2134 = vmatprep.subr.bf16.mxu1 %v3926_v10 }
 0xcae   :  { %2094 = vmatpush1.bf16.msra.mxu0 %v3932_v12  ;;  %2135 = vmatpush1.bf16.msra.mxu1 %v3938_v13 }
 0xcaf   :  { %2209 = vmatprep.subr.bf16.mxu0 %v3771_v47  ;;  %2250 = vmatprep.subr.bf16.mxu1 %v3777_v48 }
 0xd64   :  { %v1998_v45 = vpop.f32.mrb[56].mxu0  ;;  %v2039_v46 = vpop.f32.mrb[56].mxu1 }
 0xd65   :  { %v2046_v11 = vadd.f32 %v1998_v45, %v1956_v25  ;;  %v2000_v14 = vpop.f32.mrb[57].mxu0  ;;  %v2041_v26 = vpop.f32.mrb[57].mxu1  ;;  %v2048_v18 = vadd.f32 %v2039_v46, %v1958_v16 }
 0xd66   :  { %v2047_v27 = vadd.f32 %v2000_v14, %v1957_v23  ;;  %v2002_v29 = vpop.f32.mrb[58].mxu0  ;;  %v2043_v61 = vpop.f32.mrb[58].mxu1  ;;  %v2049_v53 = vadd.f32 %v2041_v26, %v1959_v38 }
 0xd67   :  { %v2050_v32 = vsub.f32 0.0, %v2046_v11  ;;  %v2003_v33 = vpop.f32.mrb[59].mxu0  ;;  %v2044_v36 = vpop.f32.mrb[59].mxu1 }
 0xd68   :  { %v2055_v37 = vsub.f32 0.0, %v2047_v27  ;;  %v2061_v15 = vsub.f32 0.0, %v2049_v53 }
 0xd69   :  { %v2051_v6 = vmul.f32 1.442695, %v2050_v32 }
 0xd6a   :  { %v2056_v40 = vmul.f32 1.442695, %v2055_v37  ;;  %v2062_v17 = vmul.f32 1.442695, %v2061_v15  ;;  %v2074_v37 = vld [vmem:[#allocation2 + $0x60] sm:$0xc] }
 0xd6b   :  { %2759 = vpow2.f32 %v2051_v6  ;;  %v2075_v15 = vld [vmem:[#allocation2 + $0x68] sm:$0xc] }
 0xd6c   :  { %2761 = vpow2.f32 %v2056_v40 }
 0xd6d   :  { %2763 = vpow2.f32 %v2062_v17 }
 0xd6e   :  { %2765 = vtanh.f32 %v2048_v18 }
 0xd75   :  { %v2760_v19 = vpop.eup %2759 }
 0xd76   :  { %v2762_v20 = vpop.eup %2761  ;;  %v2053_v62 = vadd.f32 1.0, %v2760_v19 }
 0xd77   :  { %v2058_v22 = vadd.f32 1.0, %v2762_v20  ;;  %v2764_v28 = vpop.eup %2763 }
 0xd78   :  { %2767 = vrcp.f32 %v2053_v62  ;;  %v2766_v31 = vpop.eup %2765  ;;  %v2064_v11 = vadd.f32 1.0, %v2764_v28 }
 0xd79   :  { %2769 = vrcp.f32 %v2058_v22  ;;  %v2077_v22 = vld [vmem:[#allocation2 + $0x78] sm:$0xc] }
 0xd7a   :  { %2771 = vrcp.f32 %v2064_v11 }
 0xd82   :  { %v2768_v43 = vpop.eup %2767 }
 0xd83   :  { %v2770_v25 = vpop.eup %2769  ;;  %v2070_v45 = vmul.f32 %v2768_v43, %v2766_v31 }
 0xd84   :  { %v2069_v23 = vmul.f32 %v2770_v25, %v2067_v34  ;;  %v2772_v46 = vpop.eup %2771  ;;  %v2076_v34 = vld [vmem:[#allocation2 + $0x70] sm:$0xc] }
 0xd86   :  { %v3982_v14 = vadd.f32 %v2070_v45, %v2069_v23 }
 0xd88   :  { %2773 = vtanh.f32 %v3982_v14 }
 0xd92   :  { %v2774_v26 = vpop.eup %2773 }
 0xd93   :  { %v2073_v27 = vmul.f32 %v2774_v26, %v2772_v46 }
 0xd95   :  { %v2078_v29 = vpack.c.bf16 %v2073_v27, %v2073_v27 }
 0xd97   :  { %2112 = vmatmul.mubr.bf16.vlgmr.msra.gmra.mrb[60].mxu0 %v2078_v29  ;;  %2153 = vmatmul.mubr.bf16.vlgmr.msra.gmra.mrb[60].mxu1 %v2078_v29 }
 0xd98   :  { %2210 = vmatpush1.bf16.msra.mxu0 %v3714_v49  ;;  %2251 = vmatpush1.bf16.msra.mxu1 %v3720_v2 }
 0xd99   :  { %2211 = vmatprep.subr.bf16.mxu0 %v3726_v41  ;;  %2252 = vmatprep.subr.bf16.mxu1 %v3790_v42 }
 0xd9a   :  { %2241 = vmatprep.mubr.bf16.mxu0 %v2912_v35  ;;  %2282 = vmatprep.mubr.bf16.mxu1 %v2912_v35 }
 0xd9c   :  { %2212 = vmatpush1.bf16.msra.mxu0 %v3735_v24  ;;  %2253 = vmatpush1.bf16.msra.mxu1 %v3741_v7 }
 0xd9d   :  { %2213 = vmatprep.subr.bf16.mxu0 %v3800_v39  ;;  %2254 = vmatprep.subr.bf16.mxu1 %v3806_v4 }
 0xda0   :  { %2214 = vmatpush1.bf16.msra.mxu0 %v3812_v51  ;;  %2255 = vmatpush1.bf16.msra.mxu1 %v3818_v5 }
 0xda1   :  { %2215 = vmatprep.subr.bf16.mxu0 %v3824_v55  ;;  %2256 = vmatprep.subr.bf16.mxu1 %v3830_v63 }
 0xda4   :  { %2216 = vmatpush1.bf16.msra.mxu0 %v3836_v0  ;;  %2257 = vmatpush1.bf16.msra.mxu1 %v3842_v1 }
 0xda5   :  { %2217 = vmatprep.subr.bf16.mxu0 %v3848_v3  ;;  %2258 = vmatprep.subr.bf16.mxu1 %v3854_v30 }
 0xda8   :  { %2218 = vmatpush1.bf16.msra.mxu0 %v3860_v50  ;;  %2259 = vmatpush1.bf16.msra.mxu1 %v3866_v52 }
 0xda9   :  { %2219 = vmatprep.subr.bf16.mxu0 %v3872_v54  ;;  %2260 = vmatprep.subr.bf16.mxu1 %v3878_v44 }
 0xdac   :  { %2220 = vmatpush1.bf16.msra.mxu0 %v3884_v56  ;;  %2261 = vmatpush1.bf16.msra.mxu1 %v3890_v57 }
 0xdad   :  { %2221 = vmatprep.subr.bf16.mxu0 %v3896_v58  ;;  %2262 = vmatprep.subr.bf16.mxu1 %v3902_v59 }
 0xdb0   :  { %2222 = vmatpush1.bf16.msra.mxu0 %v3908_v60  ;;  %2263 = vmatpush1.bf16.msra.mxu1 %v3914_v8 }
 0xdb1   :  { %2223 = vmatprep.subr.bf16.mxu0 %v3920_v9  ;;  %2264 = vmatprep.subr.bf16.mxu1 %v3926_v10 }
 0xdb4   :  { %2224 = vmatpush1.bf16.msra.mxu0 %v3932_v12  ;;  %2265 = vmatpush1.bf16.msra.mxu1 %v3938_v13 }
 0xdb5   :  { %2339 = vmatprep.subr.bf16.mxu0 %v3771_v47  ;;  %2380 = vmatprep.subr.bf16.mxu1 %v3777_v48 }
 0xe6a   :  { %v2113_v21 = vpop.f32.mrb[60].mxu0  ;;  %v2154_v61 = vpop.f32.mrb[60].mxu1 }
 0xe6b   :  { %v2165_v32 = vrot.slane %v2113_v21, 6  ;;  %v2115_v33 = vpop.f32.mrb[61].mxu0  ;;  %v2156_v36 = vpop.f32.mrb[61].mxu1  ;;  %v2167_v43 = vrot.slane %v2154_v61, 6 }
 0xe6c   :  { %v2166_v6 = vrot.slane %v2115_v33, 6  ;;  %v2117_v38 = vpop.f32.mrb[62].mxu0  ;;  %v2158_v40 = vpop.f32.mrb[62].mxu1  ;;  %v2168_v19 = vrot.slane %v2156_v36, 6 }
 0xe6d   :  { %v2173_v53 = vadd.f32 %v2165_v32, %v2074_v37  ;;  %v2118_v16 = vpop.f32.mrb[63].mxu0  ;;  %v2159_v17 = vpop.f32.mrb[63].mxu1  ;;  %v2175_v45 = vadd.f32 %v2167_v43, %v2076_v34  ;;  %v2194_v32 = vrot.slane %v3982_v14, 6 }
 0xe6e   :  { %v2174_v18 = vadd.f32 %v2166_v6, %v2075_v15  ;;  %v2176_v28 = vadd.f32 %v2168_v19, %v2077_v22 }
 0xe6f   :  { %v2177_v20 = vsub.f32 0.0, %v2173_v53 }
 0xe70   :  { %v2182_v62 = vsub.f32 0.0, %v2174_v18  ;;  %v2188_v31 = vsub.f32 0.0, %v2176_v28 }
 0xe71   :  { %v2178_v47 = vmul.f32 1.442695, %v2177_v20 }
 0xe72   :  { %v2183_v48 = vmul.f32 1.442695, %v2182_v62  ;;  %v2189_v25 = vmul.f32 1.442695, %v2188_v31 }
 0xe73   :  { %2775 = vpow2.f32 %v2178_v47 }
 0xe74   :  { %2777 = vpow2.f32 %v2183_v48 }
 0xe75   :  { %2779 = vpow2.f32 %v2189_v25 }
 0xe76   :  { %2781 = vtanh.f32 %v2175_v45 }
 0xe7d   :  { %v2776_v11 = vpop.eup %2775 }
 0xe7e   :  { %v2778_v23 = vpop.eup %2777  ;;  %v2180_v46 = vadd.f32 1.0, %v2776_v11 }
 0xe7f   :  { %v2185_v26 = vadd.f32 1.0, %v2778_v23  ;;  %v2780_v27 = vpop.eup %2779 }
 0xe80   :  { %2783 = vrcp.f32 %v2180_v46  ;;  %v2782_v29 = vpop.eup %2781  ;;  %v2191_v37 = vadd.f32 1.0, %v2780_v27 }
 0xe81   :  { %2785 = vrcp.f32 %v2185_v26  ;;  %v2331_v26 = vld [vmem:[#allocation2 + $0x60] sm:$0xc0] }
 0xe82   :  { %2787 = vrcp.f32 %v2191_v37 }
 0xe8a   :  { %v2784_v21 = vpop.eup %2783 }
 0xe8b   :  { %v2786_v33 = vpop.eup %2785  ;;  %v2197_v36 = vmul.f32 %v2784_v21, %v2782_v29 }
 0xe8c   :  { %v2196_v61 = vmul.f32 %v2786_v33, %v2194_v32  ;;  %v2788_v38 = vpop.eup %2787  ;;  %v2332_v33 = vld [vmem:[#allocation2 + $0x68] sm:$0xc0] }
 0xe8e   :  { %v4020_v6 = vadd.f32 %v2197_v36, %v2196_v61 }
 0xe90   :  { %2789 = vtanh.f32 %v4020_v6  ;;  %v2324_v18 = vrot.slane %v4020_v6, 6 }
 0xe9a   :  { %v2790_v40 = vpop.eup %2789 }
 0xe9b   :  { %v2200_v53 = vmul.f32 %v2790_v40, %v2788_v38 }
 0xe9d   :  { %v2205_v15 = vpack.c.bf16 %v2200_v53, %v2200_v53 }
 0xe9f   :  { %v2207_v16 = vrot.slane %v2205_v15, 1  ;;  %v2334_v15 = vld [vmem:[#allocation2 + $0x78] sm:$0xc0] }
 0xea1   :  { %2242 = vmatmul.mubr.bf16.vlgmr.msra.gmra.mrb[64].mxu0 %v2207_v16  ;;  %2283 = vmatmul.mubr.bf16.vlgmr.msra.gmra.mrb[64].mxu1 %v2207_v16 }
 0xea2   :  { %2340 = vmatpush1.bf16.msra.mxu0 %v3714_v49  ;;  %2381 = vmatpush1.bf16.msra.mxu1 %v3720_v2 }
 0xea3   :  { %2341 = vmatprep.subr.bf16.mxu0 %v3726_v41  ;;  %2382 = vmatprep.subr.bf16.mxu1 %v3790_v42 }
 0xea4   :  { %2371 = vmatprep.mubr.bf16.mxu0 %v2912_v35  ;;  %2412 = vmatprep.mubr.bf16.mxu1 %v2912_v35 }
 0xea6   :  { %2342 = vmatpush1.bf16.msra.mxu0 %v3735_v24  ;;  %2383 = vmatpush1.bf16.msra.mxu1 %v3741_v7  ;;  %v2201_v7 = vld [vmem:[#allocation2 + $0x60] sm:$0x30] }
 0xea7   :  { %2343 = vmatprep.subr.bf16.mxu0 %v3800_v39  ;;  %2384 = vmatprep.subr.bf16.mxu1 %v3806_v4 }
 0xeaa   :  { %2344 = vmatpush1.bf16.msra.mxu0 %v3812_v51  ;;  %2385 = vmatpush1.bf16.msra.mxu1 %v3818_v5  ;;  %v2202_v5 = vld [vmem:[#allocation2 + $0x68] sm:$0x30] }
 0xeab   :  { %2345 = vmatprep.subr.bf16.mxu0 %v3824_v55  ;;  %2386 = vmatprep.subr.bf16.mxu1 %v3830_v63 }
 0xeae   :  { %2346 = vmatpush1.bf16.msra.mxu0 %v3836_v0  ;;  %2387 = vmatpush1.bf16.msra.mxu1 %v3842_v1 }
 0xeaf   :  { %2347 = vmatprep.subr.bf16.mxu0 %v3848_v3  ;;  %2388 = vmatprep.subr.bf16.mxu1 %v3854_v30 }
 0xeb2   :  { %2348 = vmatpush1.bf16.msra.mxu0 %v3860_v50  ;;  %2389 = vmatpush1.bf16.msra.mxu1 %v3866_v52  ;;  %v2204_v52 = vld [vmem:[#allocation2 + $0x78] sm:$0x30] }
 0xeb3   :  { %2349 = vmatprep.subr.bf16.mxu0 %v3872_v54  ;;  %2390 = vmatprep.subr.bf16.mxu1 %v3878_v44 }
 0xeb6   :  { %2350 = vmatpush1.bf16.msra.mxu0 %v3884_v56  ;;  %2391 = vmatpush1.bf16.msra.mxu1 %v3890_v57 }
 0xeb7   :  { %2351 = vmatprep.subr.bf16.mxu0 %v3896_v58  ;;  %2392 = vmatprep.subr.bf16.mxu1 %v3902_v59  ;;  %v2203_v58 = vld [vmem:[#allocation2 + $0x70] sm:$0x30] }
 0xeba   :  { %2352 = vmatpush1.bf16.msra.mxu0 %v3908_v60  ;;  %2393 = vmatpush1.bf16.msra.mxu1 %v3914_v8 }
 0xebb   :  { %2353 = vmatprep.subr.bf16.mxu0 %v3920_v9  ;;  %2394 = vmatprep.subr.bf16.mxu1 %v3926_v10 }
 0xebe   :  { %2354 = vmatpush1.bf16.msra.mxu0 %v3932_v12  ;;  %2395 = vmatpush1.bf16.msra.mxu1 %v3938_v13 }
 0xf74   :  { %v2243_v35 = vpop.f32.mrb[64].mxu0  ;;  %v2284_v49 = vpop.f32.mrb[64].mxu1 }
 0xf75   :  { %v2295_v2 = vrot.slane %v2243_v35, 4  ;;  %v2245_v41 = vpop.f32.mrb[65].mxu0  ;;  %v2286_v24 = vpop.f32.mrb[65].mxu1  ;;  %v2297_v57 = vrot.slane %v2284_v49, 4 }
 0xf76   :  { %v2296_v42 = vrot.slane %v2245_v41, 4  ;;  %v2247_v39 = vpop.f32.mrb[66].mxu0  ;;  %v2288_v4 = vpop.f32.mrb[66].mxu1  ;;  %v2298_v1 = vrot.slane %v2286_v24, 4  ;;  %v2333_v41 = vld [vmem:[#allocation2 + $0x70] sm:$0xc0] }
 0xf77   :  { %v2303_v51 = vadd.f32 %v2295_v2, %v2201_v7  ;;  %v2248_v55 = vpop.f32.mrb[67].mxu0  ;;  %v2289_v63 = vpop.f32.mrb[67].mxu1  ;;  %v2305_v60 = vadd.f32 %v2297_v57, %v2203_v58 }
 0xf78   :  { %v2304_v0 = vadd.f32 %v2296_v42, %v2202_v5  ;;  %v2306_v44 = vadd.f32 %v2298_v1, %v2204_v52 }
 0xf79   :  { %v2307_v3 = vsub.f32 0.0, %v2303_v51 }
 0xf7a   :  { %v2312_v30 = vsub.f32 0.0, %v2304_v0  ;;  %v2318_v56 = vsub.f32 0.0, %v2306_v44 }
 0xf7b   :  { %v2308_v50 = vmul.f32 1.442695, %v2307_v3 }
 0xf7c   :  { %v2313_v54 = vmul.f32 1.442695, %v2312_v30  ;;  %v2319_v59 = vmul.f32 1.442695, %v2318_v56 }
 0xf7d   :  { %2791 = vpow2.f32 %v2308_v50 }
 0xf7e   :  { %2793 = vpow2.f32 %v2313_v54 }
 0xf7f   :  { %2795 = vpow2.f32 %v2319_v59 }
 0xf80   :  { %2797 = vtanh.f32 %v2305_v60 }
 0xf87   :  { %v2792_v8 = vpop.eup %2791 }
 0xf88   :  { %v2794_v9 = vpop.eup %2793  ;;  %v2310_v10 = vadd.f32 1.0, %v2792_v8 }
 0xf89   :  { %v2315_v12 = vadd.f32 1.0, %v2794_v9  ;;  %v2796_v13 = vpop.eup %2795 }
 0xf8a   :  { %2799 = vrcp.f32 %v2310_v10  ;;  %v2798_v14 = vpop.eup %2797  ;;  %v2321_v62 = vadd.f32 1.0, %v2796_v13 }
 0xf8b   :  { %2801 = vrcp.f32 %v2315_v12 }
 0xf8c   :  { %2803 = vrcp.f32 %v2321_v62 }
 0xf94   :  { %v2800_v17 = vpop.eup %2799 }
 0xf95   :  { %v2802_v19 = vpop.eup %2801  ;;  %v2327_v20 = vmul.f32 %v2800_v17, %v2798_v14 }
 0xf96   :  { %v2326_v47 = vmul.f32 %v2802_v19, %v2324_v18  ;;  %v2804_v48 = vpop.eup %2803 }
 0xf98   :  { %v2328_v22 = vadd.f32 %v2327_v20, %v2326_v47 }
 0xf9a   :  { %2805 = vtanh.f32 %v2328_v22  ;;  %v2454_v0 = vrot.slane %v2328_v22, 6 }
 0xfa4   :  { %v2806_v28 = vpop.eup %2805 }
 0xfa5   :  { %v2330_v31 = vmul.f32 %v2806_v28, %v2804_v48 }
 0xfa7   :  { %v2335_v43 = vpack.c.bf16 %v2330_v31, %v2330_v31 }
 0xfa9   :  { %v2337_v34 = vrot.slane %v2335_v43, 2 }
 0xfab   :  { %2372 = vmatmul.mubr.bf16.vlgmr.msra.gmra.mrb[68].mxu0 %v2337_v34  ;;  %2413 = vmatmul.mubr.bf16.vlgmr.msra.gmra.mrb[68].mxu1 %v2337_v34 }
0x107e   :  { %v2373_v25 = vpop.f32.mrb[68].mxu0  ;;  %v2414_v45 = vpop.f32.mrb[68].mxu1 }
0x107f   :  { %v2425_v11 = vrot.slane %v2373_v25, 2  ;;  %v2375_v23 = vpop.f32.mrb[69].mxu0  ;;  %v2416_v46 = vpop.f32.mrb[69].mxu1  ;;  %v2427_v2 = vrot.slane %v2414_v45, 2 }
0x1080   :  { %v2426_v27 = vrot.slane %v2375_v23, 2  ;;  %v2377_v29 = vpop.f32.mrb[70].mxu0  ;;  %v2418_v21 = vpop.f32.mrb[70].mxu1  ;;  %v2428_v6 = vrot.slane %v2416_v46, 2 }
0x1081   :  { %v2433_v32 = vadd.f32 %v2425_v11, %v2331_v26  ;;  %v2378_v36 = vpop.f32.mrb[71].mxu0  ;;  %v2419_v37 = vpop.f32.mrb[71].mxu1  ;;  %v2435_v7 = vadd.f32 %v2427_v2, %v2333_v41 }
0x1082   :  { %v2434_v61 = vadd.f32 %v2426_v27, %v2332_v33  ;;  %v2436_v35 = vadd.f32 %v2428_v6, %v2334_v15 }
0x1083   :  { %v2437_v38 = vsub.f32 0.0, %v2433_v32 }
0x1084   :  { %v2442_v40 = vsub.f32 0.0, %v2434_v61  ;;  %v2448_v49 = vsub.f32 0.0, %v2436_v35 }
0x1085   :  { %v2438_v53 = vmul.f32 1.442695, %v2437_v38 }
0x1086   :  { %v2443_v16 = vmul.f32 1.442695, %v2442_v40  ;;  %v2449_v24 = vmul.f32 1.442695, %v2448_v49 }
0x1087   :  { %2807 = vpow2.f32 %v2438_v53 }
0x1088   :  { %2809 = vpow2.f32 %v2443_v16 }
0x1089   :  { %2811 = vpow2.f32 %v2449_v24 }
0x108a   :  { %2813 = vtanh.f32 %v2435_v7 }
0x1091   :  { %v2808_v42 = vpop.eup %2807 }
0x1092   :  { %v2810_v39 = vpop.eup %2809  ;;  %v2440_v4 = vadd.f32 1.0, %v2808_v42 }
0x1093   :  { %v2445_v51 = vadd.f32 1.0, %v2810_v39  ;;  %v2812_v5 = vpop.eup %2811 }
0x1094   :  { %2815 = vrcp.f32 %v2440_v4  ;;  %v2814_v55 = vpop.eup %2813  ;;  %v2451_v30 = vadd.f32 1.0, %v2812_v5 }
0x1095   :  { %2817 = vrcp.f32 %v2445_v51 }
0x1096   :  { %2819 = vrcp.f32 %v2451_v30 }
0x109e   :  { %v2816_v63 = vpop.eup %2815 }
0x109f   :  { %v2818_v1 = vpop.eup %2817  ;;  %v2457_v3 = vmul.f32 %v2816_v63, %v2814_v55 }
0x10a0   :  { %v2456_v50 = vmul.f32 %v2818_v1, %v2454_v0  ;;  %v2820_v54 = vpop.eup %2819 }
0x10a2   :  { %v2458_v52 = vadd.f32 %v2457_v3, %v2456_v50 }
0x10a4   :  { %2821 = vtanh.f32 %v2458_v52 }
0x10ae   :  { %v2822_v44 = vpop.eup %2821 }
0x10af   :  { %v2460_v56 = vmul.f32 %v2822_v44, %v2820_v54 }
0x10b1   :  { %2461 = vst [vmem:[#allocation3 - $0x6] sm:$0xc0] %v2460_v56 }
0x10b2   :  { %2898 = shalt.err (!%p2895_p4)
}
0x10b3   :  { %s2899_s1 = scalar_lea.hbm %s4072_s4, 32 }
0x10b4   :  { %p2900_p5 = scmp.ne.s32.totalorder %s4072_s4, %s2899_s1  ;;  %p2903_p6 = scmp.lt.u32.totalorder %s2899_s1, %s4072_s4 }
0x10b6   :  { %p2905_p7 = pnand %p2903_p6, %p2900_p5 }
0x10b8   :  { %2908 = shalt.err (!%p2905_p7)
}
0x10b9   :  { %2471 = dma.vmem_to_hbm [thread:$0]  %s2469_s26, 32, %s4072_s4, [#allocation4]  }
0x10ba   :  { %2909 = dma.done.wait [#allocation4], 32  }
0x10bb   :  { %2910 = vsyncadd [#allocation4], 4294967264 }
0x10bc   :  { %2475 = vsyncpa [#allocation4], 1 }

</bundles_post_ra>
